<compile_context>
chip_gen: v7x
topology: tpu7x:2x2x1
jax: 0.10.0
libtpu: 0.0.40
codegen_flags: <defaults>
</compile_context>

<pallas_src>
import jax
import jax.numpy as jnp
from jax import lax
from jax.experimental import pallas as pl
from jax.experimental.pallas import tpu as pltpu

K = 3          # ConvTranspose2d kernel size (all three layers)
PAD = K - 1    # spatial zero-padding turning convT(s=1,p=0) into a valid correlation
LANE = 128


def _round_up(v, m):
    return (v + m - 1) // m * m


def _make_decoder_kernel(h1, w1, h2, w2, h3, w3, WS, c1p, c2p, c3p):
    """Fused 3-layer decoder kernel, one batch element per grid step.

    Flat layout convention for the padded buffers feeding layers 2/3:
    layer-(l-1) output pixel (i, j) lives at flat row (i + PAD + 1)*WS + j, so
    the bulk store offset (PAD+1)*WS is 8-sublane aligned and a tap (ky, kx)
    read of layer l starts at the non-negative static offset (ky+1)*WS + kx-PAD.
    """
    L1, L2, L3 = h1 * WS, h2 * WS, h3 * WS
    ROWS2 = (h2 + PAD + 1) * WS          # rows of padded layer-2 input buffer
    ROWS3 = (h3 + PAD + 1) * WS          # rows of padded layer-3 input buffer
    BASE = (PAD + 1) * WS                # aligned flat offset of the first real row

    def col_mask(L, wo, cp):
        # True on real output columns (j < wo), False on over-computed junk cols.
        j = lax.broadcasted_iota(jnp.int32, (L, cp), 0) % WS
        return j < wo

    def kernel(x1_ref, s1_ref, s2_ref, w1_ref, w2_ref, w3_ref,
               b1_ref, b2_ref, b3_ref, out_ref,
               pf2_ref, pf3_ref, acc_ref, im_ref):
        # Zero ONLY the border rows of the padded VMEM buffers; the interior is
        # fully overwritten every grid step (never gated on program_id).
        pf2_ref[0:BASE, :] = jnp.zeros((BASE, c1p), pf2_ref.dtype)
        pf2_ref[BASE + L1:ROWS2, :] = jnp.zeros((ROWS2 - BASE - L1, c1p), pf2_ref.dtype)
        pf3_ref[0:BASE, :] = jnp.zeros((BASE, c2p), pf3_ref.dtype)
        pf3_ref[BASE + L2:ROWS3, :] = jnp.zeros((ROWS3 - BASE - L2, c2p), pf3_ref.dtype)

        # ---- layer 1: upconv1(x) + skip1.  All 9 taps fused into ONE bf16 matmul
        # via the wrapper-built im2col LHS; skip + bias folded into the init.
        o1 = s1_ref[...] + b1_ref[...] + jnp.dot(
            x1_ref[...], w1_ref[...], preferred_element_type=jnp.float32)
        # Junk columns (j >= w1) are zeroed: inside the aligned bulk store they
        # become the next layer's left/right column padding for free.
        pf2_ref[BASE:BASE + L1, :] = jnp.where(
            col_mask(L1, w1, c1p), o1, 0.0).astype(pf2_ref.dtype)

        # ---- layers 2/3: per ky, the 3 kx taps are concatenated along K through a
        # bf16 VMEM im2col staging buffer; accumulation is ref-based.
        def conv_k3(src_ref, w_ref, acc_out_ref, L, cin_p):
            for ky in range(K):
                s = (ky + 1) * WS - PAD
                for kx in range(K):
                    im_ref[0:L, kx * cin_p:(kx + 1) * cin_p] = (
                        src_ref[s + kx:s + kx + L, :].astype(jnp.bfloat16))
                acc_out_ref[...] += jnp.dot(
                    im_ref[0:L, 0:K * cin_p], w_ref[ky],
                    preferred_element_type=jnp.float32)

        # layer 2: upconv2 + skip2 (skip + bias folded into the accumulator init)
        acc_ref[...] = s2_ref[...] + b2_ref[...]
        conv_k3(pf2_ref, w2_ref, acc_ref, L2, c1p)
        pf3_ref[BASE:BASE + L2, :] = jnp.where(
            col_mask(L2, w2, c2p), acc_ref[...], 0.0).astype(pf3_ref.dtype)

        # layer 3: upconv3 (no skip), accumulated directly into the output block
        out_ref[...] = jnp.broadcast_to(b3_ref[...], (L3, c3p))
        conv_k3(pf3_ref, w3_ref, out_ref, L3, c2p)

    return kernel


def _prep_w1(w, k1p, coutp):
    """(Cin, Cout, K, K) convT weight -> (K1P, CoutP): all 9 taps stacked along the
    contraction dim in (ky, kx, cin) order, matching the wrapper im2col LHS."""
    cin, cout = w.shape[0], w.shape[1]
    wc = jnp.transpose(w[:, :, ::-1, ::-1], (2, 3, 0, 1)).astype(jnp.float32)
    wf = wc.reshape(K * K * cin, cout)
    wf = jnp.pad(wf, ((0, k1p - K * K * cin), (0, coutp - cout)))
    return wf.astype(jnp.bfloat16)


def _prep_w_kx(w, cinp, coutp):
    """(Cin, Cout, K, K) convT weight -> (K, K*CinP, CoutP): per ky, the 3 kx taps
    stacked along the contraction dim, matching the kernel's kx-concatenated LHS."""
    cin, cout = w.shape[0], w.shape[1]
    wc = jnp.transpose(w[:, :, ::-1, ::-1], (2, 3, 0, 1)).astype(jnp.float32)
    wc = jnp.pad(wc, ((0, 0), (0, 0), (0, cinp - cin), (0, coutp - cout)))
    return wc.reshape(K, K * cinp, coutp).astype(jnp.bfloat16)


def _prep_bias(b, cp):
    return jnp.pad(b.astype(jnp.float32), (0, cp - b.shape[0])).reshape(1, cp)


def _prep_skip(s_nchw, ws, cp):
    """NCHW skip -> (N, H*WS, CP) f32, flat row stride WS (junk columns zero)."""
    n, c, h, w = s_nchw.shape
    s = jnp.transpose(s_nchw, (0, 2, 3, 1)).astype(jnp.float32)
    s = jnp.pad(s, ((0, 0), (0, 0), (0, ws - w), (0, cp - c)))
    return s.reshape(n, h * ws, cp)


@jax.jit
def simple_decoder_forward(params, x_nchw, skip1_nchw, skip2_nchw):
    """SimpleDecoder.forward(x, encoder_partial_maps) with
    encoder_partial_maps[-1] == skip1 and encoder_partial_maps[-2] == skip2.
    I/O is NCHW (PyTorch); compute is channel-last (lane axis) inside the kernel."""
    n, c0, H, W = x_nchw.shape
    c1 = params["w1"].shape[1]
    c2 = params["w2"].shape[1]
    c3 = params["w3"].shape[1]

    # Per-layer output geometry.
    h1, w1 = H + PAD, W + PAD
    h2, w2 = h1 + PAD, w1 + PAD
    h3, w3 = h2 + PAD, w2 + PAD

    # Unified flat row stride (multiple of 8, >= w3) shared by all padded buffers,
    # the skip layout and the over-computed output.
    WS = _round_up(w3, 8)

    k1p = _round_up(K * K * c0, LANE)   # layer-1 im2col contraction width (lane-dense)
    c1p = _round_up(c1, LANE)           # intermediate / output channel dims: lane-dense
    c2p = _round_up(c2, LANE)
    c3p = _round_up(c3, LANE)

    L1, L2, L3 = h1 * WS, h2 * WS, h3 * WS
    ROWS2 = (h2 + PAD + 1) * WS
    ROWS3 = (h3 + PAD + 1) * WS

    # ---- layer-1 im2col LHS built once by XLA: row i*WS + j holds the 9*c0 patch
    # of output pixel (i, j); columns j >= w1 are junk (masked inside the kernel).
    x_nhwc = jnp.transpose(x_nchw, (0, 2, 3, 1)).astype(jnp.float32)
    xpad = jnp.pad(x_nhwc, ((0, 0), (PAD, PAD), (PAD, WS - W), (0, 0)))
    patches = [xpad[:, ky:ky + h1, kx:kx + WS, :]
               for ky in range(K) for kx in range(K)]
    x1 = jnp.concatenate(patches, axis=-1).reshape(n, L1, K * K * c0)
    x1 = jnp.pad(x1, ((0, 0), (0, 0), (0, k1p - K * K * c0))).astype(jnp.bfloat16)

    s1 = _prep_skip(skip1_nchw, WS, c1p)      # (N, L1, c1p) f32
    s2 = _prep_skip(skip2_nchw, WS, c2p)      # (N, L2, c2p) f32

    w1p = _prep_w1(params["w1"], k1p, c1p)    # (k1p, c1p)        bf16
    w2p = _prep_w_kx(params["w2"], c1p, c2p)  # (K, K*c1p, c2p)   bf16
    w3p = _prep_w_kx(params["w3"], c2p, c3p)  # (K, K*c2p, c3p)   bf16
    b1p = _prep_bias(params["b1"], c1p)
    b2p = _prep_bias(params["b2"], c2p)
    b3p = _prep_bias(params["b3"], c3p)

    kernel = _make_decoder_kernel(h1, w1, h2, w2, h3, w3, WS, c1p, c2p, c3p)

    out_flat = pl.pallas_call(
        kernel,
        out_shape=jax.ShapeDtypeStruct((n, L3, c3p), jnp.float32),
        grid=(n,),
        in_specs=[
            pl.BlockSpec((None, L1, k1p), lambda i: (i, 0, 0)),     # layer-1 im2col LHS
            pl.BlockSpec((None, L1, c1p), lambda i: (i, 0, 0)),     # skip1
            pl.BlockSpec((None, L2, c2p), lambda i: (i, 0, 0)),     # skip2
            pl.BlockSpec((k1p, c1p), lambda i: (0, 0)),             # w1
            pl.BlockSpec((K, K * c1p, c2p), lambda i: (0, 0, 0)),   # w2 (kx-concat)
            pl.BlockSpec((K, K * c2p, c3p), lambda i: (0, 0, 0)),   # w3 (kx-concat)
            pl.BlockSpec((1, c1p), lambda i: (0, 0)),               # b1
            pl.BlockSpec((1, c2p), lambda i: (0, 0)),               # b2
            pl.BlockSpec((1, c3p), lambda i: (0, 0)),               # b3
        ],
        out_specs=pl.BlockSpec((None, L3, c3p), lambda i: (i, 0, 0)),
        scratch_shapes=[
            pltpu.VMEM((ROWS2, c1p), jnp.float32),        # padded layer-2 input
            pltpu.VMEM((ROWS3, c2p), jnp.float32),        # padded layer-3 input
            pltpu.VMEM((L2, c2p), jnp.float32),           # layer-2 accumulator
            pltpu.VMEM((L3, K * c1p), jnp.bfloat16),      # kx-concat im2col staging
        ],
        compiler_params=pltpu.CompilerParams(
            dimension_semantics=("parallel",)),
    )(x1, s1, s2, w1p, w2p, w3p, b1p, b2p, b3p)

    # Drop the over-computed columns and channel padding, back to NCHW.
    out = out_flat.reshape(n, h3, WS, c3p)[:, :, :w3, :c3]
    return jnp.transpose(out, (0, 3, 1, 2))


def init_params(key, input_channels, output_channels):
    """Deterministic synthetic parameters matching SimpleDecoder.__init__ shapes."""
    ks = jax.random.split(key, 6)

    def u(k, shape, fan_in):
        bound = 1.0 / jnp.sqrt(float(fan_in * K * K))
        return jax.random.uniform(k, shape, jnp.float32, -bound, bound)

    return {
        "w1": u(ks[0], (input_channels, 64, K, K), input_channels),
        "b1": u(ks[1], (64,), input_channels),
        "w2": u(ks[2], (64, 32, K, K), 64),
        "b2": u(ks[3], (32,), 64),
        "w3": u(ks[4], (32, output_channels, K, K), 32),
        "b3": u(ks[5], (output_channels,), 32),
    }


def _ref_convT(x_nchw, w, b):
    """Pure-JAX reference for ConvTranspose2d(stride=1, padding=0)."""
    rhs = jnp.transpose(w[:, :, ::-1, ::-1], (1, 0, 2, 3))  # (Cout, Cin, K, K)
    out = lax.conv_general_dilated(
        x_nchw, rhs, window_strides=(1, 1),
        padding=((K - 1, K - 1), (K - 1, K - 1)),
        dimension_numbers=("NCHW", "OIHW", "NCHW"))
    return out + b[None, :, None, None]


def _ref_forward(params, x, skip1, skip2):
    x = _ref_convT(x, params["w1"], params["b1"]) + skip1
    x = _ref_convT(x, params["w2"], params["b2"]) + skip2
    x = _ref_convT(x, params["w3"], params["b3"])
    return x


if __name__ == "__main__":
    key = jax.random.PRNGKey(0)
    k_p, k_x, k_s1, k_s2 = jax.random.split(key, 4)

    N, Cin, H, W = 2, 4, 8, 8
    Cout_final = 3
    params = init_params(k_p, Cin, Cout_final)

    x = jax.random.normal(k_x, (N, Cin, H, W), jnp.float32)
    skip1 = jax.random.normal(k_s1, (N, 64, H + 2, W + 2), jnp.float32)   # maps[-1]
    skip2 = jax.random.normal(k_s2, (N, 32, H + 4, W + 4), jnp.float32)   # maps[-2]
    # encoder_partial_maps == [skip2, skip1] (last element added first, as in forward)

    out = simple_decoder_forward(params, x, skip1, skip2)
    out = jax.block_until_ready(out)

    ref = _ref_forward(params, x, skip1, skip2)
    assert out.shape == (N, Cout_final, H + 6, W + 6), out.shape
    # bf16 MXU operands with f32 accumulation -> looser tolerance than pure f32.
    max_err = float(jnp.max(jnp.abs(out - ref)))
    assert jnp.allclose(out, ref, atol=5e-2, rtol=5e-2), max_err

    print("KERNEL_OK")
</pallas_src>

<mosaic_0001>
module attributes {stable_mosaic.version = 11 : i64} {
  func.func @kernel(%arg0: i32, %arg1: memref<1x160x128xbf16, #tpu.memory_space<vmem>>, %arg2: memref<1x160x128xf32, #tpu.memory_space<vmem>>, %arg3: memref<1x192x128xf32, #tpu.memory_space<vmem>>, %arg4: memref<128x128xbf16, #tpu.memory_space<vmem>>, %arg5: memref<3x384x128xbf16, #tpu.memory_space<vmem>>, %arg6: memref<3x384x128xbf16, #tpu.memory_space<vmem>>, %arg7: memref<1x128xf32, #tpu.memory_space<vmem>>, %arg8: memref<1x128xf32, #tpu.memory_space<vmem>>, %arg9: memref<1x128xf32, #tpu.memory_space<vmem>>, %arg10: memref<1x224x128xf32, #tpu.memory_space<vmem>>, %arg11: memref<240x128xf32, #tpu.memory_space<vmem>>, %arg12: memref<272x128xf32, #tpu.memory_space<vmem>>, %arg13: memref<192x128xf32, #tpu.memory_space<vmem>>, %arg14: memref<224x384xbf16, #tpu.memory_space<vmem>>) attributes {dimension_semantics = [#tpu.dimension_semantics<parallel>], iteration_bounds = array<i64: 2>, scalar_prefetch = 0 : i64, scratch_operands = 4 : i64, tpu.core_type = #tpu.core_type<tc>, window_params = [{transform_indices = @transform_0, window_bounds = array<i64: 1, 160, 128>}, {transform_indices = @transform_1, window_bounds = array<i64: 1, 160, 128>}, {transform_indices = @transform_2, window_bounds = array<i64: 1, 192, 128>}, {pipeline_mode = #tpu.pipeline_mode<synchronous>, transform_indices = @transform_3, window_bounds = array<i64: 128, 128>}, {pipeline_mode = #tpu.pipeline_mode<synchronous>, transform_indices = @transform_4, window_bounds = array<i64: 3, 384, 128>}, {pipeline_mode = #tpu.pipeline_mode<synchronous>, transform_indices = @transform_5, window_bounds = array<i64: 3, 384, 128>}, {pipeline_mode = #tpu.pipeline_mode<synchronous>, transform_indices = @transform_6, window_bounds = array<i64: 1, 128>}, {pipeline_mode = #tpu.pipeline_mode<synchronous>, transform_indices = @transform_7, window_bounds = array<i64: 1, 128>}, {pipeline_mode = #tpu.pipeline_mode<synchronous>, transform_indices = @transform_8, window_bounds = array<i64: 1, 128>}, {transform_indices = @transform_9, window_bounds = array<i64: 1, 224, 128>}]} {
    %cst = arith.constant 0.000000e+00 : f32
    %0 = vector.broadcast %cst : f32 to vector<48x128xf32>
    %c0 = arith.constant 0 : index
    %c0_0 = arith.constant 0 : index
    %1 = vector.load %arg11[%c0, %c0_0] : memref<240x128xf32, #tpu.memory_space<vmem>>, vector<48x128xf32>
    tpu.vector_store %arg11[%c0, %c0_0], %0 {strides = array<i32>} : memref<240x128xf32, #tpu.memory_space<vmem>>, vector<48x128xf32>,
    %cst_1 = arith.constant 0.000000e+00 : f32
    %2 = vector.broadcast %cst_1 : f32 to vector<32x128xf32>
    %c208 = arith.constant 208 : index
    %c0_2 = arith.constant 0 : index
    %3 = vector.load %arg11[%c208, %c0_2] : memref<240x128xf32, #tpu.memory_space<vmem>>, vector<32x128xf32>
    tpu.vector_store %arg11[%c208, %c0_2], %2 {strides = array<i32>} : memref<240x128xf32, #tpu.memory_space<vmem>>, vector<32x128xf32>,
    %cst_3 = arith.constant 0.000000e+00 : f32
    %4 = vector.broadcast %cst_3 : f32 to vector<48x128xf32>
    %c0_4 = arith.constant 0 : index
    %c0_5 = arith.constant 0 : index
    %5 = vector.load %arg12[%c0_4, %c0_5] : memref<272x128xf32, #tpu.memory_space<vmem>>, vector<48x128xf32>
    tpu.vector_store %arg12[%c0_4, %c0_5], %4 {strides = array<i32>} : memref<272x128xf32, #tpu.memory_space<vmem>>, vector<48x128xf32>,
    %cst_6 = arith.constant 0.000000e+00 : f32
    %6 = vector.broadcast %cst_6 : f32 to vector<32x128xf32>
    %c240 = arith.constant 240 : index
    %c0_7 = arith.constant 0 : index
    %7 = vector.load %arg12[%c240, %c0_7] : memref<272x128xf32, #tpu.memory_space<vmem>>, vector<32x128xf32>
    tpu.vector_store %arg12[%c240, %c0_7], %6 {strides = array<i32>} : memref<272x128xf32, #tpu.memory_space<vmem>>, vector<32x128xf32>,
    %c0_8 = arith.constant 0 : index
    %c0_9 = arith.constant 0 : index
    %c0_10 = arith.constant 0 : index
    %8 = vector.load %arg2[%c0_8, %c0_9, %c0_10] : memref<1x160x128xf32, #tpu.memory_space<vmem>>, vector<1x160x128xf32>
    %9 = vector.shape_cast %8 : vector<1x160x128xf32> to vector<160x128xf32>
    %c0_11 = arith.constant 0 : index
    %c0_12 = arith.constant 0 : index
    %10 = vector.load %arg7[%c0_11, %c0_12] : memref<1x128xf32, #tpu.memory_space<vmem>>, vector<1x128xf32>
    %11 = vector.broadcast %10 : vector<1x128xf32> to vector<160x128xf32>
    %12 = arith.addf %9, %11 : vector<160x128xf32>
    %c0_13 = arith.constant 0 : index
    %c0_14 = arith.constant 0 : index
    %c0_15 = arith.constant 0 : index
    %13 = vector.load %arg1[%c0_13, %c0_14, %c0_15] : memref<1x160x128xbf16, #tpu.memory_space<vmem>>, vector<1x160x128xbf16>
    %14 = vector.shape_cast %13 : vector<1x160x128xbf16> to vector<160x128xbf16>
    %c0_16 = arith.constant 0 : index
    %c0_17 = arith.constant 0 : index
    %15 = vector.load %arg4[%c0_16, %c0_17] : memref<128x128xbf16, #tpu.memory_space<vmem>>, vector<128x128xbf16>
    %cst_18 = arith.constant dense<0.000000e+00> : vector<160x128xf32>
    %16 = tpu.matmul %14, %15, %cst_18 {dimension_numbers = #tpu.dot_dimension_numbers<[1], [0], [0], [1], [0, 0, 1, 1], [], []>} : vector<160x128xbf16>, vector<128x128xbf16>, vector<160x128xf32> -> vector<160x128xf32>
    %17 = arith.addf %12, %16 : vector<160x128xf32>
    %18 = tpu.iota {dimensions = array<i32: 0>} : vector<160x128xi32>
    %c16_i32 = arith.constant 16 : i32
    %c0_i32 = arith.constant 0 : i32
    %19 = arith.cmpi eq, %c16_i32, %c0_i32 : i32
    %c1_i32 = arith.constant 1 : i32
    %20 = arith.select %19, %c1_i32, %c16_i32 : i32
    %21 = vector.broadcast %20 : i32 to vector<160x128xi32>
    %22 = arith.remsi %18, %21 : vector<160x128xi32>
    %c0_i32_19 = arith.constant 0 : i32
    %23 = vector.broadcast %c0_i32_19 : i32 to vector<160x128xi32>
    %24 = arith.cmpi ne, %22, %23 : vector<160x128xi32>
    %c0_i32_20 = arith.constant 0 : i32
    %25 = vector.broadcast %c0_i32_20 : i32 to vector<160x128xi32>
    %26 = arith.cmpi slt, %22, %25 : vector<160x128xi32>
    %c0_i32_21 = arith.constant 0 : i32
    %27 = arith.cmpi slt, %20, %c0_i32_21 : i32
    %28 = vector.broadcast %27 : i1 to vector<160x128xi1>
    %29 = vector.broadcast %28 : vector<160x128xi1> to vector<160x128xi1>
    %30 = arith.xori %26, %29 : vector<160x128xi1>
    %31 = arith.andi %30, %24 : vector<160x128xi1>
    %32 = vector.broadcast %20 : i32 to vector<160x128xi32>
    %33 = arith.addi %22, %32 : vector<160x128xi32>
    %34 = arith.select %31, %33, %22 : vector<160x128xi1>, vector<160x128xi32>
    %c10_i32 = arith.constant 10 : i32
    %35 = vector.broadcast %c10_i32 : i32 to vector<160x128xi32>
    %36 = arith.cmpi slt, %34, %35 : vector<160x128xi32>
    %cst_22 = arith.constant 0.000000e+00 : f32
    %37 = vector.broadcast %cst_22 : f32 to vector<160x128xf32>
    %38 = arith.select %36, %17, %37 : vector<160x128xi1>, vector<160x128xf32>
    %c48 = arith.constant 48 : index
    %c0_23 = arith.constant 0 : index
    %39 = vector.load %arg11[%c48, %c0_23] : memref<240x128xf32, #tpu.memory_space<vmem>>, vector<160x128xf32>
    tpu.vector_store %arg11[%c48, %c0_23], %38 {strides = array<i32>} : memref<240x128xf32, #tpu.memory_space<vmem>>, vector<160x128xf32>,
    %c0_24 = arith.constant 0 : index
    %c0_25 = arith.constant 0 : index
    %c0_26 = arith.constant 0 : index
    %40 = vector.load %arg3[%c0_24, %c0_25, %c0_26] : memref<1x192x128xf32, #tpu.memory_space<vmem>>, vector<1x192x128xf32>
    %41 = vector.shape_cast %40 : vector<1x192x128xf32> to vector<192x128xf32>
    %c0_27 = arith.constant 0 : index
    %c0_28 = arith.constant 0 : index
    %42 = vector.load %arg8[%c0_27, %c0_28] : memref<1x128xf32, #tpu.memory_space<vmem>>, vector<1x128xf32>
    %43 = vector.broadcast %42 : vector<1x128xf32> to vector<192x128xf32>
    %44 = arith.addf %41, %43 : vector<192x128xf32>
    %c0_29 = arith.constant 0 : index
    %c0_30 = arith.constant 0 : index
    %45 = vector.load %arg13[%c0_29, %c0_30] : memref<192x128xf32, #tpu.memory_space<vmem>>, vector<192x128xf32>
    tpu.vector_store %arg13[%c0_29, %c0_30], %44 {strides = array<i32>} : memref<192x128xf32, #tpu.memory_space<vmem>>, vector<192x128xf32>,
    %c14 = arith.constant 14 : index
    %c0_31 = arith.constant 0 : index
    %46 = vector.load %arg11[%c14, %c0_31] : memref<240x128xf32, #tpu.memory_space<vmem>>, vector<192x128xf32>
    %47 = arith.truncf %46 : vector<192x128xf32> to vector<192x128xbf16>
    %c0_32 = arith.constant 0 : index
    %c0_33 = arith.constant 0 : index
    %48 = vector.load %arg14[%c0_32, %c0_33] : memref<224x384xbf16, #tpu.memory_space<vmem>>, vector<192x128xbf16>
    tpu.vector_store %arg14[%c0_32, %c0_33], %47 {strides = array<i32>} : memref<224x384xbf16, #tpu.memory_space<vmem>>, vector<192x128xbf16>,
    %c15 = arith.constant 15 : index
    %c0_34 = arith.constant 0 : index
    %49 = vector.load %arg11[%c15, %c0_34] : memref<240x128xf32, #tpu.memory_space<vmem>>, vector<192x128xf32>
    %50 = arith.truncf %49 : vector<192x128xf32> to vector<192x128xbf16>
    %c0_35 = arith.constant 0 : index
    %c128 = arith.constant 128 : index
    %51 = vector.load %arg14[%c0_35, %c128] : memref<224x384xbf16, #tpu.memory_space<vmem>>, vector<192x128xbf16>
    tpu.vector_store %arg14[%c0_35, %c128], %50 {strides = array<i32>} : memref<224x384xbf16, #tpu.memory_space<vmem>>, vector<192x128xbf16>,
    %c16 = arith.constant 16 : index
    %c0_36 = arith.constant 0 : index
    %52 = vector.load %arg11[%c16, %c0_36] : memref<240x128xf32, #tpu.memory_space<vmem>>, vector<192x128xf32>
    %53 = arith.truncf %52 : vector<192x128xf32> to vector<192x128xbf16>
    %c0_37 = arith.constant 0 : index
    %c256 = arith.constant 256 : index
    %54 = vector.load %arg14[%c0_37, %c256] : memref<224x384xbf16, #tpu.memory_space<vmem>>, vector<192x128xbf16>
    tpu.vector_store %arg14[%c0_37, %c256], %53 {strides = array<i32>} : memref<224x384xbf16, #tpu.memory_space<vmem>>, vector<192x128xbf16>,
    %c0_38 = arith.constant 0 : index
    %c0_39 = arith.constant 0 : index
    %55 = vector.load %arg13[%c0_38, %c0_39] : memref<192x128xf32, #tpu.memory_space<vmem>>, vector<192x128xf32>
    %c0_40 = arith.constant 0 : index
    %c0_41 = arith.constant 0 : index
    %56 = vector.load %arg14[%c0_40, %c0_41] : memref<224x384xbf16, #tpu.memory_space<vmem>>, vector<192x384xbf16>
    %c0_42 = arith.constant 0 : index
    %c0_43 = arith.constant 0 : index
    %c0_44 = arith.constant 0 : index
    %57 = vector.load %arg5[%c0_42, %c0_43, %c0_44] : memref<3x384x128xbf16, #tpu.memory_space<vmem>>, vector<1x384x128xbf16>
    %58 = vector.shape_cast %57 : vector<1x384x128xbf16> to vector<384x128xbf16>
    %cst_45 = arith.constant dense<0.000000e+00> : vector<192x128xf32>
    %59 = tpu.matmul %56, %58, %cst_45 {dimension_numbers = #tpu.dot_dimension_numbers<[1], [0], [0], [1], [0, 0, 1, 1], [], []>} : vector<192x384xbf16>, vector<384x128xbf16>, vector<192x128xf32> -> vector<192x128xf32>
    %60 = arith.addf %55, %59 : vector<192x128xf32>
    %c0_46 = arith.constant 0 : index
    %c0_47 = arith.constant 0 : index
    %61 = vector.load %arg13[%c0_46, %c0_47] : memref<192x128xf32, #tpu.memory_space<vmem>>, vector<192x128xf32>
    tpu.vector_store %arg13[%c0_46, %c0_47], %60 {strides = array<i32>} : memref<192x128xf32, #tpu.memory_space<vmem>>, vector<192x128xf32>,
    %c30 = arith.constant 30 : index
    %c0_48 = arith.constant 0 : index
    %62 = vector.load %arg11[%c30, %c0_48] : memref<240x128xf32, #tpu.memory_space<vmem>>, vector<192x128xf32>
    %63 = arith.truncf %62 : vector<192x128xf32> to vector<192x128xbf16>
    %c0_49 = arith.constant 0 : index
    %c0_50 = arith.constant 0 : index
    %64 = vector.load %arg14[%c0_49, %c0_50] : memref<224x384xbf16, #tpu.memory_space<vmem>>, vector<192x128xbf16>
    tpu.vector_store %arg14[%c0_49, %c0_50], %63 {strides = array<i32>} : memref<224x384xbf16, #tpu.memory_space<vmem>>, vector<192x128xbf16>,
    %c31 = arith.constant 31 : index
    %c0_51 = arith.constant 0 : index
    %65 = vector.load %arg11[%c31, %c0_51] : memref<240x128xf32, #tpu.memory_space<vmem>>, vector<192x128xf32>
    %66 = arith.truncf %65 : vector<192x128xf32> to vector<192x128xbf16>
    %c0_52 = arith.constant 0 : index
    %c128_53 = arith.constant 128 : index
    %67 = vector.load %arg14[%c0_52, %c128_53] : memref<224x384xbf16, #tpu.memory_space<vmem>>, vector<192x128xbf16>
    tpu.vector_store %arg14[%c0_52, %c128_53], %66 {strides = array<i32>} : memref<224x384xbf16, #tpu.memory_space<vmem>>, vector<192x128xbf16>,
    %c32 = arith.constant 32 : index
    %c0_54 = arith.constant 0 : index
    %68 = vector.load %arg11[%c32, %c0_54] : memref<240x128xf32, #tpu.memory_space<vmem>>, vector<192x128xf32>
    %69 = arith.truncf %68 : vector<192x128xf32> to vector<192x128xbf16>
    %c0_55 = arith.constant 0 : index
    %c256_56 = arith.constant 256 : index
    %70 = vector.load %arg14[%c0_55, %c256_56] : memref<224x384xbf16, #tpu.memory_space<vmem>>, vector<192x128xbf16>
    tpu.vector_store %arg14[%c0_55, %c256_56], %69 {strides = array<i32>} : memref<224x384xbf16, #tpu.memory_space<vmem>>, vector<192x128xbf16>,
    %c0_57 = arith.constant 0 : index
    %c0_58 = arith.constant 0 : index
    %71 = vector.load %arg13[%c0_57, %c0_58] : memref<192x128xf32, #tpu.memory_space<vmem>>, vector<192x128xf32>
    %c0_59 = arith.constant 0 : index
    %c0_60 = arith.constant 0 : index
    %72 = vector.load %arg14[%c0_59, %c0_60] : memref<224x384xbf16, #tpu.memory_space<vmem>>, vector<192x384xbf16>
    %c1 = arith.constant 1 : index
    %c0_61 = arith.constant 0 : index
    %c0_62 = arith.constant 0 : index
    %73 = vector.load %arg5[%c1, %c0_61, %c0_62] : memref<3x384x128xbf16, #tpu.memory_space<vmem>>, vector<1x384x128xbf16>
    %74 = vector.shape_cast %73 : vector<1x384x128xbf16> to vector<384x128xbf16>
    %cst_63 = arith.constant dense<0.000000e+00> : vector<192x128xf32>
    %75 = tpu.matmul %72, %74, %cst_63 {dimension_numbers = #tpu.dot_dimension_numbers<[1], [0], [0], [1], [0, 0, 1, 1], [], []>} : vector<192x384xbf16>, vector<384x128xbf16>, vector<192x128xf32> -> vector<192x128xf32>
    %76 = arith.addf %71, %75 : vector<192x128xf32>
    %c0_64 = arith.constant 0 : index
    %c0_65 = arith.constant 0 : index
    %77 = vector.load %arg13[%c0_64, %c0_65] : memref<192x128xf32, #tpu.memory_space<vmem>>, vector<192x128xf32>
    tpu.vector_store %arg13[%c0_64, %c0_65], %76 {strides = array<i32>} : memref<192x128xf32, #tpu.memory_space<vmem>>, vector<192x128xf32>,
    %c46 = arith.constant 46 : index
    %c0_66 = arith.constant 0 : index
    %78 = vector.load %arg11[%c46, %c0_66] : memref<240x128xf32, #tpu.memory_space<vmem>>, vector<192x128xf32>
    %79 = arith.truncf %78 : vector<192x128xf32> to vector<192x128xbf16>
    %c0_67 = arith.constant 0 : index
    %c0_68 = arith.constant 0 : index
    %80 = vector.load %arg14[%c0_67, %c0_68] : memref<224x384xbf16, #tpu.memory_space<vmem>>, vector<192x128xbf16>
    tpu.vector_store %arg14[%c0_67, %c0_68], %79 {strides = array<i32>} : memref<224x384xbf16, #tpu.memory_space<vmem>>, vector<192x128xbf16>,
    %c47 = arith.constant 47 : index
    %c0_69 = arith.constant 0 : index
    %81 = vector.load %arg11[%c47, %c0_69] : memref<240x128xf32, #tpu.memory_space<vmem>>, vector<192x128xf32>
    %82 = arith.truncf %81 : vector<192x128xf32> to vector<192x128xbf16>
    %c0_70 = arith.constant 0 : index
    %c128_71 = arith.constant 128 : index
    %83 = vector.load %arg14[%c0_70, %c128_71] : memref<224x384xbf16, #tpu.memory_space<vmem>>, vector<192x128xbf16>
    tpu.vector_store %arg14[%c0_70, %c128_71], %82 {strides = array<i32>} : memref<224x384xbf16, #tpu.memory_space<vmem>>, vector<192x128xbf16>,
    %c48_72 = arith.constant 48 : index
    %c0_73 = arith.constant 0 : index
    %84 = vector.load %arg11[%c48_72, %c0_73] : memref<240x128xf32, #tpu.memory_space<vmem>>, vector<192x128xf32>
    %85 = arith.truncf %84 : vector<192x128xf32> to vector<192x128xbf16>
    %c0_74 = arith.constant 0 : index
    %c256_75 = arith.constant 256 : index
    %86 = vector.load %arg14[%c0_74, %c256_75] : memref<224x384xbf16, #tpu.memory_space<vmem>>, vector<192x128xbf16>
    tpu.vector_store %arg14[%c0_74, %c256_75], %85 {strides = array<i32>} : memref<224x384xbf16, #tpu.memory_space<vmem>>, vector<192x128xbf16>,
    %c0_76 = arith.constant 0 : index
    %c0_77 = arith.constant 0 : index
    %87 = vector.load %arg13[%c0_76, %c0_77] : memref<192x128xf32, #tpu.memory_space<vmem>>, vector<192x128xf32>
    %c0_78 = arith.constant 0 : index
    %c0_79 = arith.constant 0 : index
    %88 = vector.load %arg14[%c0_78, %c0_79] : memref<224x384xbf16, #tpu.memory_space<vmem>>, vector<192x384xbf16>
    %c2 = arith.constant 2 : index
    %c0_80 = arith.constant 0 : index
    %c0_81 = arith.constant 0 : index
    %89 = vector.load %arg5[%c2, %c0_80, %c0_81] : memref<3x384x128xbf16, #tpu.memory_space<vmem>>, vector<1x384x128xbf16>
    %90 = vector.shape_cast %89 : vector<1x384x128xbf16> to vector<384x128xbf16>
    %cst_82 = arith.constant dense<0.000000e+00> : vector<192x128xf32>
    %91 = tpu.matmul %88, %90, %cst_82 {dimension_numbers = #tpu.dot_dimension_numbers<[1], [0], [0], [1], [0, 0, 1, 1], [], []>} : vector<192x384xbf16>, vector<384x128xbf16>, vector<192x128xf32> -> vector<192x128xf32>
    %92 = arith.addf %87, %91 : vector<192x128xf32>
    %c0_83 = arith.constant 0 : index
    %c0_84 = arith.constant 0 : index
    %93 = vector.load %arg13[%c0_83, %c0_84] : memref<192x128xf32, #tpu.memory_space<vmem>>, vector<192x128xf32>
    tpu.vector_store %arg13[%c0_83, %c0_84], %92 {strides = array<i32>} : memref<192x128xf32, #tpu.memory_space<vmem>>, vector<192x128xf32>,
    %94 = tpu.iota {dimensions = array<i32: 0>} : vector<192x128xi32>
    %c16_i32_85 = arith.constant 16 : i32
    %c0_i32_86 = arith.constant 0 : i32
    %95 = arith.cmpi eq, %c16_i32_85, %c0_i32_86 : i32
    %c1_i32_87 = arith.constant 1 : i32
    %96 = arith.select %95, %c1_i32_87, %c16_i32_85 : i32
    %97 = vector.broadcast %96 : i32 to vector<192x128xi32>
    %98 = arith.remsi %94, %97 : vector<192x128xi32>
    %c0_i32_88 = arith.constant 0 : i32
    %99 = vector.broadcast %c0_i32_88 : i32 to vector<192x128xi32>
    %100 = arith.cmpi ne, %98, %99 : vector<192x128xi32>
    %c0_i32_89 = arith.constant 0 : i32
    %101 = vector.broadcast %c0_i32_89 : i32 to vector<192x128xi32>
    %102 = arith.cmpi slt, %98, %101 : vector<192x128xi32>
    %c0_i32_90 = arith.constant 0 : i32
    %103 = arith.cmpi slt, %96, %c0_i32_90 : i32
    %104 = vector.broadcast %103 : i1 to vector<192x128xi1>
    %105 = vector.broadcast %104 : vector<192x128xi1> to vector<192x128xi1>
    %106 = arith.xori %102, %105 : vector<192x128xi1>
    %107 = arith.andi %106, %100 : vector<192x128xi1>
    %108 = vector.broadcast %96 : i32 to vector<192x128xi32>
    %109 = arith.addi %98, %108 : vector<192x128xi32>
    %110 = arith.select %107, %109, %98 : vector<192x128xi1>, vector<192x128xi32>
    %c12_i32 = arith.constant 12 : i32
    %111 = vector.broadcast %c12_i32 : i32 to vector<192x128xi32>
    %112 = arith.cmpi slt, %110, %111 : vector<192x128xi32>
    %c0_91 = arith.constant 0 : index
    %c0_92 = arith.constant 0 : index
    %113 = vector.load %arg13[%c0_91, %c0_92] : memref<192x128xf32, #tpu.memory_space<vmem>>, vector<192x128xf32>
    %cst_93 = arith.constant 0.000000e+00 : f32
    %114 = vector.broadcast %cst_93 : f32 to vector<192x128xf32>
    %115 = arith.select %112, %113, %114 : vector<192x128xi1>, vector<192x128xf32>
    %c48_94 = arith.constant 48 : index
    %c0_95 = arith.constant 0 : index
    %116 = vector.load %arg12[%c48_94, %c0_95] : memref<272x128xf32, #tpu.memory_space<vmem>>, vector<192x128xf32>
    tpu.vector_store %arg12[%c48_94, %c0_95], %115 {strides = array<i32>} : memref<272x128xf32, #tpu.memory_space<vmem>>, vector<192x128xf32>,
    %c0_96 = arith.constant 0 : index
    %c0_97 = arith.constant 0 : index
    %117 = vector.load %arg9[%c0_96, %c0_97] : memref<1x128xf32, #tpu.memory_space<vmem>>, vector<1x128xf32>
    %118 = vector.shape_cast %117 : vector<1x128xf32> to vector<1x128xf32>
    %119 = vector.broadcast %118 : vector<1x128xf32> to vector<224x128xf32>
    %c0_98 = arith.constant 0 : index
    %c0_99 = arith.constant 0 : index
    %c0_100 = arith.constant 0 : index
    %120 = vector.load %arg10[%c0_98, %c0_99, %c0_100] : memref<1x224x128xf32, #tpu.memory_space<vmem>>, vector<1x224x128xf32>
    %121 = vector.shape_cast %120 : vector<1x224x128xf32> to vector<224x128xf32>
    %122 = vector.shape_cast %119 : vector<224x128xf32> to vector<1x224x128xf32>
    tpu.vector_store %arg10[%c0_98, %c0_99, %c0_100], %122 {strides = array<i32>} : memref<1x224x128xf32, #tpu.memory_space<vmem>>, vector<1x224x128xf32>,
    %c14_101 = arith.constant 14 : index
    %c0_102 = arith.constant 0 : index
    %123 = vector.load %arg12[%c14_101, %c0_102] : memref<272x128xf32, #tpu.memory_space<vmem>>, vector<224x128xf32>
    %124 = arith.truncf %123 : vector<224x128xf32> to vector<224x128xbf16>
    %c0_103 = arith.constant 0 : index
    %c0_104 = arith.constant 0 : index
    %125 = vector.load %arg14[%c0_103, %c0_104] : memref<224x384xbf16, #tpu.memory_space<vmem>>, vector<224x128xbf16>
    tpu.vector_store %arg14[%c0_103, %c0_104], %124 {strides = array<i32>} : memref<224x384xbf16, #tpu.memory_space<vmem>>, vector<224x128xbf16>,
    %c15_105 = arith.constant 15 : index
    %c0_106 = arith.constant 0 : index
    %126 = vector.load %arg12[%c15_105, %c0_106] : memref<272x128xf32, #tpu.memory_space<vmem>>, vector<224x128xf32>
    %127 = arith.truncf %126 : vector<224x128xf32> to vector<224x128xbf16>
    %c0_107 = arith.constant 0 : index
    %c128_108 = arith.constant 128 : index
    %128 = vector.load %arg14[%c0_107, %c128_108] : memref<224x384xbf16, #tpu.memory_space<vmem>>, vector<224x128xbf16>
    tpu.vector_store %arg14[%c0_107, %c128_108], %127 {strides = array<i32>} : memref<224x384xbf16, #tpu.memory_space<vmem>>, vector<224x128xbf16>,
    %c16_109 = arith.constant 16 : index
    %c0_110 = arith.constant 0 : index
    %129 = vector.load %arg12[%c16_109, %c0_110] : memref<272x128xf32, #tpu.memory_space<vmem>>, vector<224x128xf32>
    %130 = arith.truncf %129 : vector<224x128xf32> to vector<224x128xbf16>
    %c0_111 = arith.constant 0 : index
    %c256_112 = arith.constant 256 : index
    %131 = vector.load %arg14[%c0_111, %c256_112] : memref<224x384xbf16, #tpu.memory_space<vmem>>, vector<224x128xbf16>
    tpu.vector_store %arg14[%c0_111, %c256_112], %130 {strides = array<i32>} : memref<224x384xbf16, #tpu.memory_space<vmem>>, vector<224x128xbf16>,
    %c0_113 = arith.constant 0 : index
    %c0_114 = arith.constant 0 : index
    %c0_115 = arith.constant 0 : index
    %132 = vector.load %arg10[%c0_113, %c0_114, %c0_115] : memref<1x224x128xf32, #tpu.memory_space<vmem>>, vector<1x224x128xf32>
    %133 = vector.shape_cast %132 : vector<1x224x128xf32> to vector<224x128xf32>
    %c0_116 = arith.constant 0 : index
    %c0_117 = arith.constant 0 : index
    %134 = vector.load %arg14[%c0_116, %c0_117] : memref<224x384xbf16, #tpu.memory_space<vmem>>, vector<224x384xbf16>
    %c0_118 = arith.constant 0 : index
    %c0_119 = arith.constant 0 : index
    %c0_120 = arith.constant 0 : index
    %135 = vector.load %arg6[%c0_118, %c0_119, %c0_120] : memref<3x384x128xbf16, #tpu.memory_space<vmem>>, vector<1x384x128xbf16>
    %136 = vector.shape_cast %135 : vector<1x384x128xbf16> to vector<384x128xbf16>
    %cst_121 = arith.constant dense<0.000000e+00> : vector<224x128xf32>
    %137 = tpu.matmul %134, %136, %cst_121 {dimension_numbers = #tpu.dot_dimension_numbers<[1], [0], [0], [1], [0, 0, 1, 1], [], []>} : vector<224x384xbf16>, vector<384x128xbf16>, vector<224x128xf32> -> vector<224x128xf32>
    %138 = arith.addf %133, %137 : vector<224x128xf32>
    %c0_122 = arith.constant 0 : index
    %c0_123 = arith.constant 0 : index
    %c0_124 = arith.constant 0 : index
    %139 = vector.load %arg10[%c0_122, %c0_123, %c0_124] : memref<1x224x128xf32, #tpu.memory_space<vmem>>, vector<1x224x128xf32>
    %140 = vector.shape_cast %139 : vector<1x224x128xf32> to vector<224x128xf32>
    %141 = vector.shape_cast %138 : vector<224x128xf32> to vector<1x224x128xf32>
    tpu.vector_store %arg10[%c0_122, %c0_123, %c0_124], %141 {strides = array<i32>} : memref<1x224x128xf32, #tpu.memory_space<vmem>>, vector<1x224x128xf32>,
    %c30_125 = arith.constant 30 : index
    %c0_126 = arith.constant 0 : index
    %142 = vector.load %arg12[%c30_125, %c0_126] : memref<272x128xf32, #tpu.memory_space<vmem>>, vector<224x128xf32>
    %143 = arith.truncf %142 : vector<224x128xf32> to vector<224x128xbf16>
    %c0_127 = arith.constant 0 : index
    %c0_128 = arith.constant 0 : index
    %144 = vector.load %arg14[%c0_127, %c0_128] : memref<224x384xbf16, #tpu.memory_space<vmem>>, vector<224x128xbf16>
    tpu.vector_store %arg14[%c0_127, %c0_128], %143 {strides = array<i32>} : memref<224x384xbf16, #tpu.memory_space<vmem>>, vector<224x128xbf16>,
    %c31_129 = arith.constant 31 : index
    %c0_130 = arith.constant 0 : index
    %145 = vector.load %arg12[%c31_129, %c0_130] : memref<272x128xf32, #tpu.memory_space<vmem>>, vector<224x128xf32>
    %146 = arith.truncf %145 : vector<224x128xf32> to vector<224x128xbf16>
    %c0_131 = arith.constant 0 : index
    %c128_132 = arith.constant 128 : index
    %147 = vector.load %arg14[%c0_131, %c128_132] : memref<224x384xbf16, #tpu.memory_space<vmem>>, vector<224x128xbf16>
    tpu.vector_store %arg14[%c0_131, %c128_132], %146 {strides = array<i32>} : memref<224x384xbf16, #tpu.memory_space<vmem>>, vector<224x128xbf16>,
    %c32_133 = arith.constant 32 : index
    %c0_134 = arith.constant 0 : index
    %148 = vector.load %arg12[%c32_133, %c0_134] : memref<272x128xf32, #tpu.memory_space<vmem>>, vector<224x128xf32>
    %149 = arith.truncf %148 : vector<224x128xf32> to vector<224x128xbf16>
    %c0_135 = arith.constant 0 : index
    %c256_136 = arith.constant 256 : index
    %150 = vector.load %arg14[%c0_135, %c256_136] : memref<224x384xbf16, #tpu.memory_space<vmem>>, vector<224x128xbf16>
    tpu.vector_store %arg14[%c0_135, %c256_136], %149 {strides = array<i32>} : memref<224x384xbf16, #tpu.memory_space<vmem>>, vector<224x128xbf16>,
    %c0_137 = arith.constant 0 : index
    %c0_138 = arith.constant 0 : index
    %c0_139 = arith.constant 0 : index
    %151 = vector.load %arg10[%c0_137, %c0_138, %c0_139] : memref<1x224x128xf32, #tpu.memory_space<vmem>>, vector<1x224x128xf32>
    %152 = vector.shape_cast %151 : vector<1x224x128xf32> to vector<224x128xf32>
    %c0_140 = arith.constant 0 : index
    %c0_141 = arith.constant 0 : index
    %153 = vector.load %arg14[%c0_140, %c0_141] : memref<224x384xbf16, #tpu.memory_space<vmem>>, vector<224x384xbf16>
    %c1_142 = arith.constant 1 : index
    %c0_143 = arith.constant 0 : index
    %c0_144 = arith.constant 0 : index
    %154 = vector.load %arg6[%c1_142, %c0_143, %c0_144] : memref<3x384x128xbf16, #tpu.memory_space<vmem>>, vector<1x384x128xbf16>
    %155 = vector.shape_cast %154 : vector<1x384x128xbf16> to vector<384x128xbf16>
    %cst_145 = arith.constant dense<0.000000e+00> : vector<224x128xf32>
    %156 = tpu.matmul %153, %155, %cst_145 {dimension_numbers = #tpu.dot_dimension_numbers<[1], [0], [0], [1], [0, 0, 1, 1], [], []>} : vector<224x384xbf16>, vector<384x128xbf16>, vector<224x128xf32> -> vector<224x128xf32>
    %157 = arith.addf %152, %156 : vector<224x128xf32>
    %c0_146 = arith.constant 0 : index
    %c0_147 = arith.constant 0 : index
    %c0_148 = arith.constant 0 : index
    %158 = vector.load %arg10[%c0_146, %c0_147, %c0_148] : memref<1x224x128xf32, #tpu.memory_space<vmem>>, vector<1x224x128xf32>
    %159 = vector.shape_cast %158 : vector<1x224x128xf32> to vector<224x128xf32>
    %160 = vector.shape_cast %157 : vector<224x128xf32> to vector<1x224x128xf32>
    tpu.vector_store %arg10[%c0_146, %c0_147, %c0_148], %160 {strides = array<i32>} : memref<1x224x128xf32, #tpu.memory_space<vmem>>, vector<1x224x128xf32>,
    %c46_149 = arith.constant 46 : index
    %c0_150 = arith.constant 0 : index
    %161 = vector.load %arg12[%c46_149, %c0_150] : memref<272x128xf32, #tpu.memory_space<vmem>>, vector<224x128xf32>
    %162 = arith.truncf %161 : vector<224x128xf32> to vector<224x128xbf16>
    %c0_151 = arith.constant 0 : index
    %c0_152 = arith.constant 0 : index
    %163 = vector.load %arg14[%c0_151, %c0_152] : memref<224x384xbf16, #tpu.memory_space<vmem>>, vector<224x128xbf16>
    tpu.vector_store %arg14[%c0_151, %c0_152], %162 {strides = array<i32>} : memref<224x384xbf16, #tpu.memory_space<vmem>>, vector<224x128xbf16>,
    %c47_153 = arith.constant 47 : index
    %c0_154 = arith.constant 0 : index
    %164 = vector.load %arg12[%c47_153, %c0_154] : memref<272x128xf32, #tpu.memory_space<vmem>>, vector<224x128xf32>
    %165 = arith.truncf %164 : vector<224x128xf32> to vector<224x128xbf16>
    %c0_155 = arith.constant 0 : index
    %c128_156 = arith.constant 128 : index
    %166 = vector.load %arg14[%c0_155, %c128_156] : memref<224x384xbf16, #tpu.memory_space<vmem>>, vector<224x128xbf16>
    tpu.vector_store %arg14[%c0_155, %c128_156], %165 {strides = array<i32>} : memref<224x384xbf16, #tpu.memory_space<vmem>>, vector<224x128xbf16>,
    %c48_157 = arith.constant 48 : index
    %c0_158 = arith.constant 0 : index
    %167 = vector.load %arg12[%c48_157, %c0_158] : memref<272x128xf32, #tpu.memory_space<vmem>>, vector<224x128xf32>
    %168 = arith.truncf %167 : vector<224x128xf32> to vector<224x128xbf16>
    %c0_159 = arith.constant 0 : index
    %c256_160 = arith.constant 256 : index
    %169 = vector.load %arg14[%c0_159, %c256_160] : memref<224x384xbf16, #tpu.memory_space<vmem>>, vector<224x128xbf16>
    tpu.vector_store %arg14[%c0_159, %c256_160], %168 {strides = array<i32>} : memref<224x384xbf16, #tpu.memory_space<vmem>>, vector<224x128xbf16>,
    %c0_161 = arith.constant 0 : index
    %c0_162 = arith.constant 0 : index
    %c0_163 = arith.constant 0 : index
    %170 = vector.load %arg10[%c0_161, %c0_162, %c0_163] : memref<1x224x128xf32, #tpu.memory_space<vmem>>, vector<1x224x128xf32>
    %171 = vector.shape_cast %170 : vector<1x224x128xf32> to vector<224x128xf32>
    %c0_164 = arith.constant 0 : index
    %c0_165 = arith.constant 0 : index
    %172 = vector.load %arg14[%c0_164, %c0_165] : memref<224x384xbf16, #tpu.memory_space<vmem>>, vector<224x384xbf16>
    %c2_166 = arith.constant 2 : index
    %c0_167 = arith.constant 0 : index
    %c0_168 = arith.constant 0 : index
    %173 = vector.load %arg6[%c2_166, %c0_167, %c0_168] : memref<3x384x128xbf16, #tpu.memory_space<vmem>>, vector<1x384x128xbf16>
    %174 = vector.shape_cast %173 : vector<1x384x128xbf16> to vector<384x128xbf16>
    %cst_169 = arith.constant dense<0.000000e+00> : vector<224x128xf32>
    %175 = tpu.matmul %172, %174, %cst_169 {dimension_numbers = #tpu.dot_dimension_numbers<[1], [0], [0], [1], [0, 0, 1, 1], [], []>} : vector<224x384xbf16>, vector<384x128xbf16>, vector<224x128xf32> -> vector<224x128xf32>
    %176 = arith.addf %171, %175 : vector<224x128xf32>
    %c0_170 = arith.constant 0 : index
    %c0_171 = arith.constant 0 : index
    %c0_172 = arith.constant 0 : index
    %177 = vector.load %arg10[%c0_170, %c0_171, %c0_172] : memref<1x224x128xf32, #tpu.memory_space<vmem>>, vector<1x224x128xf32>
    %178 = vector.shape_cast %177 : vector<1x224x128xf32> to vector<224x128xf32>
    %179 = vector.shape_cast %176 : vector<224x128xf32> to vector<1x224x128xf32>
    tpu.vector_store %arg10[%c0_170, %c0_171, %c0_172], %179 {strides = array<i32>} : memref<1x224x128xf32, #tpu.memory_space<vmem>>, vector<1x224x128xf32>,
    return
  }
  func.func @transform_0(%arg0: i32) -> (i32, i32, i32) {
    %c0_i32 = arith.constant 0 : i32
    %c0_i32_0 = arith.constant 0 : i32
    %c0_i32_1 = arith.constant 0 : i32
    return %arg0, %c0_i32, %c0_i32_0 : i32, i32, i32
  }
  func.func @transform_1(%arg0: i32) -> (i32, i32, i32) {
    %c0_i32 = arith.constant 0 : i32
    %c0_i32_0 = arith.constant 0 : i32
    %c0_i32_1 = arith.constant 0 : i32
    return %arg0, %c0_i32, %c0_i32_0 : i32, i32, i32
  }
  func.func @transform_2(%arg0: i32) -> (i32, i32, i32) {
    %c0_i32 = arith.constant 0 : i32
    %c0_i32_0 = arith.constant 0 : i32
    %c0_i32_1 = arith.constant 0 : i32
    return %arg0, %c0_i32, %c0_i32_0 : i32, i32, i32
  }
  func.func @transform_3(%arg0: i32) -> (i32, i32) {
    %c0_i32 = arith.constant 0 : i32
    %c0_i32_0 = arith.constant 0 : i32
    %c0_i32_1 = arith.constant 0 : i32
    return %c0_i32, %c0_i32_0 : i32, i32
  }
  func.func @transform_4(%arg0: i32) -> (i32, i32, i32) {
    %c0_i32 = arith.constant 0 : i32
    %c0_i32_0 = arith.constant 0 : i32
    %c0_i32_1 = arith.constant 0 : i32
    %c0_i32_2 = arith.constant 0 : i32
    return %c0_i32, %c0_i32_0, %c0_i32_1 : i32, i32, i32
  }
  func.func @transform_5(%arg0: i32) -> (i32, i32, i32) {
    %c0_i32 = arith.constant 0 : i32
    %c0_i32_0 = arith.constant 0 : i32
    %c0_i32_1 = arith.constant 0 : i32
    %c0_i32_2 = arith.constant 0 : i32
    return %c0_i32, %c0_i32_0, %c0_i32_1 : i32, i32, i32
  }
  func.func @transform_6(%arg0: i32) -> (i32, i32) {
    %c0_i32 = arith.constant 0 : i32
    %c0_i32_0 = arith.constant 0 : i32
    %c0_i32_1 = arith.constant 0 : i32
    return %c0_i32, %c0_i32_0 : i32, i32
  }
  func.func @transform_7(%arg0: i32) -> (i32, i32) {
    %c0_i32 = arith.constant 0 : i32
    %c0_i32_0 = arith.constant 0 : i32
    %c0_i32_1 = arith.constant 0 : i32
    return %c0_i32, %c0_i32_0 : i32, i32
  }
  func.func @transform_8(%arg0: i32) -> (i32, i32) {
    %c0_i32 = arith.constant 0 : i32
    %c0_i32_0 = arith.constant 0 : i32
    %c0_i32_1 = arith.constant 0 : i32
    return %c0_i32, %c0_i32_0 : i32, i32
  }
  func.func @transform_9(%arg0: i32) -> (i32, i32, i32) {
    %c0_i32 = arith.constant 0 : i32
    %c0_i32_0 = arith.constant 0 : i32
    %c0_i32_1 = arith.constant 0 : i32
    return %arg0, %c0_i32, %c0_i32_0 : i32, i32, i32
  }
}

</mosaic_0001>

<bundles_post_ra>
// kernel: simple_decoder_forward.1
= control target key start
LH: loop header
LB: loop body
LE: loop exit
PB: predicated region body
PF: predicated region fallthrough
CT: control target
= control target key end

     0   :  { %s8030_s30 = smov 0   ;;  %s9884_s0 = inlined_call_operand.vmem [shape: bf16[2,160,128], index: 0, kind: input, shape index: {}]   ;;  %s9885_s1 = inlined_call_operand.vmem [shape: f32[2,160,128], index: 1, kind: input, shape index: {}]   ;;  %s9886_s2 = inlined_call_operand.vmem [shape: f32[2,192,128], index: 2, kind: input, shape index: {}]   ;;  %s9887_s3 = inlined_call_operand.vmem [shape: bf16[128,128], index: 3, kind: input, shape index: {}]   ;;  %s9888_s4 = inlined_call_operand.vmem [shape: bf16[3,384,128], index: 4, kind: input, shape index: {}]   ;;  %s9889_s5 = inlined_call_operand.vmem [shape: bf16[3,384,128], index: 5, kind: input, shape index: {}]   ;;  %s9890_s6 = inlined_call_operand.vmem [shape: f32[1,128], index: 6, kind: input, shape index: {}]   ;;  %s9891_s7 = inlined_call_operand.vmem [shape: f32[1,128], index: 7, kind: input, shape index: {}]   ;;  %s9892_s8 = inlined_call_operand.vmem [shape: f32[1,128], index: 8, kind: input, shape index: {}]   ;;  %s9893_s9 = inlined_call_operand.vmem [shape: f32[2,224,128], index: 9, kind: output, shape index: {}]  }
   0x1 LB: > { %s5818_s10 = sadd.s32 4294967295, %s7975_s30   ;;  %p5822_p0 = scmp.ge.s32.totalorder %s7975_s30, 1  ;;  %s7975_s30 = sphi %s8030_s30, %s19_s30  }
   0x2   : > { %p307_p1 = scmp.lt.s32.totalorder %s7975_s30, 3 }
   0x4   : > { %p308_p2 = pnand %p5822_p0, %p307_p1 }
   0x5   : > { %v7691_v0 = vld [vmem:[%s9887_s3] sm:$0xff] (!%p308_p2)   ;;  %p353_p3 = scmp.lt.s32.totalorder (!%p308_p2), %s5818_s10, 1  ;;  %v7692_v1 = vld [vmem:[%s9887_s3 + $0x8] sm:$0xff] (!%p308_p2)   ;;  %v7693_v2 = vld [vmem:[%s9887_s3 + $0x10] sm:$0xff] (!%p308_p2)   ;;  %v7977_v41 = vmov (!%p308_p2), 0.0   ;;  %v7978_v49 = vmov (!%p308_p2), 0.0|0.0  }
   0x6   : > { %311 = sbr.rel (%p308_p2) target bundleno = 1165 (0x48d), region = 56  ;;  %6894 = vmatprep.subr.bf16.mxu0 (!%p308_p2), %v7691_v0  ;;  %v7694_v3 = vld [vmem:[%s9887_s3 + $0x18] sm:$0xff] (!%p308_p2)   ;;  %v7695_v5 = vld [vmem:[%s9887_s3 + $0x20] sm:$0xff] (!%p308_p2)   ;;  %v7696_v6 = vld [vmem:[%s9887_s3 + $0x28] sm:$0xff] (!%p308_p2)   ;;  %374 = vst [vmem:[#allocation2] sm:$0xff] (!%p308_p2), %v7977_v41  ;;  %vm7979_vm2 = vmmov (!%p308_p2), 1  }
   0x7   : > { %6895 = vmatpush3.bf16.msra.mxu0 (!%p308_p2), %v7691_v0  ;;  %v7697_v7 = vld [vmem:[%s9887_s3 + $0x30] sm:$0xff] (!%p308_p2)   ;;  %v7710_v8 = vld [vmem:[%s9888_s4 + $0x40] sm:$0xff] (!%p308_p2)   ;;  %v7712_v10 = vld [vmem:[%s9888_s4 + $0x48] sm:$0xff] (!%p308_p2)   ;;  %375 = vst [vmem:[#allocation2 + $0x8] sm:$0xff] (!%p308_p2), %v7977_v41 }
   0x8   : > { %6896 = vmatprep.subr.bf16.mxu0 (!%p308_p2), %v7692_v1  ;;  %v7711_v9 = vld [vmem:[%s9888_s4] sm:$0xff] (!%p308_p2)   ;;  %6204 = vmatprep.subr.bf16.mxu1 (!%p308_p2), %v7710_v8  ;;  %v7698_v11 = vld [vmem:[%s9887_s3 + $0x38] sm:$0xff] (!%p308_p2)   ;;  %v7714_v12 = vld [vmem:[%s9888_s4 + $0x8] sm:$0xff] (!%p308_p2)   ;;  %376 = vst [vmem:[#allocation2 + $0x10] sm:$0xff] (!%p308_p2), %v7977_v41 }
   0x9   : > { %6205 = vmatpush3.bf16.msra.mxu1 (!%p308_p2), %v7711_v9  ;;  %v7715_v13 = vld [vmem:[%s9888_s4 + $0x50] sm:$0xff] (!%p308_p2)   ;;  %v7718_v15 = vld [vmem:[%s9888_s4 + $0x58] sm:$0xff] (!%p308_p2)   ;;  %v7709_v17 = vld [vmem:[%s9888_s4 + $0x80] sm:$0xff] (!%p308_p2)   ;;  %377 = vst [vmem:[#allocation2 + $0x18] sm:$0xff] (!%p308_p2), %v7977_v41 }
   0xa   : > { %6206 = vmatprep.subr.bf16.mxu1 (!%p308_p2), %v7712_v10  ;;  %v7716_v14 = vld [vmem:[%s9888_s4 + $0x10] sm:$0xff] (!%p308_p2)   ;;  %v7719_v19 = vld [vmem:[%s9888_s4 + $0x18] sm:$0xff] (!%p308_p2)   ;;  %v7713_v20 = vld [vmem:[%s9888_s4 + $0x88] sm:$0xff] (!%p308_p2)   ;;  %378 = vst [vmem:[#allocation2 + $0x20] sm:$0xff] (!%p308_p2), %v7977_v41 }
   0xb   : > { %6897 = vmatpush3.bf16.msra.mxu0 (!%p308_p2), %v7692_v1  ;;  %v7721_v21 = vld [vmem:[%s9888_s4 + $0x60] sm:$0xff] (!%p308_p2)   ;;  %v7724_v23 = vld [vmem:[%s9888_s4 + $0x68] sm:$0xff] (!%p308_p2)   ;;  %v7717_v25 = vld [vmem:[%s9888_s4 + $0x90] sm:$0xff] (!%p308_p2)   ;;  %379 = vst [vmem:[#allocation2 + $0x28] sm:$0xff] (!%p308_p2), %v7977_v41 }
   0xc   : > { %6898 = vmatprep.subr.bf16.mxu0 (!%p308_p2), %v7693_v2  ;;  %v7722_v22 = vld [vmem:[%s9888_s4 + $0x20] sm:$0xff] (!%p308_p2)   ;;  %v7725_v27 = vld [vmem:[%s9888_s4 + $0x28] sm:$0xff] (!%p308_p2)   ;;  %v7720_v28 = vld [vmem:[%s9888_s4 + $0x98] sm:$0xff] (!%p308_p2)   ;;  %380 = vst [vmem:[#allocation2 + $0xd0] sm:$0xff] (!%p308_p2), %v7977_v41 }
   0xd   : > { %s9967_s10 = smov (!%p353_p3, %s5818_s10), 1  ;;  %6207 = vmatpush3.bf16.msra.mxu1 %v7714_v12  ;;  %v7726_v29 = vld [vmem:[%s9888_s4 + $0x70] sm:$0xff]   ;;  %v7729_v31 = vld [vmem:[%s9888_s4 + $0x78] sm:$0xff]   ;;  %v7723_v32 = vld [vmem:[%s9888_s4 + $0xa0] sm:$0xff]   ;;  %381 = vst [vmem:[#allocation2 + $0xd8] sm:$0xff] %v7977_v41 }
   0xe   : > { %s7678_s17 = smul.u32 80, %s9967_s10  ;;  %6208 = vmatprep.subr.bf16.mxu1 %v7715_v13  ;;  %v7728_v30 = vld [vmem:[%s9888_s4 + $0x30] sm:$0xff]   ;;  %v7730_v34 = vld [vmem:[%s9888_s4 + $0x38] sm:$0xff]   ;;  %v7727_v36 = vld [vmem:[%s9888_s4 + $0xa8] sm:$0xff]   ;;  %382 = vst [vmem:[#allocation2 + $0xe0] sm:$0xff] %v7977_v41 }
   0xf   : > { %6899 = vmatpush3.bf16.msra.mxu0 %v7693_v2  ;;  %v7731_v37 = vld [vmem:[%s9888_s4 + $0xb0] sm:$0xff]   ;;  %383 = vst [vmem:[#allocation2 + $0xe8] sm:$0xff] %v7977_v41  ;;  %385 = vst [vmem:[#allocation3 + $0x8] sm:$0xff] %v7977_v41  ;;  %v7732_v42 = vld [vmem:[%s9888_s4 + $0xb8] sm:$0xff]   ;;  %s7679_s14 = smul.u32 160, %s9967_s10 }
  0x10   : > { %s8053_s20 = scalar_lea.vmem %s9884_s0, %s7678_s17  ;;  %6900 = vmatprep.subr.bf16.mxu0 %v7694_v3  ;;  %386 = vst [vmem:[#allocation3 + $0x10] sm:$0xff] %v7977_v41  ;;  %387 = vst [vmem:[#allocation3 + $0x18] sm:$0xff] %v7977_v41  ;;  %v1166_v43 = vld [vmem:[#allocation2 + $0xf] sm:$0xff]  ;;  %v1167_v44 = vld [vmem:[#allocation2 + $0x17] sm:$0xff]  ;;  %s7681_s15 = smul.u32 224, %s9967_s10 }
  0x11   : > { %v7699_v4 = vld [vmem:[%s8053_s20] sm:$0xff]   ;;  %v7700_v16 = vld [vmem:[%s8053_s20 + $0x8] sm:$0xff]   ;;  %v7701_v18 = vld [vmem:[%s8053_s20 + $0x10] sm:$0xff]   ;;  %6209 = vmatpush3.bf16.msra.mxu1 %v7716_v14  ;;  %388 = vst [vmem:[#allocation3 + $0x20] sm:$0xff] %v7977_v41  ;;  %v1190_v45 = vpack.c.bf16 %v1167_v44, %v1166_v43  ;;  %s8268_s17 = scalar_lea.vmem %s9885_s1, %s7679_s14 }
  0x12   : > { %6910 = vmatprep.mubr.bf16.mxu0 %v7699_v4  ;;  %6210 = vmatprep.subr.bf16.mxu1 %v7718_v15  ;;  %v7702_v24 = vld [vmem:[%s8053_s20 + $0x18] sm:$0xff]   ;;  %v7703_v26 = vld [vmem:[%s8053_s20 + $0x20] sm:$0xff]   ;;  %v7704_v33 = vld [vmem:[%s8053_s20 + $0x28] sm:$0xff]   ;;  %389 = vst [vmem:[#allocation3 + $0x28] sm:$0xff] %v7977_v41  ;;  %s9702_s18 = scalar_lea.vmem %s9893_s9, %s7681_s15 }
  0x13   : > { %6901 = vmatpush3.bf16.msra.mxu0 %v7694_v3  ;;  %v7705_v35 = vld [vmem:[%s8053_s20 + $0x30] sm:$0xff]   ;;  %v7706_v38 = vld [vmem:[%s8053_s20 + $0x38] sm:$0xff]   ;;  %v7707_v39 = vld [vmem:[%s8053_s20 + $0x40] sm:$0xff]   ;;  %390 = vst [vmem:[#allocation3 + $0xf0] sm:$0xff] %v7977_v41  ;;  %1546 = vmatprep.mubr.bf16.mxu1 %v1190_v45 }
  0x14   : > { %6902 = vmatprep.subr.bf16.mxu0 %v7695_v5  ;;  %v7708_v40 = vld [vmem:[%s8053_s20 + $0x48] sm:$0xff]   ;;  %391 = vst [vmem:[#allocation3 + $0xf8] sm:$0xff] %v7977_v41  ;;  %392 = vst [vmem:[#allocation3 + $0x100] sm:$0xff] %v7977_v41  ;;  %v1119_v47 = vld [vmem:[#allocation2 + $0x16] sm:$0xff] }
  0x15   : > { %6211 = vmatpush3.bf16.msra.mxu1 %v7719_v19  ;;  %393 = vst [vmem:[#allocation3 + $0x108] sm:$0xff] %v7977_v41  ;;  %v1118_v46 = vld [vmem:[#allocation2 + $0xe] sm:$0xff]  ;;  %v1168_v50 = vld [vmem:[#allocation2 + $0x1f] sm:$0xff] }
  0x16   : > { %6212 = vmatprep.subr.bf16.mxu1 %v7721_v21  ;;  %v1142_v48 = vpack.c.bf16 %v1119_v47, %v1118_v46  ;;  %v1169_v51 = vld [vmem:[#allocation2 + $0x27] sm:$0xff]  ;;  %v1120_v53 = vld [vmem:[#allocation2 + $0x1e] sm:$0xff]  ;;  %v7737_v60 = vld [vmem:[%s9888_s4 + $0x110] sm:$0xff]  }
  0x17   : > { %6903 = vmatpush3.bf16.msra.mxu0 %v7695_v5  ;;  %v8154_v52 = vpack.c.bf16 %v1169_v51, %v1168_v50  ;;  %v1121_v54 = vld [vmem:[#allocation2 + $0x26] sm:$0xff]  ;;  %v7738_v61 = vld [vmem:[%s9888_s4 + $0xd0] sm:$0xff]   ;;  %v7739_v62 = vld [vmem:[%s9888_s4 + $0x118] sm:$0xff]  }
  0x18   : > { %6904 = vmatprep.subr.bf16.mxu0 %v7696_v6  ;;  %v8156_v55 = vpack.c.bf16 %v1121_v54, %v1120_v53  ;;  %v7733_v56 = vld [vmem:[%s9888_s4 + $0x100] sm:$0xff]   ;;  %v7735_v58 = vld [vmem:[%s9888_s4 + $0x108] sm:$0xff]   ;;  %v7740_v63 = vld [vmem:[%s9888_s4 + $0xd8] sm:$0xff]  }
  0x19   : > { %6213 = vmatpush3.bf16.msra.mxu1 %v7722_v22  ;;  %v7734_v57 = vld [vmem:[%s9888_s4 + $0xc0] sm:$0xff]   ;;  %v7736_v59 = vld [vmem:[%s9888_s4 + $0xc8] sm:$0xff]   ;;  %v7745_v4 = vld [vmem:[%s9888_s4 + $0x130] sm:$0xff]  }
  0x1a   : > { %6214 = vmatprep.subr.bf16.mxu1 %v7724_v23  ;;  %v7741_v0 = vld [vmem:[%s9888_s4 + $0x120] sm:$0xff]   ;;  %v7743_v2 = vld [vmem:[%s9888_s4 + $0x128] sm:$0xff]   ;;  %v7746_v5 = vld [vmem:[%s9888_s4 + $0xf0] sm:$0xff]  }
  0x1b   : > { %6905 = vmatpush3.bf16.msra.mxu0 %v7696_v6  ;;  %v7742_v1 = vld [vmem:[%s9888_s4 + $0xe0] sm:$0xff]   ;;  %v7744_v3 = vld [vmem:[%s9888_s4 + $0xe8] sm:$0xff]   ;;  %v7747_v6 = vld [vmem:[%s9888_s4 + $0x138] sm:$0xff]  }
  0x1c   : > { %6906 = vmatprep.subr.bf16.mxu0 %v7697_v7  ;;  %v8211_v8 = vld [vmem:[%s9888_s4 + $0x140] sm:$0xff]   ;;  %v7754_v12 = vld [vmem:[%s9888_s4 + $0x188] sm:$0xff]   ;;  %v7755_v13 = vld [vmem:[%s9888_s4 + $0x1d0] sm:$0xff]  }
  0x1d   : > { %6215 = vmatpush3.bf16.msra.mxu1 %v7725_v27  ;;  %v7750_v9 = vld [vmem:[%s9888_s4 + $0x1c0] sm:$0xff]   ;;  %v7756_v14 = vld [vmem:[%s9888_s4 + $0x190] sm:$0xff]   ;;  %v7757_v15 = vld [vmem:[%s9888_s4 + $0x1d8] sm:$0xff]  }
  0x1e   : > { %6216 = vmatprep.subr.bf16.mxu1 %v7726_v29  ;;  %v7751_v10 = vld [vmem:[%s9888_s4 + $0x180] sm:$0xff]   ;;  %v7762_v19 = vld [vmem:[%s9888_s4 + $0x1e8] sm:$0xff]   ;;  %v7764_v21 = vld [vmem:[%s9888_s4 + $0x1f0] sm:$0xff]  }
  0x1f   : > { %6907 = vmatpush3.bf16.msra.mxu0 %v7697_v7  ;;  %v7748_v7 = vld [vmem:[%s9888_s4 + $0xf8] sm:$0xff]   ;;  %v7765_v22 = vld [vmem:[%s9888_s4 + $0x1b0] sm:$0xff]   ;;  %v398_v53 = vld [vmem:[%s8268_s17 + $0x20] sm:$0xff] }
  0x20   : > { %6908 = vmatprep.subr.bf16.mxu0 %v7698_v11  ;;  %v7767_v23 = vld [vmem:[%s9888_s4 + $0x1f8] sm:$0xff]   ;;  %v396_v27 = vld [vmem:[%s8268_s17 + $0x10] sm:$0xff] }
  0x21   : > { %6217 = vmatpush3.bf16.msra.mxu1 %v7728_v30  ;;  %v394_v30 = vld [vmem:[%s8268_s17] sm:$0xff]  ;;  %v400_v46 = vld [vmem:[%s8268_s17 + $0x30] sm:$0xff] }
  0x22   : > { %6218 = vmatprep.subr.bf16.mxu1 %v7729_v31 }
  0x23   : > { %6909 = vmatpush3.bf16.msra.mxu0 %v7698_v11  ;;  %v7753_v11 = vld [vmem:[%s9888_s4 + $0x1c8] sm:$0xff]  }
  0x24   : > { %6930 = vmatprep.subr.bf16.mxu0 %v7709_v17 }
  0x25   : > { %6219 = vmatpush3.bf16.msra.mxu1 %v7730_v34  ;;  %v395_v34 = vld [vmem:[%s8268_s17 + $0x8] sm:$0xff] }
  0x26   : > { %6911 = vmatmul.mubr.bf16.vlgmr.msra.gmra.mrb[0].mxu0 %v7700_v16  ;;  %6420 = vmatprep.subr.bf16.mxu1 %v7750_v9  ;;  %v7758_v16 = vld [vmem:[%s9888_s4 + $0x198] sm:$0xff]  }
  0x27   : > { %6914 = vmatprep.mubr.bf16.mxu0 %v7701_v18  ;;  %6931 = vmatpush3.bf16.msra.mxu0 %v7709_v17  ;;  %v7760_v17 = vld [vmem:[%s9888_s4 + $0x1e0] sm:$0xff]  }
  0x28   : > { %6932 = vmatprep.subr.bf16.mxu0 %v7713_v20  ;;  %1547 = vmatmul.mubr.bf16.vlgmr.msra.gmra.mrb[0].mxu1 %v1142_v48  ;;  %v7761_v18 = vld [vmem:[%s9888_s4 + $0x1a0] sm:$0xff]  }
  0x29   : > { %1554 = vmatprep.mubr.bf16.mxu1 %v8154_v52  ;;  %6421 = vmatpush3.bf16.msra.mxu1 %v7751_v10  ;;  %v407_v10 = vld [vmem:[%s8268_s17 + $0x68] sm:$0xff] }
  0x2a   : > { %6422 = vmatprep.subr.bf16.mxu1 %v7753_v11  ;;  %v404_v11 = vld [vmem:[%s8268_s17 + $0x50] sm:$0xff] }
  0x2b   : > { %6933 = vmatpush3.bf16.msra.mxu0 %v7713_v20  ;;  %v7763_v20 = vld [vmem:[%s9888_s4 + $0x1a8] sm:$0xff]  }
  0x2c   : > { %6934 = vmatprep.subr.bf16.mxu0 %v7717_v25 }
  0x2d   : > { %6423 = vmatpush3.bf16.msra.mxu1 %v7754_v12  ;;  %v402_v12 = vld [vmem:[%s8268_s17 + $0x40] sm:$0xff] }
  0x2e   : > { %6915 = vmatmul.mubr.bf16.gmra.mrb[4].mxu0 %v7702_v24  ;;  %6424 = vmatprep.subr.bf16.mxu1 %v7755_v13  ;;  %v7768_v24 = vld [vmem:[%s9888_s4 + $0x1b8] sm:$0xff]  }
  0x2f   : > { %6918 = vmatprep.mubr.bf16.mxu0 %v7703_v26  ;;  %6935 = vmatpush3.bf16.msra.mxu0 %v7717_v25  ;;  %v718_v25 = vlaneseq }
  0x30   : > { %6936 = vmatprep.subr.bf16.mxu0 %v7720_v28  ;;  %1555 = vmatmul.mubr.bf16.gmra.mrb[4].mxu1 %v8156_v55 }
  0x31   : > { %6425 = vmatpush3.bf16.msra.mxu1 %v7756_v14  ;;  %v8263_v26 = vshrl.u32 %v718_v25, 7 }
  0x32   : > { %6426 = vmatprep.subr.bf16.mxu1 %v7757_v15 }
  0x33   : > { %6937 = vmatpush3.bf16.msra.mxu0 %v7720_v28  ;;  %v8274_v28 = vld [vmem:[%s9890_s6] ss:$0 sm:$0xff]  ;;  %v8277_v29 = vadd.s32 24, %v8263_v26  ;;  %v8281_v31 = vadd.s32 8, %v8263_v26  ;;  %v8299_v47 = vadd.s32 56, %v8263_v26  ;;  %v8309_v54 = vadd.s32 40, %v8263_v26 }
  0x34   : > { %6938 = vmatprep.subr.bf16.mxu0 %v7723_v32  ;;  %v8335_v13 = vadd.s32 88, %v8263_v26 }
  0x35   : > { %6427 = vmatpush3.bf16.msra.mxu1 %v7758_v16 }
  0x36   : > { %6919 = vmatmul.mubr.bf16.gmra.mrb[8].mxu0 %v7704_v33  ;;  %6428 = vmatprep.subr.bf16.mxu1 %v7760_v17  ;;  %v423_v33 = vadd.f32 %v8274_v28, %v396_v27 }
  0x37   : > { %6922 = vmatprep.mubr.bf16.mxu0 %v7705_v35  ;;  %6939 = vmatpush3.bf16.msra.mxu0 %v7723_v32  ;;  %v397_v32 = vld [vmem:[%s8268_s17 + $0x18] sm:$0xff]  ;;  %v421_v35 = vadd.f32 %v8274_v28, %v394_v30 }
  0x38   : > { %6940 = vmatprep.subr.bf16.mxu0 %v7727_v36 }
  0x39   : > { %6429 = vmatpush3.bf16.msra.mxu1 %v7761_v18  ;;  %v405_v18 = vld [vmem:[%s8268_s17 + $0x58] sm:$0xff] }
  0x3a   : > { %6430 = vmatprep.subr.bf16.mxu1 %v7762_v19  ;;  %v8348_v19 = vadd.s32 72, %v8263_v26 }
  0x3b   : > { %6941 = vmatpush3.bf16.msra.mxu0 %v7727_v36  ;;  %v764_v36 = vand.u32 15, %v8277_v29 }
  0x3c   : > { %6942 = vmatprep.subr.bf16.mxu0 %v7731_v37 }
  0x3d   : > { %6431 = vmatpush3.bf16.msra.mxu1 %v7763_v20  ;;  %vm8293_vm0 = vcmp.lt.s32.totalorder %v764_v36, 10 }
  0x3e   : > { %6923 = vmatmul.mubr.bf16.gmra.mrb[12].mxu0 %v7706_v38  ;;  %6432 = vmatprep.subr.bf16.mxu1 %v7764_v21  ;;  %v750_v38 = vand.u32 15, %v8281_v31  ;;  %vm7858_vm5 = vmpackc.low %vm8293_vm0, %vm7979_vm2  ;;  %v403_v21 = vld [vmem:[%s8268_s17 + $0x48] sm:$0xff] }
  0x3f   : > { %6926 = vmatprep.mubr.bf16.mxu0 %v7707_v39  ;;  %6943 = vmatpush3.bf16.msra.mxu0 %v7731_v37  ;;  %v424_v37 = vadd.f32 %v8274_v28, %v397_v32 }
  0x40   : > { %6944 = vmatprep.subr.bf16.mxu0 %v7732_v42  ;;  %vm8303_vm1 = vcmp.lt.s32.totalorder %v750_v38, 10 }
  0x41   : > { %6433 = vmatpush3.bf16.msra.mxu1 %v7765_v22  ;;  %vm7855_vm3 = vmpackc.low %vm8303_vm1, %vm7979_vm2 }
  0x42   : > { %6434 = vmatprep.subr.bf16.mxu1 %v7767_v23  ;;  %v431_v23 = vadd.f32 %v8274_v28, %v404_v11 }
  0x43   : > { %6945 = vmatpush3.bf16.msra.mxu0 %v7732_v42 }
  0x44   : > { %6312 = vmatprep.subr.bf16.mxu0 %v7733_v56 }
  0x45   : > { %6435 = vmatpush3.bf16.msra.mxu1 %v7768_v24  ;;  %v429_v24 = vadd.f32 %v8274_v28, %v402_v12 }
  0x46   : > { %6927 = vmatmul.mubr.bf16.gmra.mrb[16].mxu0 %v7708_v40  ;;  %v422_v40 = vadd.f32 %v8274_v28, %v395_v34  ;;  %v432_v34 = vadd.f32 %v8274_v28, %v405_v18 }
  0x47   : > { %6946 = vmatprep.mubr.bf16.mxu0 %v7978_v49 }
  0x4e   : > { %6947 = vmatmul.mubr.bf16.vlgmr.msra.gmra.mrb[20].mxu0 %v7978_v49 }
  0x4f   : > { %6313 = vmatpush3.bf16.msra.mxu0 %v7734_v57  ;;  %v401_v57 = vld [vmem:[%s8268_s17 + $0x38] sm:$0xff] }
  0x50   : > { %6314 = vmatprep.subr.bf16.mxu0 %v7735_v58 }
  0x53   : > { %6315 = vmatpush3.bf16.msra.mxu0 %v7736_v59  ;;  %v427_v59 = vadd.f32 %v8274_v28, %v400_v46 }
  0x54   : > { %6316 = vmatprep.subr.bf16.mxu0 %v7737_v60  ;;  %v399_v60 = vld [vmem:[%s8268_s17 + $0x28] sm:$0xff] }
  0x57   : > { %6317 = vmatpush3.bf16.msra.mxu0 %v7738_v61 }
  0x58   : > { %6318 = vmatprep.subr.bf16.mxu0 %v7739_v62  ;;  %v425_v62 = vadd.f32 %v8274_v28, %v398_v53 }
  0x5b   : > { %6319 = vmatpush3.bf16.msra.mxu0 %v7740_v63  ;;  %v792_v63 = vand.u32 15, %v8299_v47 }
  0x5c   : > { %6320 = vmatprep.subr.bf16.mxu0 %v7741_v0  ;;  %v428_v0 = vadd.f32 %v8274_v28, %v401_v57  ;;  %v408_v57 = vld [vmem:[%s8268_s17 + $0x70] sm:$0xff] }
  0x5d   : > { %vm8328_vm4 = vcmp.lt.s32.totalorder %v792_v63, 10 }
  0x5e   : > { %vm7864_vm9 = vmpackc.low %vm8328_vm4, %vm7979_vm2 }
  0x5f   : > { %6321 = vmatpush3.bf16.msra.mxu0 %v7742_v1  ;;  %v778_v1 = vand.u32 15, %v8309_v54 }
  0x60   : > { %6322 = vmatprep.subr.bf16.mxu0 %v7743_v2 }
  0x61   : > { %vm8342_vm6 = vcmp.lt.s32.totalorder %v778_v1, 10 }
  0x62   : > { %vm7861_vm7 = vmpackc.low %vm8342_vm6, %vm7979_vm2 }
  0x63   : > { %6323 = vmatpush3.bf16.msra.mxu0 %v7744_v3  ;;  %v426_v3 = vadd.f32 %v8274_v28, %v399_v60 }
  0x64   : > { %6324 = vmatprep.subr.bf16.mxu0 %v7745_v4 }
  0x67   : > { %6325 = vmatpush3.bf16.msra.mxu0 %v7746_v5 }
  0x68   : > { %6326 = vmatprep.subr.bf16.mxu0 %v7747_v6 }
  0x6b   : > { %6327 = vmatpush3.bf16.msra.mxu0 %v7748_v7 }
  0x6c   : > { %6970 = vmatprep.subr.bf16.mxu0 %v8211_v8 }
  0xf9   : > { %v6912_v39 = vpop.f32.mrb[0].mxu0 }
  0xfa   : > { %v700_v41 = vadd.f32 %v6912_v39, %v423_v33  ;;  %v619_v42 = vpop.f32.mrb[1].mxu0 }
  0xfb   : > { %v698_v43 = vadd.f32 %v619_v42, %v421_v35  ;;  %v6913_v44 = vpop.f32.mrb[2].mxu0  ;;  %v820_v35 = vand.u32 15, %v8335_v13  ;;  %v806_v42 = vand.u32 15, %v8348_v19 }
  0xfc   : > { %1021 = vst [vmem:[#allocation2 + $0x40] sm:$0xff] %v700_v41  ;;  %v701_v48 = vadd.f32 %v6913_v44, %v424_v37  ;;  %v622_v50 = vpop.f32.mrb[3].mxu0  ;;  %v430_v44 = vadd.f32 %v8274_v28, %v403_v21  ;;  %v434_v21 = vadd.f32 %v8274_v28, %v407_v10 }
  0xfd   : > { %1019 = vst [vmem:[#allocation2 + $0x30] sm:$0xff] %v698_v43  ;;  %v699_v56 = vadd.f32 %v622_v50, %v422_v40  ;;  %vm8373_vm8 = vcmp.lt.s32.totalorder %v820_v35, 10  ;;  %vm8387_vm10 = vcmp.lt.s32.totalorder %v806_v42, 10 }
  0xfe   : > { %v1002_v58 = vsel %vm8293_vm0, %v701_v48, 0.0  ;;  %v7859_v14 = vpack.c.bf16 %v701_v48, %v700_v41  ;;  %vm7867_vm11 = vmpackc.low %vm8387_vm10, %vm7979_vm2 }
  0xff   : > { %1022 = vst [vmem:[#allocation2 + $0x48] sm:$0xff] %v1002_v58  ;;  %v1000_v61 = vsel %vm8303_vm1, %v699_v56, 0.0  ;;  %v7856_v6 = vpack.c.bf16 %v699_v56, %v698_v43  ;;  %v8380_v58 = vadd.s32 120, %v8263_v26  ;;  %vm7870_vm13 = vmpackc.low %vm8373_vm8, %vm7979_vm2 }
 0x100   : > { %1020 = vst [vmem:[#allocation2 + $0x38] sm:$0xff] %v1000_v61 }
 0x101   : > { %v6916_v2 = vpop.f32.mrb[4].mxu0  ;;  %7857 = vmatprep.mubr.msk.bf16.mxu0 %vm7855_vm3, %v7856_v6  ;;  %v435_v6 = vadd.f32 %v8274_v28, %v408_v57 }
 0x102   : > { %v704_v4 = vadd.f32 %v6916_v2, %v427_v59  ;;  %v635_v5 = vpop.f32.mrb[5].mxu0  ;;  %7860 = vmatmul.mubr.msk.bf16.gmra.mrb[24].mxu0 %vm7858_vm5, %v7859_v14  ;;  %v8394_v2 = vadd.s32 104, %v8263_v26  ;;  %v848_v14 = vand.u32 15, %v8380_v58 }
 0x103   : > { %v702_v7 = vadd.f32 %v635_v5, %v425_v62  ;;  %v6917_v9 = vpop.f32.mrb[6].mxu0 }
 0x104   : > { %1025 = vst [vmem:[#allocation2 + $0x60] sm:$0xff] %v704_v4  ;;  %v705_v15 = vadd.f32 %v6917_v9, %v428_v0  ;;  %v638_v16 = vpop.f32.mrb[7].mxu0  ;;  %v1170_v25 = vld [vmem:[#allocation2 + $0x2f] sm:$0xff]  ;;  %v406_v0 = vld [vmem:[%s8268_s17 + $0x60] sm:$0xff]  ;;  %v834_v17 = vand.u32 15, %v8394_v2  ;;  %vm8417_vm12 = vcmp.lt.s32.totalorder %v848_v14, 10 }
 0x105   : > { %1023 = vst [vmem:[#allocation2 + $0x50] sm:$0xff] %v702_v7  ;;  %v703_v20 = vadd.f32 %v638_v16, %v426_v3  ;;  %v1122_v27 = vld [vmem:[#allocation2 + $0x2e] sm:$0xff]  ;;  %v433_v12 = vadd.f32 %v8274_v28, %v406_v0  ;;  %vm7876_vm1 = vmpackc.low %vm8417_vm12, %vm7979_vm2 }
 0x106   : > { %v1006_v22 = vsel %vm8328_vm4, %v705_v15, 0.0  ;;  %v1173_v30 = vld [vmem:[#allocation2 + $0x47] sm:$0xff]  ;;  %v7865_v59 = vpack.c.bf16 %v705_v15, %v704_v4  ;;  %v409_v4 = vld [vmem:[%s8268_s17 + $0x78] sm:$0xff]  ;;  %vm8431_vm14 = vcmp.lt.s32.totalorder %v834_v17, 10 }
 0x107   : > { %1026 = vst [vmem:[#allocation2 + $0x68] sm:$0xff] %v1006_v22  ;;  %v1004_v32 = vsel %vm8342_vm6, %v703_v20, 0.0  ;;  %v1171_v33 = vld [vmem:[#allocation2 + $0x37] sm:$0xff]  ;;  %v1172_v39 = vld [vmem:[#allocation2 + $0x3f] sm:$0xff]  ;;  %v7862_v50 = vpack.c.bf16 %v703_v20, %v702_v7  ;;  %v436_v16 = vadd.f32 %v8274_v28, %v409_v4  ;;  %vm8462_vm15 = vmpackc.low %vm8431_vm14, %vm7979_vm2  ;;  %vm9072_vm6 = vcmp.lt.s32.totalorder %v764_v36, 12 }
 0x108   : > { %v1123_v37 = vld [vmem:[#allocation2 + $0x36] sm:$0xff]  ;;  %1024 = vst [vmem:[#allocation2 + $0x58] sm:$0xff] %v1004_v32  ;;  %v8359_v40 = vpack.c.bf16 %v1171_v33, %v1170_v25  ;;  %v8366_v48 = vpack.c.bf16 %v1173_v30, %v1172_v39  ;;  %v1124_v7 = vld [vmem:[#allocation2 + $0x3e] sm:$0xff]  ;;  %v1125_v9 = vld [vmem:[#allocation2 + $0x46] sm:$0xff] }
 0x109   : > { %v8361_v41 = vpack.c.bf16 %v1123_v37, %v1122_v27  ;;  %v6920_v43 = vpop.f32.mrb[8].mxu0  ;;  %7863 = vmatprep.mubr.msk.bf16.mxu0 %vm7861_vm7, %v7862_v50  ;;  %v8407_v20 = vpack.c.bf16 %v1125_v9, %v1124_v7  ;;  %v8424_v37 = vadd.s32 152, %v8263_v26  ;;  %v410_v50 = vld [vmem:[%s8268_s17 + $0x80] sm:$0xff]  ;;  %vm3279_vm7 = vcmp.lt.s32.totalorder %v750_v38, 12 }
 0x10a   : > { %v708_v45 = vadd.f32 %v6920_v43, %v431_v23  ;;  %v651_v46 = vpop.f32.mrb[9].mxu0  ;;  %1562 = vmatprep.mubr.bf16.mxu1 %v8359_v40  ;;  %7866 = vmatmul.mubr.msk.bf16.gmra.mrb[28].mxu0 %vm7864_vm9, %v7865_v59  ;;  %v437_v62 = vadd.f32 %v8274_v28, %v410_v50  ;;  %vm9096_vm9 = vcmp.lt.s32.totalorder %v792_v63, 12 }
 0x10b   : > { %v706_v51 = vadd.f32 %v651_v46, %v429_v24  ;;  %v6921_v53 = vpop.f32.mrb[10].mxu0  ;;  %1563 = vmatmul.mubr.bf16.gmra.mrb[8].mxu1 %v8361_v41  ;;  %v9895_v0 = vand.u32 15, %v8424_v37 }
 0x10c   : > { %1029 = vst [vmem:[#allocation2 + $0x80] sm:$0xff] %v708_v45  ;;  %v709_v60 = vadd.f32 %v6921_v53, %v432_v34  ;;  %v654_v61 = vpop.f32.mrb[11].mxu0  ;;  %1570 = vmatprep.mubr.bf16.mxu1 %v8366_v48  ;;  %v1174_v22 = vld [vmem:[#allocation2 + $0x4f] sm:$0xff] }
 0x10d   : > { %1027 = vst [vmem:[#allocation2 + $0x70] sm:$0xff] %v706_v51  ;;  %v707_v3 = vadd.f32 %v654_v61, %v430_v44  ;;  %v412_v34 = vld [vmem:[%s8268_s17 + $0x90] sm:$0xff]  ;;  %vm8471_vm0 = vcmp.lt.s32.totalorder %v9895_v0, 10 }
 0x10e   : > { %v1010_v5 = vsel %vm8373_vm8, %v709_v60, 0.0  ;;  %v7871_v39 = vpack.c.bf16 %v709_v60, %v708_v45  ;;  %v413_v45 = vld [vmem:[%s8268_s17 + $0x98] sm:$0xff]  ;;  %v439_v57 = vadd.f32 %v8274_v28, %v412_v34  ;;  %v411_v60 = vld [vmem:[%s8268_s17 + $0x88] sm:$0xff]  ;;  %vm8502_vm5 = vmpackc.low %vm8471_vm0, %vm7979_vm2  ;;  %s7680_s17 = smul.u32 192, %s9967_s10 }
 0x10f   : > { %1030 = vst [vmem:[#allocation2 + $0x88] sm:$0xff] %v1010_v5  ;;  %v1008_v11 = vsel %vm8387_vm10, %v707_v3, 0.0  ;;  %v1175_v15 = vld [vmem:[#allocation2 + $0x57] sm:$0xff]  ;;  %v7868_v27 = vpack.c.bf16 %v707_v3, %v706_v51  ;;  %v8438_v51 = vadd.s32 136, %v8263_v26  ;;  %v1176_v3 = vld [vmem:[#allocation2 + $0x5f] sm:$0xff]  ;;  %v1177_v4 = vld [vmem:[#allocation2 + $0x67] sm:$0xff]  ;;  %v440_v5 = vadd.f32 %v8274_v28, %v413_v45 }
 0x110   : > { %1028 = vst [vmem:[#allocation2 + $0x78] sm:$0xff] %v1008_v11  ;;  %v8410_v25 = vpack.c.bf16 %v1175_v15, %v1174_v22  ;;  %v1127_v59 = vld [vmem:[#allocation2 + $0x56] sm:$0xff]  ;;  %v438_v11 = vadd.f32 %v8274_v28, %v411_v60  ;;  %v1129_v46 = vld [vmem:[#allocation2 + $0x66] sm:$0xff]  ;;  %s8581_s21 = scalar_lea.vmem %s9886_s2, %s7680_s17  ;;  %vm9084_vm8 = vmpackc.low %vm3279_vm7, %vm7979_vm2 }
 0x111   : > { %v6924_v18 = vpop.f32.mrb[12].mxu0  ;;  %7869 = vmatprep.mubr.msk.bf16.mxu0 %vm7867_vm11, %v7868_v27  ;;  %v9894_v7 = vand.u32 15, %v8438_v51  ;;  %v7769_v28 = vld [vmem:[%s9888_s4 + $0x160] sm:$0xff]   ;;  %vm9103_vm10 = vmpackc.low %vm9072_vm6, %vm7979_vm2  ;;  %vm9115_vm11 = vcmp.lt.s32.totalorder %v778_v1, 12 }
 0x112   : > { %v712_v23 = vadd.f32 %v6924_v18, %v435_v6  ;;  %v667_v24 = vpop.f32.mrb[13].mxu0  ;;  %7872 = vmatmul.mubr.msk.bf16.gmra.mrb[32].mxu0 %vm7870_vm13, %v7871_v39  ;;  %v1126_v6 = vld [vmem:[#allocation2 + $0x4e] sm:$0xff]  ;;  %vm9147_vm13 = vcmp.lt.s32.totalorder %v820_v35, 12 }
 0x113   : > { %v710_v30 = vadd.f32 %v667_v24, %v433_v12  ;;  %v6925_v32 = vpop.f32.mrb[14].mxu0  ;;  %1571 = vmatmul.mubr.bf16.gmra.mrb[12].mxu1 %v8407_v20  ;;  %v8454_v10 = vpack.c.bf16 %v1127_v59, %v1126_v6  ;;  %vm996_vm3 = vcmp.lt.s32.totalorder %v9894_v7, 10  ;;  %v7752_v6 = vld [vmem:[%s9888_s4 + $0x148] sm:$0xff]  }
 0x114   : > { %1033 = vst [vmem:[#allocation2 + $0xa0] sm:$0xff] %v712_v23  ;;  %v713_v43 = vadd.f32 %v6925_v32, %v436_v16  ;;  %v670_v44 = vpop.f32.mrb[15].mxu0  ;;  %1578 = vmatprep.mubr.bf16.mxu1 %v8410_v25  ;;  %v8457_v16 = vpack.c.bf16 %v1177_v4, %v1176_v3  ;;  %vm8489_vm4 = vmpackc.low %vm996_vm3, %vm7979_vm2  ;;  %v1130_v4 = vld [vmem:[#allocation2 + $0x6e] sm:$0xff] }
 0x115   : > { %1031 = vst [vmem:[#allocation2 + $0x90] sm:$0xff] %v710_v30  ;;  %v8440_v53 = vadd.f32 %v670_v44, %v434_v21  ;;  %v1128_v44 = vld [vmem:[#allocation2 + $0x5e] sm:$0xff]  ;;  %v7784_v59 = vld [vmem:[%s9889_s5 + $0x8] sm:$0xff]  }
 0x116   : > { %v1014_v56 = vsel %vm8417_vm12, %v713_v43, 0.0  ;;  %v7877_v27 = vpack.c.bf16 %v713_v43, %v712_v23  ;;  %v8484_v23 = vpack.c.bf16 %v1129_v46, %v1128_v44  ;;  %v1178_v43 = vld [vmem:[#allocation2 + $0x6f] sm:$0xff]  ;;  %v1181_v3 = vld [vmem:[#allocation2 + $0x87] sm:$0xff]  ;;  %vm9135_vm12 = vmpackc.low %vm9115_vm11, %vm7979_vm2 }
 0x117   : > { %1034 = vst [vmem:[#allocation2 + $0xa8] sm:$0xff] %v1014_v56  ;;  %v1012_v61 = vsel %vm8431_vm14, %v8440_v53, 0.0  ;;  %v7874_v21 = vpack.c.bf16 %v8440_v53, %v710_v30  ;;  %v1179_v50 = vld [vmem:[#allocation2 + $0x77] sm:$0xff]  ;;  %v7770_v44 = vld [vmem:[%s9888_s4 + $0x168] sm:$0xff]   ;;  %v7782_v56 = vld [vmem:[%s9889_s5] sm:$0xff]  }
 0x118   : > { %1032 = vst [vmem:[#allocation2 + $0x98] sm:$0xff] %v1012_v61  ;;  %v8486_v45 = vpack.c.bf16 %v1179_v50, %v1178_v43  ;;  %v1131_v61 = vld [vmem:[#allocation2 + $0x76] sm:$0xff]  ;;  %vm9155_vm14 = vmpackc.low %vm9096_vm9, %vm7979_vm2 }
 0x119   : > { %v6928_v9 = vpop.f32.mrb[16].mxu0  ;;  %7875 = vmatprep.mubr.msk.bf16.mxu0 %vm8462_vm15, %v7874_v21  ;;  %v7771_v50 = vld [vmem:[%s9888_s4 + $0x170] sm:$0xff]  }
 0x11a   : > { %v716_v12 = vadd.f32 %v6928_v9, %v439_v57  ;;  %v683_v15 = vpop.f32.mrb[17].mxu0  ;;  %7878 = vmatmul.mubr.msk.bf16.gmra.mrb[36].mxu0 %vm7876_vm1, %v7877_v27  ;;  %vm9197_vm1 = vcmp.lt.s32.totalorder %v848_v14, 12 }
 0x11b   : > { %v714_v22 = vadd.f32 %v683_v15, %v437_v62  ;;  %v6929_v24 = vpop.f32.mrb[18].mxu0  ;;  %1579 = vmatmul.mubr.bf16.gmra.mrb[16].mxu1 %v8454_v10  ;;  %v1180_v62 = vld [vmem:[#allocation2 + $0x7f] sm:$0xff] }
 0x11c   : > { %1037 = vst [vmem:[#allocation2 + $0xc0] sm:$0xff] %v716_v12  ;;  %v717_v30 = vadd.f32 %v6929_v24, %v440_v5  ;;  %v686_v32 = vpop.f32.mrb[19].mxu0  ;;  %1586 = vmatprep.mubr.bf16.mxu1 %v8457_v16  ;;  %v8513_v5 = vpack.c.bf16 %v1131_v61, %v1130_v4  ;;  %v8518_v9 = vpack.c.bf16 %v1181_v3, %v1180_v62  ;;  %v7772_v4 = vld [vmem:[%s9888_s4 + $0x178] sm:$0xff]  }
 0x11d   : > { %1035 = vst [vmem:[#allocation2 + $0xb0] sm:$0xff] %v714_v22  ;;  %v715_v34 = vadd.f32 %v686_v32, %v438_v11  ;;  %v1132_v11 = vld [vmem:[#allocation2 + $0x7e] sm:$0xff]  ;;  %v1134_v32 = vld [vmem:[#allocation2 + $0x8e] sm:$0xff] }
 0x11e   : > { %v1018_v39 = vsel %vm8471_vm0, %v717_v30, 0.0  ;;  %v8506_v60 = vpack.c.bf16 %v717_v30, %v716_v12  ;;  %v1133_v12 = vld [vmem:[#allocation2 + $0x86] sm:$0xff] }
 0x11f   : > { %1038 = vst [vmem:[#allocation2 + $0xc8] sm:$0xff] %v1018_v39  ;;  %v1016_v33 = vsel %vm996_vm3, %v715_v34, 0.0  ;;  %v8493_v57 = vpack.c.bf16 %v715_v34, %v714_v22  ;;  %v1183_v15 = vld [vmem:[#allocation2 + $0x97] sm:$0xff]  ;;  %v8528_v21 = vpack.c.bf16 %v1133_v12, %v1132_v11  ;;  %v1182_v22 = vld [vmem:[#allocation2 + $0x8f] sm:$0xff]  ;;  %v1184_v27 = vld [vmem:[#allocation2 + $0x9f] sm:$0xff] }
 0x120   : > { %1036 = vst [vmem:[#allocation2 + $0xb8] sm:$0xff] %v1016_v33  ;;  %v1135_v24 = vld [vmem:[#allocation2 + $0x96] sm:$0xff]  ;;  %v1185_v30 = vld [vmem:[#allocation2 + $0xa7] sm:$0xff]  ;;  %v1136_v46 = vld [vmem:[#allocation2 + $0x9e] sm:$0xff] }
 0x121   : > { %7881 = vmatprep.mubr.msk.bf16.mxu0 %vm8489_vm4, %v8493_v57  ;;  %v8542_v34 = vpack.c.bf16 %v1135_v24, %v1134_v32  ;;  %v8544_v39 = vpack.c.bf16 %v1185_v30, %v1184_v27  ;;  %v1137_v33 = vld [vmem:[#allocation2 + $0xa6] sm:$0xff]  ;;  %vm9205_vm3 = vmpackc.low %vm9147_vm13, %vm7979_vm2 }
 0x122   : > { %7884 = vmatmul.mubr.msk.bf16.gmra.mrb[40].mxu0 %vm8502_vm5, %v8506_v60  ;;  %v8556_v61 = vpack.c.bf16 %v1137_v33, %v1136_v46  ;;  %v1039_v24 = vld [vmem:[%s8581_s21] sm:$0xff]  ;;  %v1040_v27 = vld [vmem:[%s8581_s21 + $0x8] sm:$0xff] }
 0x123   : > { %1587 = vmatmul.mubr.bf16.gmra.mrb[20].mxu1 %v8484_v23  ;;  %2249 = vmatprep.mubr.bf16.mxu0 %v8154_v52  ;;  %v7759_v52 = vld [vmem:[%s9888_s4 + $0x150] sm:$0xff]  }
 0x124   : > { %1594 = vmatprep.mubr.bf16.mxu1 %v8486_v45  ;;  %v1186_v62 = vld [vmem:[#allocation2 + $0xaf] sm:$0xff] }
 0x126   : > { %v1189_v12 = vld [vmem:[#allocation2 + $0xc7] sm:$0xff] }
 0x127   : > { %v1187_v43 = vld [vmem:[#allocation2 + $0xb7] sm:$0xff]  ;;  %v1188_v11 = vld [vmem:[#allocation2 + $0xbf] sm:$0xff] }
 0x128   : > { %v8558_v3 = vpack.c.bf16 %v1187_v43, %v1186_v62  ;;  %v1140_v30 = vld [vmem:[#allocation2 + $0xbe] sm:$0xff]  ;;  %v1141_v32 = vld [vmem:[#allocation2 + $0xc6] sm:$0xff] }
 0x12a   : > { %2250 = vmatmul.mubr.bf16.vlgmr.msra.gmra.mrb[44].mxu0 %v8156_v55  ;;  %v8530_v55 = vpack.c.bf16 %v1183_v15, %v1182_v22  ;;  %v1138_v15 = vld [vmem:[#allocation2 + $0xae] sm:$0xff] }
 0x12b   : > { %1595 = vmatmul.mubr.bf16.gmra.mrb[24].mxu1 %v8513_v5  ;;  %6971 = vmatpush3.bf16.msra.mxu0 %v8211_v8  ;;  %v7766_v8 = vld [vmem:[%s9888_s4 + $0x158] sm:$0xff]  }
 0x12c   : > { %1602 = vmatprep.mubr.bf16.mxu1 %v8518_v9  ;;  %2257 = vmatprep.mubr.bf16.mxu0 %v8359_v40 }
 0x12d   : > { %6972 = vmatprep.subr.bf16.mxu0 %v7752_v6 }
 0x12f   : > { %6973 = vmatpush3.bf16.msra.mxu0 %v7752_v6  ;;  %v1139_v6 = vld [vmem:[#allocation2 + $0xb6] sm:$0xff] }
 0x130   : > { %6974 = vmatprep.subr.bf16.mxu0 %v7759_v52  ;;  %v8573_v22 = vpack.c.bf16 %v1139_v6, %v1138_v15  ;;  %v1041_v15 = vld [vmem:[%s8581_s21 + $0x10] sm:$0xff] }
 0x132   : > { %2258 = vmatmul.mubr.bf16.gmra.mrb[48].mxu0 %v8361_v41 }
 0x133   : > { %1603 = vmatmul.mubr.bf16.gmra.mrb[28].mxu1 %v8528_v21  ;;  %2265 = vmatprep.mubr.bf16.mxu0 %v8366_v48 }
 0x134   : > { %1610 = vmatprep.mubr.bf16.mxu1 %v8530_v55  ;;  %6975 = vmatpush3.bf16.msra.mxu0 %v7759_v52  ;;  %v8570_v52 = vld [vmem:[%s9888_s4 + $0x200] sm:$0xff]  }
 0x135   : > { %6976 = vmatprep.subr.bf16.mxu0 %v7766_v8 }
 0x138   : > { %6977 = vmatpush3.bf16.msra.mxu0 %v7766_v8  ;;  %v8575_v8 = vpack.c.bf16 %v1189_v12, %v1188_v11 }
 0x139   : > { %6978 = vmatprep.subr.bf16.mxu0 %v7769_v28 }
 0x13a   : > { %2266 = vmatmul.mubr.bf16.gmra.mrb[52].mxu0 %v8407_v20 }
 0x13b   : > { %1611 = vmatmul.mubr.bf16.gmra.mrb[32].mxu1 %v8542_v34  ;;  %2273 = vmatprep.mubr.bf16.mxu0 %v8410_v25 }
 0x13c   : > { %1618 = vmatprep.mubr.bf16.mxu1 %v8544_v39  ;;  %6979 = vmatpush3.bf16.msra.mxu0 %v7769_v28  ;;  %v8591_v28 = vld [vmem:[%s9891_s7] ss:$0 sm:$0xff] }
 0x13d   : > { %6980 = vmatprep.subr.bf16.mxu0 %v7770_v44  ;;  %v1070_v46 = vadd.f32 %v8591_v28, %v1039_v24  ;;  %v1071_v62 = vadd.f32 %v8591_v28, %v1040_v27  ;;  %v1072_v27 = vadd.f32 %v8591_v28, %v1041_v15  ;;  %v1925_v15 = vld [vmem:[#allocation2 + $0x68] sm:$0xff] }
 0x140   : > { %6981 = vmatpush3.bf16.msra.mxu0 %v7770_v44  ;;  %v6220_v44 = vpop.f32.mrb[0].mxu1 }
 0x141   : > { %6982 = vmatprep.subr.bf16.mxu0 %v7771_v50  ;;  %v6221_v33 = vpop.f32.mrb[1].mxu1 }
 0x142   : > { %2274 = vmatmul.mubr.bf16.gmra.mrb[56].mxu0 %v8454_v10  ;;  %v6223_v43 = vpop.f32.mrb[2].mxu1 }
 0x143   : > { %1619 = vmatmul.mubr.bf16.gmra.mrb[36].mxu1 %v8556_v61  ;;  %2281 = vmatprep.mubr.bf16.mxu0 %v8457_v16  ;;  %v6224_v6 = vpop.f32.mrb[3].mxu1 }
 0x144   : > { %1626 = vmatprep.mubr.bf16.mxu1 %v8558_v3  ;;  %6983 = vmatpush3.bf16.msra.mxu0 %v7771_v50  ;;  %v6222_v50 = vadd.f32 %v6221_v33, %v6220_v44  ;;  %v6225_v12 = vadd.f32 %v6224_v6, %v6223_v43  ;;  %v1042_v44 = vld [vmem:[%s8581_s21 + $0x18] sm:$0xff]  ;;  %v6226_v33 = vpop.f32.mrb[4].mxu1 }
 0x145   : > { %6984 = vmatprep.subr.bf16.mxu0 %v7772_v4 }
 0x146   : > { %v8598_v11 = vadd.f32 %v6222_v50, %v1070_v46  ;;  %v8605_v24 = vadd.f32 %v6225_v12, %v1071_v62  ;;  %v1073_v50 = vadd.f32 %v8591_v28, %v1042_v44  ;;  %v1920_v62 = vld [vmem:[#allocation2 + $0x40] sm:$0xff]  ;;  %v1923_v12 = vld [vmem:[#allocation2 + $0x58] sm:$0xff]  ;;  %v1922_v44 = vld [vmem:[#allocation2 + $0x50] sm:$0xff] }
 0x148   : > { %6985 = vmatpush3.bf16.msra.mxu0 %v7772_v4  ;;  %v8596_v4 = vpack.c.bf16 %v1141_v32, %v1140_v30  ;;  %v6227_v30 = vpop.f32.mrb[5].mxu1 }
 0x149   : > { %7010 = vmatprep.subr.bf16.mxu0 %v8570_v52  ;;  %v6228_v32 = vadd.f32 %v6227_v30, %v6226_v33  ;;  %v6229_v46 = vpop.f32.mrb[6].mxu1  ;;  %v1924_v33 = vld [vmem:[#allocation2 + $0x60] sm:$0xff] }
 0x14a   : > { %2282 = vmatmul.mubr.bf16.gmra.mrb[60].mxu0 %v8484_v23  ;;  %v6230_v43 = vpop.f32.mrb[7].mxu1  ;;  %v7777_v30 = vld [vmem:[%s9888_s4 + $0x220] sm:$0xff]  }
 0x14b   : > { %1627 = vmatmul.mubr.bf16.gmra.mrb[40].mxu1 %v8573_v22  ;;  %2289 = vmatprep.mubr.bf16.mxu0 %v8486_v45  ;;  %v8610_v6 = vadd.f32 %v6228_v32, %v1072_v27  ;;  %v6231_v7 = vadd.f32 %v6230_v43, %v6229_v46  ;;  %v1944_v27 = vpack.c.bf16 %v1925_v15, %v1924_v33  ;;  %v1929_v32 = vld [vmem:[#allocation2 + $0x88] sm:$0xff]  ;;  %v1926_v46 = vld [vmem:[#allocation2 + $0x70] sm:$0xff]  ;;  %v1928_v43 = vld [vmem:[#allocation2 + $0x80] sm:$0xff] }
 0x14c   : > { %1634 = vmatprep.mubr.bf16.mxu1 %v8575_v8  ;;  %v2638_v15 = vld [vmem:[#allocation2 + $0xc8] sm:$0xff]  ;;  %v7787_v33 = vld [vmem:[%s9889_s5 + $0x58] sm:$0xff]  }
 0x152   : > { %2290 = vmatmul.mubr.bf16.gmra.mrb[64].mxu0 %v8513_v5 }
 0x153   : > { %1635 = vmatmul.mubr.bf16.gmra.mrb[44].mxu1 %v8596_v4  ;;  %2297 = vmatprep.mubr.bf16.mxu0 %v8518_v9 }
 0x154   : > { %2952 = vmatprep.mubr.bf16.mxu1 %v8359_v40  ;;  %v8616_v40 = vadd.f32 %v6231_v7, %v1073_v50  ;;  %v1843_v7 = vld [vmem:[#allocation2 + $0xd6] sm:$0xff] }
 0x15a   : > { %2298 = vmatmul.mubr.bf16.gmra.mrb[68].mxu0 %v8528_v21 }
 0x15b   : > { %2953 = vmatmul.mubr.bf16.vlgmr.msra.gmra.mrb[48].mxu1 %v8361_v41  ;;  %2305 = vmatprep.mubr.bf16.mxu0 %v8530_v55  ;;  %v1890_v41 = vld [vmem:[#allocation2 + $0xcf] sm:$0xff] }
 0x15c   : > { %2960 = vmatprep.mubr.bf16.mxu1 %v8366_v48  ;;  %v1891_v48 = vld [vmem:[#allocation2 + $0xd7] sm:$0xff] }
 0x162   : > { %2306 = vmatmul.mubr.bf16.gmra.mrb[72].mxu0 %v8542_v34 }
 0x163   : > { %2961 = vmatmul.mubr.bf16.gmra.mrb[52].mxu1 %v8407_v20  ;;  %2313 = vmatprep.mubr.bf16.mxu0 %v8544_v39  ;;  %v8630_v20 = vpack.c.bf16 %v1891_v48, %v1890_v41  ;;  %v1946_v41 = vpack.c.bf16 %v1929_v32, %v1928_v43  ;;  %v7779_v48 = vld [vmem:[%s9888_s4 + $0x230] sm:$0xff]  }
 0x164   : > { %2968 = vmatprep.mubr.bf16.mxu1 %v8410_v25  ;;  %v1842_v25 = vld [vmem:[#allocation2 + $0xce] sm:$0xff] }
 0x16a   : > { %2314 = vmatmul.mubr.bf16.gmra.mrb[76].mxu0 %v8556_v61 }
 0x16b   : > { %2969 = vmatmul.mubr.bf16.gmra.mrb[56].mxu1 %v8454_v10  ;;  %2321 = vmatprep.mubr.bf16.mxu0 %v8558_v3  ;;  %v8636_v10 = vpack.c.bf16 %v1843_v7, %v1842_v25  ;;  %v1933_v25 = vld [vmem:[#allocation2 + $0xa8] sm:$0xff]  ;;  %v1932_v7 = vld [vmem:[#allocation2 + $0xa0] sm:$0xff] }
 0x16c   : > { %2976 = vmatprep.mubr.bf16.mxu1 %v8457_v16  ;;  %v1919_v16 = vld [vmem:[#allocation2 + $0x38] sm:$0xff] }
 0x172   : > { %2322 = vmatmul.mubr.bf16.gmra.mrb[80].mxu0 %v8573_v22 }
 0x173   : > { %2977 = vmatmul.mubr.bf16.gmra.mrb[60].mxu1 %v8484_v23  ;;  %2329 = vmatprep.mubr.bf16.mxu0 %v8575_v8  ;;  %v1918_v23 = vld [vmem:[#allocation2 + $0x30] sm:$0xff] }
 0x174   : > { %2984 = vmatprep.mubr.bf16.mxu1 %v8486_v45  ;;  %v1921_v45 = vld [vmem:[#allocation2 + $0x48] sm:$0xff] }
 0x17a   : > { %2330 = vmatmul.mubr.bf16.gmra.mrb[84].mxu0 %v8596_v4 }
 0x17b   : > { %2985 = vmatmul.mubr.bf16.gmra.mrb[64].mxu1 %v8513_v5  ;;  %2337 = vmatprep.mubr.bf16.mxu0 %v8630_v20  ;;  %v8642_v5 = vpack.c.bf16 %v1919_v16, %v1918_v23  ;;  %v1948_v16 = vpack.c.bf16 %v1933_v25, %v1932_v7  ;;  %v2593_v23 = vld [vmem:[#allocation2 + $0xdf] sm:$0xff]  ;;  %v1045_v25 = vld [vmem:[%s8581_s21 + $0x30] sm:$0xff] }
 0x17c   : > { %2992 = vmatprep.mubr.bf16.mxu1 %v8518_v9  ;;  %v7774_v9 = vld [vmem:[%s9888_s4 + $0x208] sm:$0xff]  }
 0x182   : > { %2338 = vmatmul.mubr.bf16.gmra.mrb[88].mxu0 %v8636_v10 }
 0x183   : > { %2993 = vmatmul.mubr.bf16.gmra.mrb[68].mxu1 %v8528_v21  ;;  %6986 = vmatprep.mubr.bf16.mxu0 %v7978_v49  ;;  %v8649_v21 = vpack.c.bf16 %v1921_v45, %v1920_v62  ;;  %v2594_v45 = vld [vmem:[#allocation2 + $0xe7] sm:$0xff]  ;;  %v7785_v62 = vld [vmem:[%s9889_s5 + $0x50] sm:$0xff]  }
 0x184   : > { %3000 = vmatprep.mubr.bf16.mxu1 %v8530_v55  ;;  %v7775_v55 = vld [vmem:[%s9888_s4 + $0x210] sm:$0xff]  }
 0x18a   : > { %6987 = vmatmul.mubr.bf16.vlgmr.msra.gmra.mrb[20].mxu0 %v8642_v5 }
 0x18b   : > { %3001 = vmatmul.mubr.bf16.gmra.mrb[72].mxu1 %v8542_v34  ;;  %7011 = vmatpush3.bf16.msra.mxu0 %v8570_v52  ;;  %v1943_v34 = vpack.c.bf16 %v1923_v12, %v1922_v44  ;;  %v1927_v52 = vld [vmem:[#allocation2 + $0x78] sm:$0xff]  ;;  %v2637_v44 = vld [vmem:[#allocation2 + $0xc0] sm:$0xff] }
 0x18c   : > { %3008 = vmatprep.mubr.bf16.mxu1 %v8544_v39  ;;  %6990 = vmatprep.mubr.bf16.mxu0 %v8649_v21  ;;  %v7776_v39 = vld [vmem:[%s9888_s4 + $0x218] sm:$0xff]   ;;  %v1945_v50 = vpack.c.bf16 %v1927_v52, %v1926_v46  ;;  %v1044_v52 = vld [vmem:[%s8581_s21 + $0x28] sm:$0xff] }
 0x18d   : > { %7012 = vmatprep.subr.bf16.mxu0 %v7774_v9 }
 0x18f   : > { %7013 = vmatpush3.bf16.msra.mxu0 %v7774_v9  ;;  %v2606_v9 = vpack.c.bf16 %v2594_v45, %v2593_v23 }
 0x190   : > { %7014 = vmatprep.subr.bf16.mxu0 %v7775_v55 }
 0x192   : > { %6991 = vmatmul.mubr.bf16.gmra.mrb[24].mxu0 %v1943_v34 }
 0x193   : > { %3009 = vmatmul.mubr.bf16.gmra.mrb[76].mxu1 %v8556_v61  ;;  %6994 = vmatprep.mubr.bf16.mxu0 %v1944_v27  ;;  %v7778_v61 = vld [vmem:[%s9888_s4 + $0x228] sm:$0xff]  }
 0x194   : > { %3016 = vmatprep.mubr.bf16.mxu1 %v8558_v3  ;;  %7015 = vmatpush3.bf16.msra.mxu0 %v7775_v55  ;;  %v1930_v3 = vld [vmem:[#allocation2 + $0x90] sm:$0xff] }
 0x195   : > { %7016 = vmatprep.subr.bf16.mxu0 %v7776_v39  ;;  %v2635_v55 = vld [vmem:[#allocation2 + $0xb0] sm:$0xff] }
 0x198   : > { %7017 = vmatpush3.bf16.msra.mxu0 %v7776_v39  ;;  %v1043_v39 = vld [vmem:[%s8581_s21 + $0x20] sm:$0xff] }
 0x199   : > { %7018 = vmatprep.subr.bf16.mxu0 %v7777_v30  ;;  %v1074_v32 = vadd.f32 %v8591_v28, %v1043_v39  ;;  %v7792_v39 = vld [vmem:[%s9889_s5 + $0x28] sm:$0xff]  }
 0x19a   : > { %6995 = vmatmul.mubr.bf16.gmra.mrb[28].mxu0 %v1945_v50 }
 0x19b   : > { %3017 = vmatmul.mubr.bf16.gmra.mrb[80].mxu1 %v8573_v22  ;;  %6998 = vmatprep.mubr.bf16.mxu0 %v1946_v41  ;;  %v7780_v22 = vld [vmem:[%s9888_s4 + $0x238] sm:$0xff]  }
 0x19c   : > { %3024 = vmatprep.mubr.bf16.mxu1 %v8575_v8  ;;  %7019 = vmatpush3.bf16.msra.mxu0 %v7777_v30  ;;  %v7886_v8 = vpack.c.bf16 %v8440_v53, %v1930_v3  ;;  %v2545_v53 = vld [vmem:[#allocation2 + $0xde] sm:$0xff] }
 0x19d   : > { %7020 = vmatprep.subr.bf16.mxu0 %v7778_v61 }
 0x1a0   : > { %7021 = vmatpush3.bf16.msra.mxu0 %v7778_v61 }
 0x1a1   : > { %7022 = vmatprep.subr.bf16.mxu0 %v7779_v48 }
 0x1a2   : > { %7887 = vmatmul.mubr.msk.bf16.gmra.mrb[32].mxu0 %vm8462_vm15, %v7886_v8  ;;  %v1076_v8 = vadd.f32 %v8591_v28, %v1045_v25  ;;  %vm9167_vm15 = vcmp.lt.s32.totalorder %v806_v42, 12 }
 0x1a3   : > { %3025 = vmatmul.mubr.bf16.gmra.mrb[84].mxu1 %v8596_v4  ;;  %7002 = vmatprep.mubr.bf16.mxu0 %v1948_v16  ;;  %v2546_v4 = vld [vmem:[#allocation2 + $0xe6] sm:$0xff]  ;;  %vm9185_vm0 = vmpackc.low %vm9167_vm15, %vm7979_vm2 }
 0x1a4   : > { %3032 = vmatprep.mubr.bf16.mxu1 %v8630_v20  ;;  %7023 = vmatpush3.bf16.msra.mxu0 %v7779_v48  ;;  %v2558_v18 = vpack.c.bf16 %v2546_v4, %v2545_v53  ;;  %v7781_v20 = vld [vmem:[%s9889_s5 + $0x40] sm:$0xff]  }
 0x1a5   : > { %7024 = vmatprep.subr.bf16.mxu0 %v7780_v22  ;;  %6528 = vmatprep.subr.bf16.mxu1 %v7781_v20  ;;  %v7789_v4 = vld [vmem:[%s9889_s5 + $0x60] sm:$0xff]  }
 0x1a6   : > { %6529 = vmatpush3.bf16.msra.mxu1 %v7782_v56 }
 0x1a8   : > { %7025 = vmatpush3.bf16.msra.mxu0 %v7780_v22 }
 0x1aa   : > { %7890 = vmatmul.mubr.msk.bf16.gmra.mrb[36].mxu0 %vm8489_vm4, %v8493_v57  ;;  %v7783_v57 = vld [vmem:[%s9889_s5 + $0x48] sm:$0xff]   ;;  %vm9217_vm4 = vcmp.lt.s32.totalorder %v834_v17, 12 }
 0x1ab   : > { %3033 = vmatmul.mubr.bf16.gmra.mrb[88].mxu1 %v8636_v10  ;;  %7893 = vmatprep.mubr.msk.bf16.mxu0 %vm8502_vm5, %v8506_v60  ;;  %v2632_v60 = vld [vmem:[#allocation2 + $0x98] sm:$0xff]  ;;  %vm9235_vm5 = vmpackc.low %vm9217_vm4, %vm7979_vm2 }
 0x1ac   : > { %3040 = vmatprep.mubr.bf16.mxu1 %v2606_v9  ;;  %6530 = vmatprep.subr.bf16.mxu1 %v7783_v57  ;;  %v2649_v10 = vpack.c.bf16 %v2632_v60, %v1930_v3  ;;  %v1047_v57 = vld [vmem:[%s8581_s21 + $0x40] sm:$0xff]  ;;  %v1048_v60 = vld [vmem:[%s8581_s21 + $0x48] sm:$0xff] }
 0x1ad   : > { %6531 = vmatpush3.bf16.msra.mxu1 %v7784_v59 }
 0x1ae   : > { %6532 = vmatprep.subr.bf16.mxu1 %v7785_v62 }
 0x1b2   : > { %7007 = vmatmul.mubr.bf16.gmra.mrb[40].mxu0 %v7978_v49 }
 0x1b3   : > { %3041 = vmatmul.mubr.bf16.gmra.mrb[92].mxu1 %v2558_v18  ;;  %7026 = vmatprep.mubr.bf16.mxu0 %v8642_v5  ;;  %v2636_v5 = vld [vmem:[#allocation2 + $0xb8] sm:$0xff] }
 0x1b4   : > { %v2651_v12 = vpack.c.bf16 %v2636_v5, %v2635_v55  ;;  %v1078_v5 = vadd.f32 %v8591_v28, %v1047_v57 }
 0x1ba   : > { %7027 = vmatmul.mubr.bf16.vlgmr.msra.gmra.mrb[20].mxu0 %v8649_v21  ;;  %v7786_v21 = vld [vmem:[%s9889_s5 + $0x10] sm:$0xff]  }
 0x1bb   : > { %7030 = vmatprep.mubr.bf16.mxu0 %v1943_v34  ;;  %6533 = vmatpush3.bf16.msra.mxu1 %v7786_v21  ;;  %v2652_v34 = vpack.c.bf16 %v2638_v15, %v2637_v44  ;;  %v7795_v44 = vld [vmem:[%s9889_s5 + $0x80] sm:$0xff]  }
 0x1bc   : > { %6534 = vmatprep.subr.bf16.mxu1 %v7787_v33  ;;  %7050 = vmatprep.subr.bf16.mxu0 %v7795_v44 }
 0x1bd   : > { %7051 = vmatpush3.bf16.msra.mxu0 %v7795_v44 }
 0x1c2   : > { %7031 = vmatmul.mubr.bf16.gmra.mrb[24].mxu0 %v1944_v27  ;;  %v7788_v27 = vld [vmem:[%s9889_s5 + $0x18] sm:$0xff]  }
 0x1c3   : > { %7034 = vmatprep.mubr.bf16.mxu0 %v1945_v50  ;;  %6535 = vmatpush3.bf16.msra.mxu1 %v7788_v27  ;;  %v7791_v27 = vld [vmem:[%s9889_s5 + $0x68] sm:$0xff]  }
 0x1c4   : > { %6536 = vmatprep.subr.bf16.mxu1 %v7789_v4  ;;  %v7800_v4 = vld [vmem:[%s9889_s5 + $0x98] sm:$0xff]  }
 0x1ca   : > { %7035 = vmatmul.mubr.bf16.gmra.mrb[28].mxu0 %v1946_v41  ;;  %v1075_v41 = vadd.f32 %v8591_v28, %v1044_v52  ;;  %v1049_v52 = vld [vmem:[%s8581_s21 + $0x50] sm:$0xff] }
 0x1cb   : > { %7038 = vmatprep.mubr.bf16.mxu0 %v2649_v10 }
 0x1d2   : > { %7039 = vmatmul.mubr.bf16.gmra.mrb[32].mxu0 %v1948_v16  ;;  %v1046_v16 = vld [vmem:[%s8581_s21 + $0x38] sm:$0xff] }
 0x1d3   : > { %7042 = vmatprep.mubr.bf16.mxu0 %v2651_v12  ;;  %v1077_v53 = vadd.f32 %v8591_v28, %v1046_v16  ;;  %v1079_v12 = vadd.f32 %v8591_v28, %v1048_v60 }
 0x1da   : > { %7043 = vmatmul.mubr.bf16.gmra.mrb[36].mxu0 %v2652_v34 }
 0x1db   : > { %7046 = vmatprep.mubr.bf16.mxu0 %v7978_v49 }
 0x1de   : > { %v6232_v30 = vpop.f32.mrb[8].mxu1 }
 0x1df   : > { %v6233_v46 = vpop.f32.mrb[9].mxu1 }
 0x1e0   : > { %v6234_v50 = vadd.f32 %v6233_v46, %v6232_v30  ;;  %v6235_v43 = vpop.f32.mrb[10].mxu1  ;;  %v7796_v46 = vld [vmem:[%s9889_s5 + $0x88] sm:$0xff]  }
 0x1e1   : > { %v6236_v61 = vpop.f32.mrb[11].mxu1  ;;  %7052 = vmatprep.subr.bf16.mxu0 %v7796_v46 }
 0x1e2   : > { %v8720_v3 = vadd.f32 %v6234_v50, %v1074_v32  ;;  %v6237_v48 = vadd.f32 %v6236_v61, %v6235_v43  ;;  %7047 = vmatmul.mubr.bf16.gmra.mrb[40].mxu0 %v7978_v49  ;;  %v7790_v49 = vld [vmem:[%s9889_s5 + $0x20] sm:$0xff]   ;;  %v1050_v32 = vld [vmem:[%s8581_s21 + $0x58] sm:$0xff]  ;;  %v1080_v43 = vadd.f32 %v8591_v28, %v1049_v52 }
 0x1e3   : > { %6537 = vmatpush3.bf16.msra.mxu1 %v7790_v49  ;;  %v1081_v25 = vadd.f32 %v8591_v28, %v1050_v32  ;;  %7053 = vmatpush3.bf16.msra.mxu0 %v7796_v46 }
 0x1e4   : > { %v8724_v7 = vadd.f32 %v6237_v48, %v1075_v41  ;;  %6538 = vmatprep.subr.bf16.mxu1 %v7791_v27  ;;  %v7801_v27 = vld [vmem:[%s9889_s5 + $0xa0] sm:$0xff]  }
 0x1e6   : > { %v6238_v22 = vpop.f32.mrb[12].mxu1 }
 0x1e7   : > { %v6239_v23 = vpop.f32.mrb[13].mxu1  ;;  %6539 = vmatpush3.bf16.msra.mxu1 %v7792_v39 }
 0x1e8   : > { %v6240_v45 = vadd.f32 %v6239_v23, %v6238_v22  ;;  %v6241_v9 = vpop.f32.mrb[14].mxu1  ;;  %v7797_v22 = vld [vmem:[%s9889_s5 + $0x90] sm:$0xff]  }
 0x1e9   : > { %v6242_v18 = vpop.f32.mrb[15].mxu1  ;;  %7054 = vmatprep.subr.bf16.mxu0 %v7797_v22 }
 0x1ea   : > { %v8735_v20 = vadd.f32 %v6240_v45, %v1076_v8  ;;  %v6243_v56 = vadd.f32 %v6242_v18, %v6241_v9  ;;  %v1051_v45 = vld [vmem:[%s8581_s21 + $0x60] sm:$0xff]  ;;  %7055 = vmatpush3.bf16.msra.mxu0 %v7797_v22 }
 0x1eb   : > { %v1082_v18 = vadd.f32 %v8591_v28, %v1051_v45  ;;  %7056 = vmatprep.subr.bf16.mxu0 %v7800_v4 }
 0x1ec   : > { %v8738_v59 = vadd.f32 %v6243_v56, %v1077_v53  ;;  %v1052_v53 = vld [vmem:[%s8581_s21 + $0x68] sm:$0xff] }
 0x1ee   : > { %v6244_v10 = vpop.f32.mrb[16].mxu1  ;;  %7057 = vmatpush3.bf16.msra.mxu0 %v7800_v4 }
 0x1ef   : > { %v6245_v62 = vpop.f32.mrb[17].mxu1  ;;  %7058 = vmatprep.subr.bf16.mxu0 %v7801_v27 }
 0x1f0   : > { %v6246_v21 = vadd.f32 %v6245_v62, %v6244_v10  ;;  %v6247_v55 = vpop.f32.mrb[18].mxu1  ;;  %v1083_v62 = vadd.f32 %v8591_v28, %v1052_v53 }
 0x1f1   : > { %v6248_v15 = vpop.f32.mrb[19].mxu1 }
 0x1f2   : > { %v8746_v34 = vadd.f32 %v6246_v21, %v1078_v5  ;;  %v6249_v33 = vadd.f32 %v6248_v15, %v6247_v55  ;;  %v7794_v15 = vld [vmem:[%s9889_s5 + $0x30] sm:$0xff]   ;;  %7059 = vmatpush3.bf16.msra.mxu0 %v7801_v27  ;;  %v3410_v27 = vld [vmem:[#allocation3 + $0x16] sm:$0xff] }
 0x1f4   : > { %v8755_v30 = vadd.f32 %v6249_v33, %v1079_v12  ;;  %v7793_v12 = vld [vmem:[%s9889_s5 + $0x70] sm:$0xff]  }
 0x1f5   : > { %6540 = vmatprep.subr.bf16.mxu1 %v7793_v12  ;;  %v7799_v12 = vld [vmem:[%s9889_s5 + $0x38] sm:$0xff]  }
 0x1f6   : > { %v6250_v50 = vpop.f32.mrb[20].mxu1  ;;  %6541 = vmatpush3.bf16.msra.mxu1 %v7794_v15  ;;  %v3465_v15 = vld [vmem:[#allocation3 + $0xf] sm:$0xff] }
 0x1f7   : > { %v6251_v41 = vpop.f32.mrb[21].mxu1 }
 0x1f8   : > { %v6252_v61 = vadd.f32 %v6251_v41, %v6250_v50  ;;  %v6253_v48 = vpop.f32.mrb[22].mxu1  ;;  %v1053_v50 = vld [vmem:[%s8581_s21 + $0x70] sm:$0xff] }
 0x1f9   : > { %v6254_v16 = vpop.f32.mrb[23].mxu1 }
 0x1fa   : > { %v8766_v8 = vadd.f32 %v6252_v61, %v1080_v43  ;;  %v6255_v23 = vadd.f32 %v6254_v16, %v6253_v48  ;;  %v1054_v61 = vld [vmem:[%s8581_s21 + $0x78] sm:$0xff]  ;;  %v7802_v48 = vld [vmem:[%s9889_s5 + $0xa8] sm:$0xff]  }
 0x1fb   : > { %7060 = vmatprep.subr.bf16.mxu0 %v7802_v48  ;;  %v1085_v4 = vadd.f32 %v8591_v28, %v1054_v61  ;;  %v1056_v61 = vld [vmem:[%s8581_s21 + $0x88] sm:$0xff] }
 0x1fc   : > { %v8769_v9 = vadd.f32 %v6255_v23, %v1081_v25  ;;  %7061 = vmatpush3.bf16.msra.mxu0 %v7802_v48  ;;  %v7806_v48 = vld [vmem:[%s9889_s5 + $0xb8] sm:$0xff]  }
 0x1fd   : > { %v6328_v56 = vpop.f32.mrb[44].mxu0 }
 0x1fe   : > { %v6256_v49 = vpop.f32.mrb[24].mxu1  ;;  %v6329_v60 = vpop.f32.mrb[45].mxu0 }
 0x1ff   : > { %v6257_v57 = vpop.f32.mrb[25].mxu1  ;;  %v6330_v21 = vadd.f32 %v6329_v60, %v6328_v56  ;;  %v6331_v55 = vpop.f32.mrb[46].mxu0  ;;  %v1055_v56 = vld [vmem:[%s8581_s21 + $0x80] sm:$0xff]  ;;  %v7804_v60 = vld [vmem:[%s9889_s5 + $0xb0] sm:$0xff]  }
 0x200   : > { %v6258_v10 = vadd.f32 %v6257_v57, %v6256_v49  ;;  %v6259_v5 = vpop.f32.mrb[26].mxu1  ;;  %v6332_v33 = vpop.f32.mrb[47].mxu0  ;;  %7062 = vmatprep.subr.bf16.mxu0 %v7804_v60 }
 0x201   : > { %v6260_v44 = vpop.f32.mrb[27].mxu1  ;;  %v8789_v32 = vadd.f32 %v8598_v11, %v6330_v21  ;;  %v6333_v46 = vadd.f32 %v6332_v33, %v6331_v55  ;;  %v1084_v11 = vadd.f32 %v8591_v28, %v1053_v50  ;;  %v7798_v55 = vld [vmem:[%s9889_s5 + $0x78] sm:$0xff]   ;;  %7063 = vmatpush3.bf16.msra.mxu0 %v7804_v60 }
 0x202   : > { %v8786_v39 = vadd.f32 %v6258_v10, %v1082_v18  ;;  %v6261_v52 = vadd.f32 %v6260_v44, %v6259_v5  ;;  %v3466_v44 = vld [vmem:[#allocation3 + $0x17] sm:$0xff]  ;;  %v3409_v33 = vld [vmem:[#allocation3 + $0xe] sm:$0xff]  ;;  %6542 = vmatprep.subr.bf16.mxu1 %v7798_v55  ;;  %7064 = vmatprep.subr.bf16.mxu0 %v7806_v48 }
 0x203   : > { %v8795_v41 = vadd.f32 %v8605_v24, %v6333_v46  ;;  %v3437_v50 = vpack.c.bf16 %v3410_v27, %v3409_v33  ;;  %6543 = vmatpush3.bf16.msra.mxu1 %v7799_v12  ;;  %v7803_v12 = vld [vmem:[%s9889_s5 + $0x100] sm:$0xff]  }
 0x204   : > { %v8792_v43 = vadd.f32 %v6261_v52, %v1083_v62  ;;  %6650 = vmatprep.subr.bf16.mxu1 %v7803_v12  ;;  %v7805_v27 = vld [vmem:[%s9889_s5 + $0xc0] sm:$0xff]  }
 0x205   : > { %v6334_v16 = vpop.f32.mrb[48].mxu0  ;;  %7065 = vmatpush3.bf16.msra.mxu0 %v7806_v48  ;;  %v3411_v48 = vld [vmem:[#allocation3 + $0x1e] sm:$0xff] }
 0x206   : > { %v6262_v25 = vpop.f32.mrb[28].mxu1  ;;  %v6335_v23 = vpop.f32.mrb[49].mxu0 }
 0x207   : > { %v6263_v22 = vpop.f32.mrb[29].mxu1  ;;  %v6336_v24 = vadd.f32 %v6335_v23, %v6334_v16  ;;  %v6337_v49 = vpop.f32.mrb[50].mxu0 }
 0x208   : > { %v6264_v45 = vadd.f32 %v6263_v22, %v6262_v25  ;;  %v6265_v53 = vpop.f32.mrb[30].mxu1  ;;  %v6338_v57 = vpop.f32.mrb[51].mxu0 }
 0x209   : > { %v6266_v18 = vpop.f32.mrb[31].mxu1  ;;  %v8810_v62 = vadd.f32 %v8610_v6, %v6336_v24  ;;  %v6339_v21 = vadd.f32 %v6338_v57, %v6337_v49  ;;  %v3493_v6 = vpack.c.bf16 %v3466_v44, %v3465_v15  ;;  %v7853_v49 = vld [vmem:[#allocation2] sm:$0xff]  ;;  %v1057_v15 = vld [vmem:[%s8581_s21 + $0x90] sm:$0xff] }
 0x20a   : > { %v8807_v10 = vadd.f32 %v6264_v45, %v1084_v11  ;;  %v6267_v5 = vadd.f32 %v6266_v18, %v6265_v53  ;;  %v1086_v11 = vadd.f32 %v8591_v28, %v1055_v56  ;;  %v1087_v53 = vadd.f32 %v8591_v28, %v1056_v61 }
 0x20b   : > { %v8821_v46 = vadd.f32 %v8616_v40, %v6339_v21  ;;  %3871 = vmatprep.mubr.bf16.mxu1 %v3493_v6  ;;  %v8829_v18 = vpack.c.bf16 %v7853_v49, %v7853_v49  ;;  %v3468_v6 = vld [vmem:[#allocation3 + $0x27] sm:$0xff] }
 0x20c   : > { %v8818_v52 = vadd.f32 %v6267_v5, %v1085_v4  ;;  %3872 = vmatmul.mubr.bf16.vlgmr.msra.gmra.mrb[96].mxu1 %v3437_v50  ;;  %v1058_v50 = vld [vmem:[%s8581_s21 + $0x98] sm:$0xff] }
 0x20d   : > { %v6340_v16 = vpop.f32.mrb[52].mxu0  ;;  %7066 = vmatprep.mubr.bf16.mxu0 %v8829_v18  ;;  %6651 = vmatpush3.bf16.msra.mxu1 %v7805_v27  ;;  %v1059_v27 = vld [vmem:[%s8581_s21 + $0xa0] sm:$0xff] }
 0x20e   : > { %v6268_v25 = vpop.f32.mrb[32].mxu1  ;;  %v6341_v23 = vpop.f32.mrb[53].mxu0  ;;  %7067 = vmatmul.mubr.bf16.vlgmr.msra.gmra.mrb[92].mxu0 %v8829_v18 }
 0x20f   : > { %v6269_v22 = vpop.f32.mrb[33].mxu1  ;;  %v6342_v4 = vadd.f32 %v6341_v23, %v6340_v16  ;;  %v6343_v24 = vpop.f32.mrb[54].mxu0  ;;  %v1088_v16 = vadd.f32 %v8591_v28, %v1057_v15 }
 0x210   : > { %v6270_v40 = vadd.f32 %v6269_v22, %v6268_v25  ;;  %v6271_v45 = vpop.f32.mrb[34].mxu1  ;;  %v6344_v60 = vpop.f32.mrb[55].mxu0  ;;  %v3412_v25 = vld [vmem:[#allocation3 + $0x26] sm:$0xff] }
 0x211   : > { %v6272_v57 = vpop.f32.mrb[35].mxu1  ;;  %v8834_v21 = vadd.f32 %v8720_v3, %v6342_v4  ;;  %v6345_v55 = vadd.f32 %v6344_v60, %v6343_v24  ;;  %v3467_v3 = vld [vmem:[#allocation3 + $0x1f] sm:$0xff]  ;;  %v1089_v4 = vadd.f32 %v8591_v28, %v1058_v50 }
 0x212   : > { %v8831_v56 = vadd.f32 %v6270_v40, %v1086_v11  ;;  %v6273_v5 = vadd.f32 %v6272_v57, %v6271_v45  ;;  %v8851_v61 = vpack.c.bf16 %v3468_v6, %v3467_v3  ;;  %v1060_v50 = vld [vmem:[%s8581_s21 + $0xa8] sm:$0xff] }
 0x213   : > { %v8844_v33 = vadd.f32 %v8724_v7, %v6345_v55  ;;  %v8854_v7 = vpack.c.bf16 %v3412_v25, %v3411_v48  ;;  %v7807_v48 = vld [vmem:[%s9889_s5 + $0x108] sm:$0xff]  }
 0x214   : > { %v8841_v44 = vadd.f32 %v6273_v5, %v1087_v53  ;;  %3879 = vmatprep.mubr.bf16.mxu1 %v8851_v61  ;;  %6652 = vmatprep.subr.bf16.mxu1 %v7807_v48 }
 0x215   : > { %v6346_v22 = vpop.f32.mrb[56].mxu0  ;;  %3880 = vmatmul.mubr.bf16.gmra.mrb[100].mxu1 %v8854_v7 }
 0x216   : > { %v6274_v11 = vpop.f32.mrb[36].mxu1  ;;  %v6347_v40 = vpop.f32.mrb[57].mxu0 }
 0x217   : > { %v6275_v23 = vpop.f32.mrb[37].mxu1  ;;  %v6348_v24 = vadd.f32 %v6347_v40, %v6346_v22  ;;  %v6349_v49 = vpop.f32.mrb[58].mxu0 }
 0x218   : > { %v6276_v45 = vadd.f32 %v6275_v23, %v6274_v11  ;;  %v6277_v53 = vpop.f32.mrb[38].mxu1  ;;  %v6350_v60 = vpop.f32.mrb[59].mxu0  ;;  %v1090_v11 = vadd.f32 %v8591_v28, %v1059_v27  ;;  %v1061_v27 = vld [vmem:[%s8581_s21 + $0xb0] sm:$0xff] }
 0x219   : > { %v6278_v57 = vpop.f32.mrb[39].mxu1  ;;  %v8862_v12 = vadd.f32 %v8735_v20, %v6348_v24  ;;  %v6351_v15 = vadd.f32 %v6350_v60, %v6349_v49  ;;  %v7808_v49 = vld [vmem:[%s9889_s5 + $0xc8] sm:$0xff]  }
 0x21a   : > { %v8859_v5 = vadd.f32 %v6276_v45, %v1088_v16  ;;  %v6279_v55 = vadd.f32 %v6278_v57, %v6277_v53  ;;  %v1091_v45 = vadd.f32 %v8591_v28, %v1060_v50  ;;  %6653 = vmatpush3.bf16.msra.mxu1 %v7808_v49 }
 0x21b   : > { %v8868_v6 = vadd.f32 %v8738_v59, %v6351_v15 }
 0x21c   : > { %v8865_v3 = vadd.f32 %v6279_v55, %v1089_v4 }
 0x21d   : > { %v6352_v16 = vpop.f32.mrb[60].mxu0 }
 0x21e   : > { %v6280_v25 = vpop.f32.mrb[40].mxu1  ;;  %v6353_v20 = vpop.f32.mrb[61].mxu0 }
 0x21f   : > { %v6281_v22 = vpop.f32.mrb[41].mxu1  ;;  %v6354_v59 = vadd.f32 %v6353_v20, %v6352_v16  ;;  %v6355_v53 = vpop.f32.mrb[62].mxu0 }
 0x220   : > { %v6282_v23 = vadd.f32 %v6281_v22, %v6280_v25  ;;  %v6283_v40 = vpop.f32.mrb[42].mxu1  ;;  %v6356_v24 = vpop.f32.mrb[63].mxu0  ;;  %v1062_v25 = vld [vmem:[%s8581_s21 + $0xb8] sm:$0xff]  ;;  %v1092_v22 = vadd.f32 %v8591_v28, %v1061_v27  ;;  %v7809_v27 = vld [vmem:[%s9889_s5 + $0x110] sm:$0xff]  }
 0x221   : > { %v6284_v4 = vpop.f32.mrb[43].mxu1  ;;  %v8882_v55 = vadd.f32 %v8746_v34, %v6354_v59  ;;  %v6357_v15 = vadd.f32 %v6356_v24, %v6355_v53  ;;  %v1093_v34 = vadd.f32 %v8591_v28, %v1062_v25  ;;  %v7810_v25 = vld [vmem:[%s9889_s5 + $0xd0] sm:$0xff]   ;;  %6654 = vmatprep.subr.bf16.mxu1 %v7809_v27 }
 0x222   : > { %v8879_v57 = vadd.f32 %v6282_v23, %v1090_v11  ;;  %v6285_v60 = vadd.f32 %v6284_v4, %v6283_v40  ;;  %6655 = vmatpush3.bf16.msra.mxu1 %v7810_v25 }
 0x223   : > { %v8888_v50 = vadd.f32 %v8755_v30, %v6357_v15  ;;  %v7811_v30 = vld [vmem:[%s9889_s5 + $0x140] sm:$0xff]  }
 0x224   : > { %v8885_v48 = vadd.f32 %v6285_v60, %v1091_v45  ;;  %7094 = vmatprep.subr.bf16.mxu0 %v7811_v30 }
 0x225   : > { %v6358_v20 = vpop.f32.mrb[64].mxu0  ;;  %7095 = vmatpush3.bf16.msra.mxu0 %v7811_v30 }
 0x226   : > { %v6286_v16 = vpop.f32.mrb[44].mxu1  ;;  %v6359_v11 = vpop.f32.mrb[65].mxu0 }
 0x227   : > { %v6287_v0 = vpop.f32.mrb[45].mxu1  ;;  %v6360_v59 = vadd.f32 %v6359_v11, %v6358_v20  ;;  %v6361_v53 = vpop.f32.mrb[66].mxu0 }
 0x228   : > { %v6288_v23 = vadd.f32 %v6287_v0, %v6286_v16  ;;  %v6289_v40 = vpop.f32.mrb[46].mxu1  ;;  %v6362_v24 = vpop.f32.mrb[67].mxu0 }
 0x229   : > { %v6290_v4 = vpop.f32.mrb[47].mxu1  ;;  %v8899_v60 = vadd.f32 %v8766_v8, %v6360_v59  ;;  %v6363_v15 = vadd.f32 %v6362_v24, %v6361_v53  ;;  %v7812_v8 = vld [vmem:[%s9889_s5 + $0x148] sm:$0xff]  }
 0x22a   : > { %v8896_v45 = vadd.f32 %v6288_v23, %v1092_v22  ;;  %v6291_v49 = vadd.f32 %v6290_v4, %v6289_v40  ;;  %7096 = vmatprep.subr.bf16.mxu0 %v7812_v8  ;;  %v7813_v4 = vld [vmem:[%s9889_s5 + $0x150] sm:$0xff]  }
 0x22b   : > { %v8904_v28 = vadd.f32 %v8769_v9, %v6363_v15  ;;  %7097 = vmatpush3.bf16.msra.mxu0 %v7812_v8  ;;  %v7816_v8 = vld [vmem:[%s9889_s5 + $0x158] sm:$0xff]  }
 0x22c   : > { %v8901_v0 = vadd.f32 %v6291_v49, %v1093_v34  ;;  %7098 = vmatprep.subr.bf16.mxu0 %v7813_v4 }
 0x22d   : > { %v6364_v22 = vpop.f32.mrb[68].mxu0 }
 0x22e   : > { %v6436_v16 = vpop.f32.mrb[48].mxu1  ;;  %v6365_v11 = vpop.f32.mrb[69].mxu0 }
 0x22f   : > { %v6437_v20 = vpop.f32.mrb[49].mxu1  ;;  %v6366_v40 = vadd.f32 %v6365_v11, %v6364_v22  ;;  %v6367_v34 = vpop.f32.mrb[70].mxu0  ;;  %7099 = vmatpush3.bf16.msra.mxu0 %v7813_v4 }
 0x230   : > { %v6438_v9 = vadd.f32 %v6437_v20, %v6436_v16  ;;  %v6439_v23 = vpop.f32.mrb[50].mxu1  ;;  %v6368_v53 = vpop.f32.mrb[71].mxu0  ;;  %7100 = vmatprep.subr.bf16.mxu0 %v7816_v8 }
 0x231   : > { %v6440_v59 = vpop.f32.mrb[51].mxu1  ;;  %v8919_v30 = vadd.f32 %v8786_v39, %v6366_v40  ;;  %v6369_v49 = vadd.f32 %v6368_v53, %v6367_v34 }
 0x232   : > { %v6441_v24 = vadd.f32 %v6440_v59, %v6439_v23  ;;  %v8922_v15 = vadd.f32 %v8789_v32, %v6438_v9 }
 0x233   : > { %v8925_v27 = vadd.f32 %v8792_v43, %v6369_v49  ;;  %7101 = vmatpush3.bf16.msra.mxu0 %v7816_v8  ;;  %v7814_v8 = vld [vmem:[%s9889_s5 + $0x118] sm:$0xff]  }
 0x234   : > { %v8928_v25 = vadd.f32 %v8795_v41, %v6441_v24  ;;  %v7817_v41 = vld [vmem:[%s9889_s5 + $0x160] sm:$0xff]   ;;  %6656 = vmatprep.subr.bf16.mxu1 %v7814_v8 }
 0x235   : > { %v6370_v22 = vpop.f32.mrb[72].mxu0  ;;  %7102 = vmatprep.subr.bf16.mxu0 %v7817_v41 }
 0x236   : > { %v6442_v16 = vpop.f32.mrb[52].mxu1  ;;  %v6371_v20 = vpop.f32.mrb[73].mxu0 }
 0x237   : > { %v6443_v39 = vpop.f32.mrb[53].mxu1  ;;  %v6372_v9 = vadd.f32 %v6371_v20, %v6370_v22  ;;  %v6373_v23 = vpop.f32.mrb[74].mxu0  ;;  %7103 = vmatpush3.bf16.msra.mxu0 %v7817_v41 }
 0x238   : > { %v6444_v11 = vadd.f32 %v6443_v39, %v6442_v16  ;;  %v6445_v32 = vpop.f32.mrb[54].mxu1  ;;  %v6374_v40 = vpop.f32.mrb[75].mxu0 }
 0x239   : > { %v6446_v43 = vpop.f32.mrb[55].mxu1  ;;  %v8937_v59 = vadd.f32 %v8807_v10, %v6372_v9  ;;  %v6375_v53 = vadd.f32 %v6374_v40, %v6373_v23  ;;  %v7815_v10 = vld [vmem:[%s9889_s5 + $0xd8] sm:$0xff]   ;;  %v7821_v40 = vld [vmem:[%s9889_s5 + $0x170] sm:$0xff]  }
 0x23a   : > { %v6447_v34 = vadd.f32 %v6446_v43, %v6445_v32  ;;  %v8940_v4 = vadd.f32 %v8810_v62, %v6444_v11  ;;  %v7818_v62 = vld [vmem:[%s9889_s5 + $0x168] sm:$0xff]   ;;  %6657 = vmatpush3.bf16.msra.mxu1 %v7815_v10  ;;  %v7819_v43 = vld [vmem:[%s9889_s5 + $0x120] sm:$0xff]  }
 0x23b   : > { %v8943_v24 = vadd.f32 %v8818_v52, %v6375_v53  ;;  %7104 = vmatprep.subr.bf16.mxu0 %v7818_v62  ;;  %6658 = vmatprep.subr.bf16.mxu1 %v7819_v43 }
 0x23c   : > { %v8946_v49 = vadd.f32 %v8821_v46, %v6447_v34  ;;  %7105 = vmatpush3.bf16.msra.mxu0 %v7818_v62 }
 0x23d   : > { %v6376_v22 = vpop.f32.mrb[76].mxu0  ;;  %7106 = vmatprep.subr.bf16.mxu0 %v7821_v40 }
 0x23e   : > { %v6448_v16 = vpop.f32.mrb[56].mxu1  ;;  %v6377_v39 = vpop.f32.mrb[77].mxu0 }
 0x23f   : > { %v6449_v52 = vpop.f32.mrb[57].mxu1  ;;  %v6378_v11 = vadd.f32 %v6377_v39, %v6376_v22  ;;  %v6379_v32 = vpop.f32.mrb[78].mxu0 }
 0x240   : > { %v6450_v46 = vadd.f32 %v6449_v52, %v6448_v16  ;;  %v6451_v20 = vpop.f32.mrb[58].mxu1  ;;  %v6380_v23 = vpop.f32.mrb[79].mxu0  ;;  %7107 = vmatpush3.bf16.msra.mxu0 %v7821_v40  ;;  %v7822_v16 = vld [vmem:[%s9889_s5 + $0x178] sm:$0xff]  }
 0x241   : > { %v6452_v9 = vpop.f32.mrb[59].mxu1  ;;  %v8964_v34 = vadd.f32 %v8831_v56, %v6378_v11  ;;  %v6381_v53 = vadd.f32 %v6380_v23, %v6379_v32  ;;  %7108 = vmatprep.subr.bf16.mxu0 %v7822_v16 }
 0x242   : > { %v6453_v41 = vadd.f32 %v6452_v9, %v6451_v20  ;;  %v8967_v8 = vadd.f32 %v8834_v21, %v6450_v46 }
 0x243   : > { %v8970_v10 = vadd.f32 %v8841_v44, %v6381_v53  ;;  %v7820_v44 = vld [vmem:[%s9889_s5 + $0xe0] sm:$0xff]  }
 0x244   : > { %v8973_v62 = vadd.f32 %v8844_v33, %v6453_v41  ;;  %7109 = vmatpush3.bf16.msra.mxu0 %v7822_v16  ;;  %6659 = vmatpush3.bf16.msra.mxu1 %v7820_v44 }
 0x245   : > { %v6382_v56 = vpop.f32.mrb[80].mxu0 }
 0x246   : > { %v6454_v22 = vpop.f32.mrb[60].mxu1  ;;  %v6383_v39 = vpop.f32.mrb[81].mxu0 }
 0x247   : > { %v6455_v52 = vpop.f32.mrb[61].mxu1  ;;  %v6384_v20 = vadd.f32 %v6383_v39, %v6382_v56  ;;  %v6385_v11 = vpop.f32.mrb[82].mxu0 }
 0x248   : > { %v6456_v21 = vadd.f32 %v6455_v52, %v6454_v22  ;;  %v6457_v46 = vpop.f32.mrb[62].mxu1  ;;  %v6386_v32 = vpop.f32.mrb[83].mxu0 }
 0x249   : > { %v6458_v33 = vpop.f32.mrb[63].mxu1  ;;  %v8982_v23 = vadd.f32 %v8859_v5, %v6384_v20  ;;  %v6387_v43 = vadd.f32 %v6386_v32, %v6385_v11 }
 0x24a   : > { %v6459_v9 = vadd.f32 %v6458_v33, %v6457_v46  ;;  %v8985_v40 = vadd.f32 %v8862_v12, %v6456_v21  ;;  %v7823_v12 = vld [vmem:[%s9889_s5 + $0x128] sm:$0xff]  }
 0x24b   : > { %v8988_v41 = vadd.f32 %v8865_v3, %v6387_v43  ;;  %v7824_v3 = vld [vmem:[%s9889_s5 + $0xe8] sm:$0xff]   ;;  %6660 = vmatprep.subr.bf16.mxu1 %v7823_v12 }
 0x24c   : > { %v8991_v53 = vadd.f32 %v8868_v6, %v6459_v9  ;;  %6661 = vmatpush3.bf16.msra.mxu1 %v7824_v3 }
 0x24d   : > { %v6388_v56 = vpop.f32.mrb[84].mxu0 }
 0x24e   : > { %v6460_v22 = vpop.f32.mrb[64].mxu1  ;;  %v6389_v52 = vpop.f32.mrb[85].mxu0 }
 0x24f   : > { %v6461_v16 = vpop.f32.mrb[65].mxu1  ;;  %v6390_v33 = vadd.f32 %v6389_v52, %v6388_v56  ;;  %v6391_v5 = vpop.f32.mrb[86].mxu0 }
 0x250   : > { %v6462_v39 = vadd.f32 %v6461_v16, %v6460_v22  ;;  %v6463_v46 = vpop.f32.mrb[66].mxu1  ;;  %v6392_v11 = vpop.f32.mrb[87].mxu0 }
 0x251   : > { %v6464_v20 = vpop.f32.mrb[67].mxu1  ;;  %v9000_v21 = vadd.f32 %v8879_v57, %v6390_v33  ;;  %v6393_v44 = vadd.f32 %v6392_v11, %v6391_v5 }
 0x252   : > { %v6465_v6 = vadd.f32 %v6464_v20, %v6463_v46  ;;  %v9003_v32 = vadd.f32 %v8882_v55, %v6462_v39 }
 0x253   : > { %v9006_v9 = vadd.f32 %v8885_v48, %v6393_v44 }
 0x254   : > { %v9009_v43 = vadd.f32 %v8888_v50, %v6465_v6 }
 0x255   : > { %v6394_v56 = vpop.f32.mrb[88].mxu0 }
 0x256   : > { %v6466_v22 = vpop.f32.mrb[68].mxu1  ;;  %v6395_v52 = vpop.f32.mrb[89].mxu0 }
 0x257   : > { %v6467_v16 = vpop.f32.mrb[69].mxu1  ;;  %v6396_v57 = vadd.f32 %v6395_v52, %v6394_v56  ;;  %v6397_v33 = vpop.f32.mrb[90].mxu0  ;;  %v7825_v52 = vld [vmem:[%s9889_s5 + $0x130] sm:$0xff]  }
 0x258   : > { %v6468_v46 = vadd.f32 %v6467_v16, %v6466_v22  ;;  %v6469_v20 = vpop.f32.mrb[70].mxu1  ;;  %v6398_v11 = vpop.f32.mrb[91].mxu0  ;;  %6662 = vmatprep.subr.bf16.mxu1 %v7825_v52  ;;  %v7834_v52 = vld [vmem:[%s9889_s5 + $0xf8] sm:$0xff]  }
 0x259   : > { %v6470_v5 = vpop.f32.mrb[71].mxu1  ;;  %v7279_v39 = vadd.f32 %v8896_v45, %v6396_v57  ;;  %v6399_v12 = vadd.f32 %v6398_v11, %v6397_v33  ;;  %v7826_v45 = vld [vmem:[%s9889_s5 + $0xf0] sm:$0xff]  }
 0x25a   : > { %v6471_v55 = vadd.f32 %v6470_v5, %v6469_v20  ;;  %v9013_v48 = vadd.f32 %v8899_v60, %v6468_v46  ;;  %v7827_v60 = vld [vmem:[%s9889_s5 + $0x1c0] sm:$0xff]   ;;  %6663 = vmatpush3.bf16.msra.mxu1 %v7826_v45 }
 0x25b   : > { %v7287_v50 = vadd.f32 %v8901_v0, %v6399_v12  ;;  %6772 = vmatprep.subr.bf16.mxu0 %v7827_v60 }
 0x25c   : > { %v9017_v3 = vadd.f32 %v8904_v28, %v6471_v55 }
 0x25e   : > { %v6472_v6 = vpop.f32.mrb[72].mxu1 }
 0x25f   : > { %v6473_v44 = vpop.f32.mrb[73].mxu1 }
 0x260   : > { %v6474_v22 = vadd.f32 %v6473_v44, %v6472_v6  ;;  %v6475_v16 = vpop.f32.mrb[74].mxu1 }
 0x261   : > { %v6476_v56 = vpop.f32.mrb[75].mxu1 }
 0x262   : > { %v6477_v0 = vadd.f32 %v6476_v56, %v6475_v16  ;;  %v9029_v28 = vadd.f32 %v8919_v30, %v6474_v22 }
 0x264   : > { %v9032_v46 = vadd.f32 %v8925_v27, %v6477_v0  ;;  %v7832_v27 = vld [vmem:[%s9889_s5 + $0x138] sm:$0xff]  }
 0x265   : > { %6664 = vmatprep.subr.bf16.mxu1 %v7832_v27 }
 0x266   : > { %v6478_v20 = vpop.f32.mrb[76].mxu1  ;;  %6665 = vmatpush3.bf16.msra.mxu1 %v7834_v52 }
 0x267   : > { %v6479_v57 = vpop.f32.mrb[77].mxu1  ;;  %7182 = vmatprep.subr.bf16.mxu1 %v7827_v60 }
 0x268   : > { %v6480_v33 = vadd.f32 %v6479_v57, %v6478_v20  ;;  %v6481_v5 = vpop.f32.mrb[78].mxu1 }
 0x269   : > { %v6482_v11 = vpop.f32.mrb[79].mxu1 }
 0x26a   : > { %v6483_v55 = vadd.f32 %v6482_v11, %v6481_v5  ;;  %v9035_v12 = vadd.f32 %v8937_v59, %v6480_v33 }
 0x26c   : > { %v9038_v6 = vadd.f32 %v8943_v24, %v6483_v55 }
 0x26e   : > { %v6484_v30 = vpop.f32.mrb[80].mxu1 }
 0x26f   : > { %v6485_v44 = vpop.f32.mrb[81].mxu1 }
 0x270   : > { %v6486_v22 = vadd.f32 %v6485_v44, %v6484_v30  ;;  %v6487_v16 = vpop.f32.mrb[82].mxu1 }
 0x271   : > { %v6488_v56 = vpop.f32.mrb[83].mxu1 }
 0x272   : > { %v6489_v45 = vadd.f32 %v6488_v56, %v6487_v16  ;;  %v9047_v59 = vadd.f32 %v8964_v34, %v6486_v22 }
 0x274   : > { %v9050_v24 = vadd.f32 %v8970_v10, %v6489_v45 }
 0x276   : > { %v6490_v0 = vpop.f32.mrb[84].mxu1 }
 0x277   : > { %v6491_v20 = vpop.f32.mrb[85].mxu1 }
 0x278   : > { %v6492_v57 = vadd.f32 %v6491_v20, %v6490_v0  ;;  %v6493_v33 = vpop.f32.mrb[86].mxu1 }
 0x279   : > { %v6494_v5 = vpop.f32.mrb[87].mxu1 }
 0x27a   : > { %v6495_v11 = vadd.f32 %v6494_v5, %v6493_v33  ;;  %v9053_v55 = vadd.f32 %v8982_v23, %v6492_v57 }
 0x27c   : > { %v9056_v30 = vadd.f32 %v8988_v41, %v6495_v11 }
 0x27e   : > { %v6496_v34 = vpop.f32.mrb[88].mxu1 }
 0x27f   : > { %v6497_v44 = vpop.f32.mrb[89].mxu1 }
 0x280   : > { %v6498_v22 = vadd.f32 %v6497_v44, %v6496_v34  ;;  %v6499_v16 = vpop.f32.mrb[90].mxu1 }
 0x281   : > { %v6500_v10 = vpop.f32.mrb[91].mxu1 }
 0x282   : > { %v6501_v56 = vadd.f32 %v6500_v10, %v6499_v16  ;;  %v9059_v60 = vadd.f32 %v9000_v21, %v6498_v22 }
 0x284   : > { %v9062_v27 = vadd.f32 %v9006_v9, %v6501_v56  ;;  %v9420_v9 = vld [vmem:[%s9889_s5 + $0x1e0] sm:$0xff]  }
 0x286   : > { %v6502_v52 = vpop.f32.mrb[92].mxu1 }
 0x287   : > { %v6503_v45 = vpop.f32.mrb[93].mxu1 }
 0x288   : > { %v6504_v0 = vadd.f32 %v6503_v45, %v6502_v52  ;;  %v6505_v23 = vpop.f32.mrb[94].mxu1 }
 0x289   : > { %v6506_v20 = vpop.f32.mrb[95].mxu1 }
 0x28a   : > { %v6507_v57 = vadd.f32 %v6506_v20, %v6505_v23  ;;  %v9064_v41 = vadd.f32 %v7279_v39, %v6504_v0 }
 0x28c   : > { %v9066_v33 = vadd.f32 %v7287_v50, %v6507_v57 }
 0x28d   : > { %v7028_v5 = vpop.f32.mrb[20].mxu0 }
 0x28e   : > { %v7201_v11 = vadd.f32 %v8940_v4, %v7028_v5  ;;  %v3083_v34 = vpop.f32.mrb[21].mxu0 }
 0x28f   : > { %v7205_v21 = vadd.f32 %v8922_v15, %v3083_v34  ;;  %v7029_v44 = vpop.f32.mrb[22].mxu0 }
 0x290   : > { %3352 = vst [vmem:[#allocation3 + $0x40] sm:$0xff] %v7201_v11  ;;  %v7209_v22 = vadd.f32 %v8946_v49, %v7029_v44  ;;  %v3086_v39 = vpop.f32.mrb[23].mxu0  ;;  %v9384_v49 = vld [vmem:[%s9889_s5 + $0x1d0] sm:$0xff]  }
 0x291   : > { %3350 = vst [vmem:[#allocation3 + $0x30] sm:$0xff] %v7205_v21  ;;  %v7213_v4 = vadd.f32 %v8928_v25, %v3086_v39 }
 0x292   : > { %v3329_v15 = vsel %vm9072_vm6, %v7209_v22, 0.0  ;;  %v9107_v56 = vpack.c.bf16 %v7209_v22, %v7201_v11 }
 0x293   : > { %3353 = vst [vmem:[#allocation3 + $0x48] sm:$0xff] %v3329_v15  ;;  %v3327_v50 = vsel %vm3279_vm7, %v7213_v4, 0.0  ;;  %v9088_v31 = vpack.c.bf16 %v7213_v4, %v7205_v21  ;;  %vm9256_vm7 = vmpackc.low %vm9197_vm1, %vm7979_vm2 }
 0x294   : > { %3351 = vst [vmem:[#allocation3 + $0x38] sm:$0xff] %v3327_v50 }
 0x295   : > { %v7032_v29 = vpop.f32.mrb[24].mxu0  ;;  %7896 = vmatprep.mubr.msk.bf16.mxu0 %vm9084_vm8, %v9088_v31 }
 0x296   : > { %v7217_v36 = vadd.f32 %v8985_v40, %v7032_v29  ;;  %v3099_v16 = vpop.f32.mrb[25].mxu0  ;;  %7899 = vmatmul.mubr.msk.bf16.gmra.mrb[96].mxu0 %vm9103_vm10, %v9107_v56 }
 0x297   : > { %v7221_v38 = vadd.f32 %v8967_v8, %v3099_v16  ;;  %v7033_v25 = vpop.f32.mrb[26].mxu0 }
 0x298   : > { %3356 = vst [vmem:[#allocation3 + $0x60] sm:$0xff] %v7217_v36  ;;  %v7225_v47 = vadd.f32 %v8991_v53, %v7033_v25  ;;  %v3102_v63 = vpop.f32.mrb[27].mxu0  ;;  %v3469_v0 = vld [vmem:[#allocation3 + $0x2f] sm:$0xff] }
 0x299   : > { %3354 = vst [vmem:[#allocation3 + $0x50] sm:$0xff] %v7221_v38  ;;  %v7229_v52 = vadd.f32 %v8973_v62, %v3102_v63  ;;  %v3413_v23 = vld [vmem:[#allocation3 + $0x2e] sm:$0xff] }
 0x29a   : > { %v3333_v45 = vsel %vm9096_vm9, %v7225_v47, 0.0  ;;  %v3472_v20 = vld [vmem:[#allocation3 + $0x47] sm:$0xff]  ;;  %v9159_v50 = vpack.c.bf16 %v7225_v47, %v7217_v36 }
 0x29b   : > { %3357 = vst [vmem:[#allocation3 + $0x68] sm:$0xff] %v3333_v45  ;;  %v3331_v53 = vsel %vm9115_vm11, %v7229_v52, 0.0  ;;  %v3470_v57 = vld [vmem:[#allocation3 + $0x37] sm:$0xff]  ;;  %v3471_v54 = vld [vmem:[#allocation3 + $0x3f] sm:$0xff]  ;;  %v9139_v22 = vpack.c.bf16 %v7229_v52, %v7221_v38 }
 0x29c   : > { %v3414_v5 = vld [vmem:[#allocation3 + $0x36] sm:$0xff]  ;;  %3355 = vst [vmem:[#allocation3 + $0x58] sm:$0xff] %v3331_v53  ;;  %v9124_v1 = vpack.c.bf16 %v3470_v57, %v3469_v0  ;;  %v9130_v44 = vpack.c.bf16 %v3472_v20, %v3471_v54  ;;  %v3415_v16 = vld [vmem:[#allocation3 + $0x3e] sm:$0xff]  ;;  %v3416_v38 = vld [vmem:[#allocation3 + $0x46] sm:$0xff] }
 0x29d   : > { %v9126_v11 = vpack.c.bf16 %v3414_v5, %v3413_v23  ;;  %v7036_v34 = vpop.f32.mrb[28].mxu0  ;;  %7902 = vmatprep.mubr.msk.bf16.mxu0 %vm9135_vm12, %v9139_v22  ;;  %v9177_v42 = vpack.c.bf16 %v3416_v38, %v3415_v16  ;;  %v9953_v38 = vand.u32 15, %v8438_v51 }
 0x29e   : > { %v7233_v62 = vadd.f32 %v9013_v48, %v7036_v34  ;;  %v3115_v21 = vpop.f32.mrb[29].mxu0  ;;  %3887 = vmatprep.mubr.bf16.mxu1 %v9124_v1  ;;  %7905 = vmatmul.mubr.msk.bf16.gmra.mrb[100].mxu0 %vm9155_vm14, %v9159_v50 }
 0x29f   : > { %v7237_v48 = vadd.f32 %v9003_v32, %v3115_v21  ;;  %v7037_v39 = vpop.f32.mrb[30].mxu0  ;;  %3888 = vmatmul.mubr.bf16.gmra.mrb[104].mxu1 %v9126_v11  ;;  %vm9268_vm9 = vcmp.lt.s32.totalorder %v9953_v38, 12 }
 0x2a0   : > { %3360 = vst [vmem:[#allocation3 + $0x80] sm:$0xff] %v7233_v62  ;;  %v7241_v13 = vadd.f32 %v9017_v3, %v7037_v39  ;;  %v3118_v35 = vpop.f32.mrb[31].mxu0  ;;  %3895 = vmatprep.mubr.bf16.mxu1 %v9130_v44  ;;  %v3473_v10 = vld [vmem:[#allocation3 + $0x4f] sm:$0xff]  ;;  %vm9287_vm11 = vmpackc.low %vm9268_vm9, %vm7979_vm2 }
 0x2a1   : > { %3358 = vst [vmem:[#allocation3 + $0x70] sm:$0xff] %v7237_v48  ;;  %v7245_v29 = vadd.f32 %v9009_v43, %v3118_v35  ;;  %v3417_v2 = vld [vmem:[#allocation3 + $0x4e] sm:$0xff]  ;;  %v9456_v43 = vld [vmem:[%s9889_s5 + $0x1f0] sm:$0xff]  }
 0x2a2   : > { %v3337_v36 = vsel %vm9147_vm13, %v7241_v13, 0.0  ;;  %v9209_v20 = vpack.c.bf16 %v7241_v13, %v7233_v62  ;;  %v3476_v34 = vld [vmem:[#allocation3 + $0x67] sm:$0xff] }
 0x2a3   : > { %3361 = vst [vmem:[#allocation3 + $0x88] sm:$0xff] %v3337_v36  ;;  %v3335_v3 = vsel %vm9167_vm15, %v7245_v29, 0.0  ;;  %v3474_v25 = vld [vmem:[#allocation3 + $0x57] sm:$0xff]  ;;  %v9189_v52 = vpack.c.bf16 %v7245_v29, %v7237_v48  ;;  %v3475_v54 = vld [vmem:[#allocation3 + $0x5f] sm:$0xff]  ;;  %v3229_v29 = vadd.s32 184, %v8263_v26 }
 0x2a4   : > { %3359 = vst [vmem:[#allocation3 + $0x78] sm:$0xff] %v3335_v3  ;;  %v9180_v8 = vpack.c.bf16 %v3474_v25, %v3473_v10  ;;  %v3418_v5 = vld [vmem:[#allocation3 + $0x56] sm:$0xff]  ;;  %v9230_v39 = vpack.c.bf16 %v3476_v34, %v3475_v54  ;;  %v3227_v25 = vadd.s32 168, %v8263_v26 }
 0x2a5   : > { %v7040_v19 = vpop.f32.mrb[32].mxu0  ;;  %7908 = vmatprep.mubr.msk.bf16.mxu0 %vm9185_vm0, %v9189_v52  ;;  %v9227_v62 = vpack.c.bf16 %v3418_v5, %v3417_v2 }
 0x2a6   : > { %v7249_v47 = vadd.f32 %v9035_v12, %v7040_v19  ;;  %v3131_v63 = vpop.f32.mrb[33].mxu0  ;;  %7911 = vmatmul.mubr.msk.bf16.gmra.mrb[104].mxu0 %vm9205_vm3, %v9209_v20 }
 0x2a7   : > { %v7253_v45 = vadd.f32 %v9029_v28, %v3131_v63  ;;  %v7041_v0 = vpop.f32.mrb[34].mxu0  ;;  %3896 = vmatmul.mubr.bf16.gmra.mrb[108].mxu1 %v9177_v42  ;;  %v3420_v63 = vld [vmem:[#allocation3 + $0x66] sm:$0xff] }
 0x2a8   : > { %3364 = vst [vmem:[#allocation3 + $0xa0] sm:$0xff] %v7249_v47  ;;  %v7257_v58 = vadd.f32 %v9038_v6, %v7041_v0  ;;  %v3134_v14 = vpop.f32.mrb[35].mxu0  ;;  %3903 = vmatprep.mubr.bf16.mxu1 %v9180_v8  ;;  %v3241_v0 = vand.u32 15, %v3227_v25  ;;  %v3477_v26 = vld [vmem:[#allocation3 + $0x6f] sm:$0xff] }
 0x2a9   : > { %3362 = vst [vmem:[#allocation3 + $0x90] sm:$0xff] %v7253_v45  ;;  %v7261_v53 = vadd.f32 %v9032_v46, %v3134_v14  ;;  %v3421_v32 = vld [vmem:[#allocation3 + $0x6e] sm:$0xff] }
 0x2aa   : > { %v3341_v57 = vsel %vm9197_vm1, %v7257_v58, 0.0  ;;  %v9260_v16 = vpack.c.bf16 %v7257_v58, %v7249_v47  ;;  %v3419_v47 = vld [vmem:[#allocation3 + $0x5e] sm:$0xff]  ;;  %vm3299_vm1 = vcmp.lt.s32.totalorder %v3241_v0, 12  ;;  %v3424_v25 = vld [vmem:[#allocation3 + $0x86] sm:$0xff]  ;;  %v7845_v46 = vld [vmem:[%s9889_s5 + $0x200] sm:$0xff]  }
 0x2ab   : > { %3365 = vst [vmem:[#allocation3 + $0xa8] sm:$0xff] %v3341_v57  ;;  %v3339_v6 = vsel %vm9217_vm4, %v7261_v53, 0.0  ;;  %v9239_v4 = vpack.c.bf16 %v7261_v53, %v7253_v45  ;;  %v3478_v45 = vld [vmem:[#allocation3 + $0x77] sm:$0xff]  ;;  %v9279_v58 = vpack.c.bf16 %v3420_v63, %v3419_v47  ;;  %vm9327_vm4 = vmpackc.low %vm3299_vm1, %vm7979_vm2 }
 0x2ac   : > { %3363 = vst [vmem:[#allocation3 + $0x98] sm:$0xff] %v3339_v6  ;;  %v9282_v28 = vpack.c.bf16 %v3478_v45, %v3477_v26  ;;  %v3423_v3 = vld [vmem:[#allocation3 + $0x7e] sm:$0xff]  ;;  %v9357_v63 = vld [vmem:[%s9889_s5 + $0x180] sm:$0xff]  }
 0x2ad   : > { %v7044_v17 = vpop.f32.mrb[36].mxu0  ;;  %7914 = vmatprep.mubr.msk.bf16.mxu0 %vm9235_vm5, %v9239_v4  ;;  %v9378_v45 = vld [vmem:[%s9889_s5 + $0x188] sm:$0xff]  }
 0x2ae   : > { %v7265_v21 = vadd.f32 %v9053_v55, %v7044_v17  ;;  %v3147_v48 = vpop.f32.mrb[37].mxu0  ;;  %v9948_v55 = vand.u32 15, %v8424_v37  ;;  %7917 = vmatmul.mubr.msk.bf16.gmra.mrb[108].mxu0 %vm9256_vm7, %v9260_v16 }
 0x2af   : > { %v7269_v13 = vadd.f32 %v9047_v59, %v3147_v48  ;;  %v7045_v35 = vpop.f32.mrb[38].mxu0  ;;  %3904 = vmatmul.mubr.bf16.gmra.mrb[112].mxu1 %v9227_v62 }
 0x2b0   : > { %vm9247_vm6 = vcmp.lt.s32.totalorder %v9948_v55, 12  ;;  %3368 = vst [vmem:[#allocation3 + $0xc0] sm:$0xff] %v7265_v21  ;;  %v7273_v37 = vadd.f32 %v9056_v30, %v7045_v35  ;;  %v3150_v59 = vpop.f32.mrb[39].mxu0  ;;  %3911 = vmatprep.mubr.bf16.mxu1 %v9230_v39  ;;  %v3255_v30 = vand.u32 15, %v3229_v29  ;;  %v3479_v35 = vld [vmem:[#allocation3 + $0x7f] sm:$0xff]  ;;  %v3480_v55 = vld [vmem:[#allocation3 + $0x87] sm:$0xff] }
 0x2b1   : > { %3366 = vst [vmem:[#allocation3 + $0xb0] sm:$0xff] %v7269_v13  ;;  %v7277_v19 = vadd.f32 %v9050_v24, %v3150_v59  ;;  %vm9305_vm15 = vmpackc.low %vm9247_vm6, %vm7979_vm2  ;;  %v9324_v29 = vpack.c.bf16 %v3480_v55, %v3479_v35  ;;  %v3481_v47 = vld [vmem:[#allocation3 + $0x8f] sm:$0xff]  ;;  %v5079_v59 = vld [vmem:[#allocation3 + $0x58] sm:$0xff] }
 0x2b2   : > { %v3345_v10 = vsel %vm9247_vm6, %v7273_v37, 0.0  ;;  %vm9297_vm13 = vcmp.lt.s32.totalorder %v3255_v30, 12  ;;  %v9309_v34 = vpack.c.bf16 %v7273_v37, %v7265_v21  ;;  %v3422_v21 = vld [vmem:[#allocation3 + $0x76] sm:$0xff]  ;;  %v3425_v26 = vld [vmem:[#allocation3 + $0x8e] sm:$0xff] }
 0x2b3   : > { %3369 = vst [vmem:[#allocation3 + $0xc8] sm:$0xff] %v3345_v10  ;;  %v3343_v51 = vsel %vm9268_vm9, %v7277_v19, 0.0  ;;  %v9291_v57 = vpack.c.bf16 %v7277_v19, %v7269_v13  ;;  %vm9341_vm6 = vmpackc.low %vm9297_vm13, %vm7979_vm2  ;;  %v3482_v19 = vld [vmem:[#allocation3 + $0x97] sm:$0xff]  ;;  %v9352_v10 = vpack.c.bf16 %v3424_v25, %v3423_v3  ;;  %v9472_v3 = vld [vmem:[%s9889_s5 + $0x1f8] sm:$0xff]  }
 0x2b4   : > { %3367 = vst [vmem:[#allocation3 + $0xb8] sm:$0xff] %v3343_v51  ;;  %v9359_v51 = vpack.c.bf16 %v3482_v19, %v3481_v47  ;;  %v9364_v30 = vld [vmem:[%s9889_s5 + $0x1c8] sm:$0xff]   ;;  %v9486_v25 = vld [vmem:[%s9889_s5 + $0x1b8] sm:$0xff]  }
 0x2b5   : > { %v7048_v12 = vpop.f32.mrb[40].mxu0  ;;  %7920 = vmatprep.mubr.msk.bf16.mxu0 %vm9287_vm11, %v9291_v57  ;;  %v3426_v0 = vld [vmem:[#allocation3 + $0x96] sm:$0xff] }
 0x2b6   : > { %v7281_v14 = vadd.f32 %v9064_v41, %v7048_v12  ;;  %v3163_v24 = vpop.f32.mrb[41].mxu0  ;;  %7923 = vmatmul.mubr.msk.bf16.gmra.mrb[112].mxu0 %vm9305_vm15, %v9309_v34  ;;  %v3484_v12 = vld [vmem:[#allocation3 + $0xa7] sm:$0xff]  ;;  %v9386_v40 = vpack.c.bf16 %v3426_v0, %v3425_v26 }
 0x2b7   : > { %v7285_v5 = vadd.f32 %v9059_v60, %v3163_v24  ;;  %v7049_v6 = vpop.f32.mrb[42].mxu0  ;;  %3912 = vmatmul.mubr.bf16.gmra.mrb[116].mxu1 %v9279_v58  ;;  %v9400_v24 = vld [vmem:[%s9889_s5 + $0x1d8] sm:$0xff]  }
 0x2b8   : > { %3372 = vst [vmem:[#allocation3 + $0xe0] sm:$0xff] %v7281_v14  ;;  %v7289_v60 = vadd.f32 %v9066_v33, %v7049_v6  ;;  %v3166_v2 = vpop.f32.mrb[43].mxu0  ;;  %3919 = vmatprep.mubr.bf16.mxu1 %v9282_v28  ;;  %v9322_v33 = vpack.c.bf16 %v3422_v21, %v3421_v32  ;;  %v3427_v6 = vld [vmem:[#allocation3 + $0x9e] sm:$0xff]  ;;  %v3428_v41 = vld [vmem:[#allocation3 + $0xa6] sm:$0xff]  ;;  %v3485_v15 = vld [vmem:[#allocation3 + $0xaf] sm:$0xff] }
 0x2b9   : > { %3370 = vst [vmem:[#allocation3 + $0xd0] sm:$0xff] %v7285_v5  ;;  %v9317_v17 = vadd.f32 %v9062_v27, %v3166_v2  ;;  %v9450_v21 = vld [vmem:[%s9889_s5 + $0x1a8] sm:$0xff]   ;;  %v3429_v55 = vld [vmem:[#allocation3 + $0xae] sm:$0xff] }
 0x2ba   : > { %v3349_v48 = vsel %vm9297_vm13, %v7289_v60, 0.0  ;;  %v9345_v38 = vpack.c.bf16 %v7289_v60, %v7281_v14  ;;  %v9422_v60 = vpack.c.bf16 %v3428_v41, %v3427_v6  ;;  %v3488_v35 = vld [vmem:[#allocation3 + $0xc7] sm:$0xff] }
 0x2bb   : > { %3373 = vst [vmem:[#allocation3 + $0xe8] sm:$0xff] %v3349_v48  ;;  %v3347_v13 = vsel %vm3299_vm1, %v9317_v17, 0.0  ;;  %v9332_v27 = vpack.c.bf16 %v9317_v17, %v7285_v5  ;;  %v9414_v5 = vld [vmem:[%s9889_s5 + $0x198] sm:$0xff]   ;;  %v9436_v48 = vld [vmem:[%s9889_s5 + $0x1e8] sm:$0xff]  }
 0x2bc   : > { %3371 = vst [vmem:[#allocation3 + $0xd8] sm:$0xff] %v3347_v13  ;;  %v3430_v13 = vld [vmem:[#allocation3 + $0xb6] sm:$0xff]  ;;  %v3431_v19 = vld [vmem:[#allocation3 + $0xbe] sm:$0xff]  ;;  %v3432_v47 = vld [vmem:[#allocation3 + $0xc6] sm:$0xff] }
 0x2bd   : > { %7926 = vmatprep.mubr.msk.bf16.mxu0 %vm9327_vm4, %v9332_v27  ;;  %v9458_v23 = vpack.c.bf16 %v3430_v13, %v3429_v55 }
 0x2be   : > { %7929 = vmatmul.mubr.msk.bf16.gmra.mrb[116].mxu0 %vm9341_vm6, %v9345_v38 }
 0x2bf   : > { %3920 = vmatmul.mubr.bf16.gmra.mrb[120].mxu1 %v9322_v33  ;;  %7110 = vmatprep.mubr.bf16.mxu0 %v8829_v18 }
 0x2c0   : > { %3927 = vmatprep.mubr.bf16.mxu1 %v9324_v29  ;;  %v3489_v26 = vld [vmem:[#allocation3 + $0xcf] sm:$0xff] }
 0x2c3   : > { %v3490_v0 = vld [vmem:[#allocation3 + $0xd7] sm:$0xff] }
 0x2c4   : > { %v9497_v41 = vpack.c.bf16 %v3490_v0, %v3489_v26  ;;  %v3435_v54 = vld [vmem:[#allocation3 + $0xde] sm:$0xff]  ;;  %v5094_v26 = vld [vmem:[#allocation3 + $0xd0] sm:$0xff] }
 0x2c6   : > { %7932 = vmatmul.mubr.msk.bf16.vlgmr.msra.gmra.mrb[92].mxu0 %vm9084_vm8, %v9088_v31  ;;  %v3483_v31 = vld [vmem:[#allocation3 + $0x9f] sm:$0xff] }
 0x2c7   : > { %3928 = vmatmul.mubr.bf16.gmra.mrb[124].mxu1 %v9352_v10  ;;  %7935 = vmatprep.mubr.msk.bf16.mxu0 %vm9103_vm10, %v9107_v56  ;;  %v9392_v56 = vld [vmem:[%s9889_s5 + $0x190] sm:$0xff]   ;;  %v9394_v14 = vpack.c.bf16 %v3484_v12, %v3483_v31  ;;  %v9494_v12 = vpack.c.bf16 %v3432_v47, %v3431_v19  ;;  %v3433_v19 = vld [vmem:[#allocation3 + $0xce] sm:$0xff] }
 0x2c8   : > { %3935 = vmatprep.mubr.bf16.mxu1 %v9359_v51  ;;  %6773 = vmatpush3.bf16.msra.mxu0 %v9357_v63 }
 0x2c9   : > { %6774 = vmatprep.subr.bf16.mxu0 %v9364_v30 }
 0x2cc   : > { %6775 = vmatpush3.bf16.msra.mxu0 %v9378_v45 }
 0x2cd   : > { %6776 = vmatprep.subr.bf16.mxu0 %v9384_v49 }
 0x2ce   : > { %7938 = vmatmul.mubr.msk.bf16.gmra.mrb[96].mxu0 %vm9135_vm12, %v9139_v22  ;;  %v3486_v22 = vld [vmem:[#allocation3 + $0xb7] sm:$0xff] }
 0x2cf   : > { %3936 = vmatmul.mubr.bf16.gmra.mrb[128].mxu1 %v9386_v40  ;;  %7941 = vmatprep.mubr.msk.bf16.mxu0 %vm9155_vm14, %v9159_v50  ;;  %v9428_v50 = vld [vmem:[%s9889_s5 + $0x1a0] sm:$0xff]   ;;  %v9430_v2 = vpack.c.bf16 %v3486_v22, %v3485_v15 }
 0x2d0   : > { %3943 = vmatprep.mubr.bf16.mxu1 %v9394_v14  ;;  %6777 = vmatpush3.bf16.msra.mxu0 %v9392_v56  ;;  %v3434_v15 = vld [vmem:[#allocation3 + $0xd6] sm:$0xff] }
 0x2d1   : > { %6778 = vmatprep.subr.bf16.mxu0 %v9400_v24  ;;  %v9511_v0 = vpack.c.bf16 %v3434_v15, %v3433_v19  ;;  %v5097_v15 = vld [vmem:[#allocation3 + $0xe8] sm:$0xff] }
 0x2d4   : > { %6779 = vmatpush3.bf16.msra.mxu0 %v9414_v5 }
 0x2d5   : > { %6780 = vmatprep.subr.bf16.mxu0 %v9420_v9 }
 0x2d6   : > { %7944 = vmatmul.mubr.msk.bf16.gmra.mrb[100].mxu0 %vm9185_vm0, %v9189_v52  ;;  %v3487_v52 = vld [vmem:[#allocation3 + $0xbf] sm:$0xff] }
 0x2d7   : > { %3944 = vmatmul.mubr.bf16.gmra.mrb[132].mxu1 %v9422_v60  ;;  %7947 = vmatprep.mubr.msk.bf16.mxu0 %vm9205_vm3, %v9209_v20  ;;  %v9464_v20 = vld [vmem:[%s9889_s5 + $0x1b0] sm:$0xff]   ;;  %v9466_v32 = vpack.c.bf16 %v3488_v35, %v3487_v52 }
 0x2d8   : > { %3951 = vmatprep.mubr.bf16.mxu1 %v9430_v2  ;;  %6781 = vmatpush3.bf16.msra.mxu0 %v9428_v50  ;;  %v3491_v52 = vld [vmem:[#allocation3 + $0xdf] sm:$0xff]  ;;  %v3492_v35 = vld [vmem:[#allocation3 + $0xe7] sm:$0xff] }
 0x2d9   : > { %6782 = vmatprep.subr.bf16.mxu0 %v9436_v48  ;;  %v9513_v53 = vpack.c.bf16 %v3492_v35, %v3491_v52  ;;  %v4212_v35 = vld [vmem:[#allocation3 + $0xf6] sm:$0xff] }
 0x2dc   : > { %6783 = vmatpush3.bf16.msra.mxu0 %v9450_v21 }
 0x2dd   : > { %6784 = vmatprep.subr.bf16.mxu0 %v9456_v43 }
 0x2de   : > { %7950 = vmatmul.mubr.msk.bf16.gmra.mrb[104].mxu0 %vm9235_vm5, %v9239_v4 }
 0x2df   : > { %3952 = vmatmul.mubr.bf16.gmra.mrb[136].mxu1 %v9458_v23  ;;  %7953 = vmatprep.mubr.msk.bf16.mxu0 %vm9256_vm7, %v9260_v16  ;;  %v6544_v4 = vpop.f32.mrb[96].mxu1 }
 0x2e0   : > { %3959 = vmatprep.mubr.bf16.mxu1 %v9466_v32  ;;  %6785 = vmatpush3.bf16.msra.mxu0 %v9464_v20  ;;  %v6545_v31 = vpop.f32.mrb[97].mxu1 }
 0x2e1   : > { %6786 = vmatprep.subr.bf16.mxu0 %v9472_v3  ;;  %v9492_v36 = vadd.f32 %v6545_v31, %v6544_v4  ;;  %v6547_v16 = vpop.f32.mrb[98].mxu1 }
 0x2e2   : > { %v6548_v6 = vpop.f32.mrb[99].mxu1 }
 0x2e3   : > { %v9499_v22 = vadd.f32 %v6548_v6, %v6547_v16  ;;  %v5092_v6 = vld [vmem:[#allocation3 + $0xc0] sm:$0xff] }
 0x2e4   : > { %6787 = vmatpush3.bf16.msra.mxu0 %v9486_v25 }
 0x2e5   : > { %7138 = vmatprep.subr.bf16.mxu0 %v7845_v46 }
 0x2e6   : > { %7956 = vmatmul.mubr.msk.bf16.gmra.mrb[108].mxu0 %vm9287_vm11, %v9291_v57 }
 0x2e7   : > { %3960 = vmatmul.mubr.bf16.gmra.mrb[140].mxu1 %v9494_v12  ;;  %7959 = vmatprep.mubr.msk.bf16.mxu0 %vm9305_vm15, %v9309_v34  ;;  %v3436_v34 = vld [vmem:[#allocation3 + $0xe6] sm:$0xff] }
 0x2e8   : > { %3967 = vmatprep.mubr.bf16.mxu1 %v9497_v41  ;;  %v6550_v13 = vpop.f32.mrb[100].mxu1  ;;  %v9525_v16 = vpack.c.bf16 %v3436_v34, %v3435_v54  ;;  %v5031_v54 = vld [vmem:[#allocation3 + $0x97] sm:$0xff] }
 0x2e9   : > { %v6551_v55 = vpop.f32.mrb[101].mxu1 }
 0x2ea   : > { %v9509_v47 = vadd.f32 %v6551_v55, %v6550_v13  ;;  %v6553_v4 = vpop.f32.mrb[102].mxu1  ;;  %v7854_v13 = vld [vmem:[#allocation2] sm:$0xff]  ;;  %v5029_v55 = vld [vmem:[#allocation3 + $0x87] sm:$0xff] }
 0x2eb   : > { %v6554_v31 = vpop.f32.mrb[103].mxu1  ;;  %v5114_v52 = vpack.c.bf16 %v7854_v13, %v7854_v13 }
 0x2ec   : > { %v9515_v57 = vadd.f32 %v6554_v31, %v6553_v4  ;;  %v4972_v4 = vld [vmem:[#allocation3 + $0x7e] sm:$0xff]  ;;  %v4973_v31 = vld [vmem:[#allocation3 + $0x86] sm:$0xff] }
 0x2ed   : > { %v4995_v34 = vpack.c.bf16 %v4973_v31, %v4972_v4 }
 0x2ee   : > { %7962 = vmatmul.mubr.msk.bf16.gmra.mrb[112].mxu0 %vm9327_vm4, %v9332_v27  ;;  %v7846_v27 = vld [vmem:[%s9889_s5 + $0x208] sm:$0xff]  }
 0x2ef   : > { %3968 = vmatmul.mubr.bf16.gmra.mrb[144].mxu1 %v9511_v0  ;;  %7965 = vmatprep.mubr.msk.bf16.mxu0 %vm9341_vm6, %v9345_v38  ;;  %v5076_v38 = vld [vmem:[#allocation3 + $0x40] sm:$0xff] }
 0x2f0   : > { %3975 = vmatprep.mubr.bf16.mxu1 %v9513_v53 }
 0x2f6   : > { %7135 = vmatmul.mubr.bf16.gmra.mrb[116].mxu0 %v8829_v18  ;;  %v7847_v18 = vld [vmem:[%s9889_s5 + $0x210] sm:$0xff]  }
 0x2f7   : > { %3976 = vmatmul.mubr.bf16.gmra.mrb[148].mxu1 %v9525_v16  ;;  %5425 = vmatprep.mubr.bf16.mxu0 %v9124_v1 }
 0x2f8   : > { %4648 = vmatprep.mubr.bf16.mxu1 %v8851_v61  ;;  %v7848_v61 = vld [vmem:[%s9889_s5 + $0x218] sm:$0xff]  }
 0x2fe   : > { %5426 = vmatmul.mubr.bf16.vlgmr.msra.gmra.mrb[120].mxu0 %v9126_v11 }
 0x2ff   : > { %4649 = vmatmul.mubr.bf16.vlgmr.msra.gmra.mrb[152].mxu1 %v8854_v7  ;;  %5433 = vmatprep.mubr.bf16.mxu0 %v9130_v44  ;;  %v7849_v7 = vld [vmem:[%s9889_s5 + $0x220] sm:$0xff]  }
 0x300   : > { %7190 = vmatpush3.bf16.msra.mxu1 %v9357_v63  ;;  %4656 = vmatprep.mubr.bf16.mxu1 %v9124_v1  ;;  %v7850_v1 = vld [vmem:[%s9889_s5 + $0x228] sm:$0xff]  }
 0x301   : > { %7183 = vmatprep.subr.bf16.mxu1 %v9364_v30  ;;  %7139 = vmatpush3.bf16.msra.mxu0 %v7845_v46  ;;  %v5078_v30 = vld [vmem:[#allocation3 + $0x50] sm:$0xff] }
 0x302   : > { %7140 = vmatprep.subr.bf16.mxu0 %v7846_v27 }
 0x304   : > { %7191 = vmatpush3.bf16.msra.mxu1 %v9378_v45  ;;  %v5104_v45 = vpack.c.bf16 %v5079_v59, %v5078_v30 }
 0x305   : > { %7184 = vmatprep.subr.bf16.mxu1 %v9384_v49  ;;  %7141 = vmatpush3.bf16.msra.mxu0 %v7846_v27  ;;  %v5081_v49 = vld [vmem:[#allocation3 + $0x68] sm:$0xff] }
 0x306   : > { %5434 = vmatmul.mubr.bf16.gmra.mrb[124].mxu0 %v9177_v42  ;;  %7142 = vmatprep.subr.bf16.mxu0 %v7847_v18  ;;  %v5030_v27 = vld [vmem:[#allocation3 + $0x8f] sm:$0xff] }
 0x307   : > { %4657 = vmatmul.mubr.bf16.gmra.mrb[156].mxu1 %v9126_v11  ;;  %5441 = vmatprep.mubr.bf16.mxu0 %v9180_v8  ;;  %v7851_v11 = vld [vmem:[%s9889_s5 + $0x230] sm:$0xff]  }
 0x308   : > { %4664 = vmatprep.mubr.bf16.mxu1 %v9130_v44  ;;  %7192 = vmatpush3.bf16.msra.mxu1 %v9392_v56  ;;  %v7852_v44 = vld [vmem:[%s9889_s5 + $0x238] sm:$0xff]   ;;  %v5083_v56 = vld [vmem:[#allocation3 + $0x78] sm:$0xff] }
 0x309   : > { %7143 = vmatpush3.bf16.msra.mxu0 %v7847_v18  ;;  %7185 = vmatprep.subr.bf16.mxu1 %v9400_v24  ;;  %v5052_v18 = vpack.c.bf16 %v5031_v54, %v5030_v27 }
 0x30a   : > { %7144 = vmatprep.subr.bf16.mxu0 %v7848_v61 }
 0x30c   : > { %7193 = vmatpush3.bf16.msra.mxu1 %v9414_v5  ;;  %v5082_v5 = vld [vmem:[#allocation3 + $0x70] sm:$0xff] }
 0x30d   : > { %7145 = vmatpush3.bf16.msra.mxu0 %v7848_v61  ;;  %7186 = vmatprep.subr.bf16.mxu1 %v9420_v9  ;;  %v5106_v9 = vpack.c.bf16 %v5083_v56, %v5082_v5 }
 0x30e   : > { %5442 = vmatmul.mubr.bf16.gmra.mrb[128].mxu0 %v9227_v62  ;;  %7146 = vmatprep.subr.bf16.mxu0 %v7849_v7 }
 0x30f   : > { %4665 = vmatmul.mubr.bf16.gmra.mrb[160].mxu1 %v9177_v42  ;;  %5449 = vmatprep.mubr.bf16.mxu0 %v9230_v39  ;;  %v5075_v42 = vld [vmem:[#allocation3 + $0x38] sm:$0xff] }
 0x310   : > { %4672 = vmatprep.mubr.bf16.mxu1 %v9180_v8  ;;  %7194 = vmatpush3.bf16.msra.mxu1 %v9428_v50  ;;  %v5074_v8 = vld [vmem:[#allocation3 + $0x30] sm:$0xff]  ;;  %v5087_v50 = vld [vmem:[#allocation3 + $0x98] sm:$0xff] }
 0x311   : > { %7147 = vmatpush3.bf16.msra.mxu0 %v7849_v7  ;;  %7187 = vmatprep.subr.bf16.mxu1 %v9436_v48  ;;  %v5084_v48 = vld [vmem:[#allocation3 + $0x80] sm:$0xff]  ;;  %v4975_v7 = vld [vmem:[#allocation3 + $0x96] sm:$0xff] }
 0x312   : > { %7148 = vmatprep.subr.bf16.mxu0 %v7850_v1 }
 0x314   : > { %7195 = vmatpush3.bf16.msra.mxu1 %v9450_v21  ;;  %v5086_v21 = vld [vmem:[#allocation3 + $0x90] sm:$0xff] }
 0x315   : > { %7149 = vmatpush3.bf16.msra.mxu0 %v7850_v1  ;;  %7188 = vmatprep.subr.bf16.mxu1 %v9456_v43  ;;  %v5108_v43 = vpack.c.bf16 %v5087_v50, %v5086_v21  ;;  %v5034_v50 = vld [vmem:[#allocation3 + $0xaf] sm:$0xff] }
 0x316   : > { %5450 = vmatmul.mubr.bf16.gmra.mrb[132].mxu0 %v9279_v58  ;;  %7150 = vmatprep.subr.bf16.mxu0 %v7851_v11 }
 0x317   : > { %4673 = vmatmul.mubr.bf16.gmra.mrb[164].mxu1 %v9227_v62  ;;  %5457 = vmatprep.mubr.bf16.mxu0 %v9282_v28  ;;  %v5102_v62 = vpack.c.bf16 %v5075_v42, %v5074_v8 }
 0x318   : > { %4680 = vmatprep.mubr.bf16.mxu1 %v9230_v39  ;;  %7196 = vmatpush3.bf16.msra.mxu1 %v9464_v20  ;;  %v5077_v39 = vld [vmem:[#allocation3 + $0x48] sm:$0xff]  ;;  %v5091_v20 = vld [vmem:[#allocation3 + $0xb8] sm:$0xff] }
 0x319   : > { %7151 = vmatpush3.bf16.msra.mxu0 %v7851_v11  ;;  %7189 = vmatprep.subr.bf16.mxu1 %v9472_v3  ;;  %v5103_v63 = vpack.c.bf16 %v5077_v39, %v5076_v38  ;;  %v5088_v3 = vld [vmem:[#allocation3 + $0xa0] sm:$0xff] }
 0x31a   : > { %7152 = vmatprep.subr.bf16.mxu0 %v7852_v44  ;;  %v5032_v11 = vld [vmem:[#allocation3 + $0x9f] sm:$0xff] }
 0x31c   : > { %7197 = vmatpush3.bf16.msra.mxu1 %v9486_v25  ;;  %v5090_v25 = vld [vmem:[#allocation3 + $0xb0] sm:$0xff] }
 0x31d   : > { %7153 = vmatpush3.bf16.msra.mxu0 %v7852_v44  ;;  %v5110_v46 = vpack.c.bf16 %v5091_v20, %v5090_v25  ;;  %v5033_v44 = vld [vmem:[#allocation3 + $0xa7] sm:$0xff]  ;;  %v5036_v20 = vld [vmem:[#allocation3 + $0xbf] sm:$0xff] }
 0x31e   : > { %5458 = vmatmul.mubr.bf16.gmra.mrb[136].mxu0 %v9322_v33 }
 0x31f   : > { %4681 = vmatmul.mubr.bf16.gmra.mrb[168].mxu1 %v9279_v58  ;;  %7154 = vmatprep.mubr.bf16.mxu0 %v5102_v62  ;;  %v5080_v58 = vld [vmem:[#allocation3 + $0x60] sm:$0xff]  ;;  %v4974_v62 = vld [vmem:[#allocation3 + $0x8e] sm:$0xff] }
 0x320   : > { %4688 = vmatprep.mubr.bf16.mxu1 %v9282_v28  ;;  %v5105_v24 = vpack.c.bf16 %v5081_v49, %v5080_v58  ;;  %v5085_v28 = vld [vmem:[#allocation3 + $0x88] sm:$0xff]  ;;  %v4996_v59 = vpack.c.bf16 %v4975_v7, %v4974_v62  ;;  %v5035_v58 = vld [vmem:[#allocation3 + $0xb7] sm:$0xff] }
 0x321   : > { %v4977_v49 = vld [vmem:[#allocation3 + $0xa6] sm:$0xff] }
 0x322   : > { %v5045_v62 = vld [vmem:[#allocation3 + $0x107] sm:$0xff] }
 0x326   : > { %7155 = vmatmul.mubr.bf16.vlgmr.msra.gmra.mrb[92].mxu0 %v5103_v63  ;;  %v5053_v63 = vpack.c.bf16 %v5033_v44, %v5032_v11 }
 0x327   : > { %4689 = vmatmul.mubr.bf16.gmra.mrb[172].mxu1 %v9322_v33  ;;  %7158 = vmatprep.mubr.bf16.mxu0 %v5104_v45  ;;  %v5107_v33 = vpack.c.bf16 %v5085_v28, %v5084_v48  ;;  %v4976_v45 = vld [vmem:[#allocation3 + $0x9e] sm:$0xff] }
 0x328   : > { %4696 = vmatprep.mubr.bf16.mxu1 %v9324_v29  ;;  %v5089_v29 = vld [vmem:[#allocation3 + $0xa8] sm:$0xff]  ;;  %v4997_v28 = vpack.c.bf16 %v4977_v49, %v4976_v45  ;;  %v4988_v49 = vld [vmem:[#allocation3 + $0xfe] sm:$0xff] }
 0x32e   : > { %7159 = vmatmul.mubr.bf16.gmra.mrb[96].mxu0 %v5105_v24 }
 0x32f   : > { %4697 = vmatmul.mubr.bf16.gmra.mrb[176].mxu1 %v9352_v10  ;;  %7162 = vmatprep.mubr.bf16.mxu0 %v5106_v9  ;;  %v5109_v10 = vpack.c.bf16 %v5089_v29, %v5088_v3  ;;  %v5037_v3 = vld [vmem:[#allocation3 + $0xc7] sm:$0xff] }
 0x330   : > { %4704 = vmatprep.mubr.bf16.mxu1 %v9359_v51  ;;  %v5093_v51 = vld [vmem:[#allocation3 + $0xc8] sm:$0xff] }
 0x336   : > { %7163 = vmatmul.mubr.bf16.gmra.mrb[100].mxu0 %v5107_v33  ;;  %v5054_v33 = vpack.c.bf16 %v5035_v58, %v5034_v50 }
 0x337   : > { %4705 = vmatmul.mubr.bf16.gmra.mrb[180].mxu1 %v9386_v40  ;;  %7166 = vmatprep.mubr.bf16.mxu0 %v5108_v43  ;;  %v5111_v40 = vpack.c.bf16 %v5093_v51, %v5092_v6  ;;  %v4979_v43 = vld [vmem:[#allocation3 + $0xb6] sm:$0xff] }
 0x338   : > { %4712 = vmatprep.mubr.bf16.mxu1 %v9394_v14  ;;  %v7967_v14 = vpack.c.bf16 %v9317_v17, %v5094_v26  ;;  %v4267_v17 = vld [vmem:[#allocation3 + $0xef] sm:$0xff] }
 0x33e   : > { %7167 = vmatmul.mubr.bf16.gmra.mrb[104].mxu0 %v5109_v10 }
 0x33f   : > { %4713 = vmatmul.mubr.bf16.gmra.mrb[184].mxu1 %v9422_v60  ;;  %7170 = vmatprep.mubr.bf16.mxu0 %v5110_v46  ;;  %v5096_v60 = vld [vmem:[#allocation3 + $0xe0] sm:$0xff]  ;;  %v4978_v46 = vld [vmem:[#allocation3 + $0xae] sm:$0xff] }
 0x340   : > { %4720 = vmatprep.mubr.bf16.mxu1 %v9430_v2  ;;  %v5113_v2 = vpack.c.bf16 %v5097_v15, %v5096_v60  ;;  %v4998_v26 = vpack.c.bf16 %v4979_v43, %v4978_v46  ;;  %v4980_v15 = vld [vmem:[#allocation3 + $0xbe] sm:$0xff]  ;;  %v4981_v60 = vld [vmem:[#allocation3 + $0xc6] sm:$0xff] }
 0x346   : > { %7171 = vmatmul.mubr.bf16.gmra.mrb[108].mxu0 %v5111_v40  ;;  %v5055_v40 = vpack.c.bf16 %v5037_v3, %v5036_v20 }
 0x347   : > { %4721 = vmatmul.mubr.bf16.gmra.mrb[188].mxu1 %v9458_v23  ;;  %7968 = vmatprep.mubr.msk.bf16.mxu0 %vm9327_vm4, %v7967_v14  ;;  %v4268_v23 = vld [vmem:[#allocation3 + $0xf7] sm:$0xff] }
 0x348   : > { %4728 = vmatprep.mubr.bf16.mxu1 %v9466_v32  ;;  %v9603_v37 = vpack.c.bf16 %v4268_v23, %v4267_v17  ;;  %v4211_v32 = vld [vmem:[#allocation3 + $0xee] sm:$0xff] }
 0x349   : > { %v9607_v19 = vpack.c.bf16 %v4212_v35, %v4211_v32  ;;  %v4999_v32 = vpack.c.bf16 %v4981_v60, %v4980_v15  ;;  %v5038_v35 = vld [vmem:[#allocation3 + $0xcf] sm:$0xff] }
 0x34e   : > { %7175 = vmatmul.mubr.bf16.gmra.mrb[112].mxu0 %v5113_v2 }
 0x34f   : > { %4729 = vmatmul.mubr.bf16.gmra.mrb[192].mxu1 %v9494_v12  ;;  %7178 = vmatprep.mubr.bf16.mxu0 %v5114_v52  ;;  %v5028_v12 = vld [vmem:[#allocation3 + $0x7f] sm:$0xff] }
 0x350   : > { %4736 = vmatprep.mubr.bf16.mxu1 %v9497_v41  ;;  %v5051_v41 = vpack.c.bf16 %v5029_v55, %v5028_v12 }
 0x356   : > { %7179 = vmatmul.mubr.bf16.gmra.mrb[116].mxu0 %v5114_v52  ;;  %v5039_v52 = vld [vmem:[#allocation3 + $0xd7] sm:$0xff] }
 0x357   : > { %4737 = vmatmul.mubr.bf16.gmra.mrb[196].mxu1 %v9511_v0  ;;  %v5056_v55 = vpack.c.bf16 %v5039_v52, %v5038_v35 }
 0x358   : > { %4744 = vmatprep.mubr.bf16.mxu1 %v9513_v53 }
 0x35f   : > { %4745 = vmatmul.mubr.bf16.gmra.mrb[200].mxu1 %v9525_v16 }
 0x360   : > { %4752 = vmatprep.mubr.bf16.mxu1 %v9603_v37 }
 0x367   : > { %4753 = vmatmul.mubr.bf16.gmra.mrb[204].mxu1 %v9607_v19 }
 0x368   : > { %5465 = vmatprep.mubr.bf16.mxu1 %v5051_v41 }
 0x36f   : > { %5466 = vmatmul.mubr.bf16.vlgmr.msra.gmra.mrb[208].mxu1 %v4995_v34 }
 0x370   : > { %5473 = vmatprep.mubr.bf16.mxu1 %v5052_v18 }
 0x372   : > { %v6556_v61 = vpop.f32.mrb[104].mxu1 }
 0x373   : > { %v6557_v1 = vpop.f32.mrb[105].mxu1 }
 0x374   : > { %v9610_v42 = vadd.f32 %v6557_v1, %v6556_v61  ;;  %v6559_v8 = vpop.f32.mrb[106].mxu1 }
 0x375   : > { %v6560_v39 = vpop.f32.mrb[107].mxu1 }
 0x376   : > { %v9612_v38 = vadd.f32 %v6560_v39, %v6559_v8  ;;  %v5044_v8 = vld [vmem:[#allocation3 + $0xff] sm:$0xff] }
 0x377   : > { %5474 = vmatmul.mubr.bf16.gmra.mrb[212].mxu1 %v4996_v59 }
 0x378   : > { %5481 = vmatprep.mubr.bf16.mxu1 %v5053_v63 }
 0x37a   : > { %v6562_v30 = vpop.f32.mrb[108].mxu1 }
 0x37b   : > { %v6563_v56 = vpop.f32.mrb[109].mxu1 }
 0x37c   : > { %v9614_v24 = vadd.f32 %v6563_v56, %v6562_v30  ;;  %v6565_v5 = vpop.f32.mrb[110].mxu1  ;;  %v4989_v56 = vld [vmem:[#allocation3 + $0x106] sm:$0xff] }
 0x37d   : > { %v6566_v9 = vpop.f32.mrb[111].mxu1 }
 0x37e   : > { %v9616_v48 = vadd.f32 %v6566_v9, %v6565_v5  ;;  %v5003_v5 = vpack.c.bf16 %v4989_v56, %v4988_v49 }
 0x37f   : > { %5482 = vmatmul.mubr.bf16.gmra.mrb[216].mxu1 %v4997_v28 }
 0x380   : > { %5489 = vmatprep.mubr.bf16.mxu1 %v5054_v33 }
 0x382   : > { %v6568_v21 = vpop.f32.mrb[112].mxu1 }
 0x383   : > { %v6569_v29 = vpop.f32.mrb[113].mxu1 }
 0x384   : > { %v9618_v10 = vadd.f32 %v6569_v29, %v6568_v21  ;;  %v6571_v25 = vpop.f32.mrb[114].mxu1 }
 0x385   : > { %v6572_v51 = vpop.f32.mrb[115].mxu1 }
 0x386   : > { %v9620_v6 = vadd.f32 %v6572_v51, %v6571_v25 }
 0x387   : > { %5490 = vmatmul.mubr.bf16.gmra.mrb[220].mxu1 %v4998_v26 }
 0x388   : > { %5497 = vmatprep.mubr.bf16.mxu1 %v5055_v40 }
 0x38a   : > { %v6574_v14 = vpop.f32.mrb[116].mxu1 }
 0x38b   : > { %v6575_v13 = vpop.f32.mrb[117].mxu1 }
 0x38c   : > { %v9622_v2 = vadd.f32 %v6575_v13, %v6574_v14  ;;  %v6577_v17 = vpop.f32.mrb[118].mxu1 }
 0x38d   : > { %v6578_v23 = vpop.f32.mrb[119].mxu1 }
 0x38e   : > { %v9624_v12 = vadd.f32 %v6578_v23, %v6577_v17 }
 0x38f   : > { %5498 = vmatmul.mubr.bf16.gmra.mrb[224].mxu1 %v4999_v32 }
 0x390   : > { %5505 = vmatprep.mubr.bf16.mxu1 %v5056_v55 }
 0x392   : > { %v6580_v41 = vpop.f32.mrb[120].mxu1 }
 0x393   : > { %v6581_v4 = vpop.f32.mrb[121].mxu1 }
 0x394   : > { %v9626_v31 = vadd.f32 %v6581_v4, %v6580_v41  ;;  %v6583_v54 = vpop.f32.mrb[122].mxu1 }
 0x395   : > { %v6584_v34 = vpop.f32.mrb[123].mxu1 }
 0x396   : > { %v9628_v27 = vadd.f32 %v6584_v34, %v6583_v54  ;;  %v9666_v54 = vld [vmem:[%s9892_s8] ss:$0 sm:$0xff] }
 0x397   : > { %5506 = vmatmul.mubr.bf16.gmra.mrb[228].mxu1 %v9511_v0 }
 0x398   : > { %5513 = vmatprep.mubr.bf16.mxu1 %v9513_v53  ;;  %v5059_v53 = vpack.c.bf16 %v5045_v62, %v5044_v8 }
 0x39a   : > { %v6586_v18 = vpop.f32.mrb[124].mxu1 }
 0x39b   : > { %v6587_v61 = vpop.f32.mrb[125].mxu1 }
 0x39c   : > { %v9632_v7 = vadd.f32 %v6587_v61, %v6586_v18  ;;  %v6589_v1 = vpop.f32.mrb[126].mxu1 }
 0x39d   : > { %v6590_v11 = vpop.f32.mrb[127].mxu1 }
 0x39e   : > { %v9634_v44 = vadd.f32 %v6590_v11, %v6589_v1  ;;  %v7304_v11 = vadd.f32 %v9492_v36, %v9666_v54 }
 0x39f   : > { %5514 = vmatmul.mubr.bf16.gmra.mrb[232].mxu1 %v9525_v16 }
 0x3a0   : > { %5521 = vmatprep.mubr.bf16.mxu1 %v9603_v37 }
 0x3a2   : > { %v6592_v39 = vpop.f32.mrb[128].mxu1 }
 0x3a3   : > { %v6593_v59 = vpop.f32.mrb[129].mxu1 }
 0x3a4   : > { %v9638_v63 = vadd.f32 %v6593_v59, %v6592_v39  ;;  %v6595_v0 = vpop.f32.mrb[130].mxu1 }
 0x3a5   : > { %v6596_v30 = vpop.f32.mrb[131].mxu1 }
 0x3a6   : > { %v9640_v45 = vadd.f32 %v6596_v30, %v6595_v0  ;;  %v7324_v30 = vadd.f32 %v9499_v22, %v9666_v54 }
 0x3a7   : > { %5522 = vmatmul.mubr.bf16.gmra.mrb[236].mxu1 %v9607_v19 }
 0x3a8   : > { %5529 = vmatprep.mubr.bf16.mxu1 %v5059_v53 }
 0x3aa   : > { %v6598_v58 = vpop.f32.mrb[132].mxu1 }
 0x3ab   : > { %v6599_v16 = vpop.f32.mrb[133].mxu1 }
 0x3ac   : > { %v9643_v37 = vadd.f32 %v6599_v16, %v6598_v58  ;;  %v6601_v9 = vpop.f32.mrb[134].mxu1 }
 0x3ad   : > { %v6602_v28 = vpop.f32.mrb[135].mxu1 }
 0x3ae   : > { %v9645_v50 = vadd.f32 %v6602_v28, %v6601_v9 }
 0x3af   : > { %5530 = vmatmul.mubr.bf16.gmra.mrb[240].mxu1 %v5003_v5 }
 0x3b2   : > { %v6604_v33 = vpop.f32.mrb[136].mxu1 }
 0x3b3   : > { %v6605_v21 = vpop.f32.mrb[137].mxu1 }
 0x3b4   : > { %v9647_v43 = vadd.f32 %v6605_v21, %v6604_v33  ;;  %v6607_v29 = vpop.f32.mrb[138].mxu1 }
 0x3b5   : > { %v6608_v20 = vpop.f32.mrb[139].mxu1 }
 0x3b6   : > { %v9649_v19 = vadd.f32 %v6608_v20, %v6607_v29  ;;  %v7294_v29 = vadd.f32 %v9509_v47, %v9666_v54 }
 0x3ba   : > { %v6610_v3 = vpop.f32.mrb[140].mxu1 }
 0x3bb   : > { %v6611_v25 = vpop.f32.mrb[141].mxu1 }
 0x3bc   : > { %v9651_v46 = vadd.f32 %v6611_v25, %v6610_v3  ;;  %v6613_v51 = vpop.f32.mrb[142].mxu1 }
 0x3bd   : > { %v6614_v26 = vpop.f32.mrb[143].mxu1 }
 0x3be   : > { %v9653_v40 = vadd.f32 %v6614_v26, %v6613_v51 }
 0x3c2   : > { %v6616_v14 = vpop.f32.mrb[144].mxu1 }
 0x3c3   : > { %v6617_v15 = vpop.f32.mrb[145].mxu1 }
 0x3c4   : > { %v9655_v60 = vadd.f32 %v6617_v15, %v6616_v14  ;;  %v6619_v13 = vpop.f32.mrb[146].mxu1  ;;  %v7314_v14 = vadd.f32 %v9515_v57, %v9666_v54 }
 0x3c5   : > { %v6620_v52 = vpop.f32.mrb[147].mxu1 }
 0x3c6   : > { %v9657_v17 = vadd.f32 %v6620_v52, %v6619_v13 }
 0x3ca   : > { %v6622_v23 = vpop.f32.mrb[148].mxu1 }
 0x3cb   : > { %v6623_v32 = vpop.f32.mrb[149].mxu1 }
 0x3cc   : > { %v9659_v35 = vadd.f32 %v6623_v32, %v6622_v23  ;;  %v6625_v55 = vpop.f32.mrb[150].mxu1 }
 0x3cd   : > { %v6626_v41 = vpop.f32.mrb[151].mxu1 }
 0x3ce   : > { %v9661_v4 = vadd.f32 %v6626_v41, %v6625_v55 }
 0x3d1   : > { %v6788_v18 = vpop.f32.mrb[120].mxu0 }
 0x3d2   : > { %v6666_v34 = vpop.f32.mrb[152].mxu1  ;;  %v6789_v1 = vpop.f32.mrb[121].mxu0 }
 0x3d3   : > { %v6667_v61 = vpop.f32.mrb[153].mxu1  ;;  %v6790_v39 = vadd.f32 %v6789_v1, %v6788_v18  ;;  %v6791_v59 = vpop.f32.mrb[122].mxu0 }
 0x3d4   : > { %v6668_v8 = vadd.f32 %v6667_v61, %v6666_v34  ;;  %v6669_v62 = vpop.f32.mrb[154].mxu1  ;;  %v6792_v53 = vpop.f32.mrb[123].mxu0  ;;  %v7344_v61 = vadd.f32 %v9610_v42, %v9666_v54 }
 0x3d5   : > { %v6670_v0 = vpop.f32.mrb[155].mxu1  ;;  %v6793_v58 = vadd.f32 %v6792_v53, %v6791_v59  ;;  %v7364_v59 = vadd.f32 %v9612_v38, %v9666_v54 }
 0x3d6   : > { %v7307_v49 = vadd.f32 %v7304_v11, %v6668_v8  ;;  %v6671_v56 = vadd.f32 %v6670_v0, %v6669_v62 }
 0x3d8   : > { %v7327_v16 = vadd.f32 %v7324_v30, %v6671_v56  ;;  %v9672_v5 = vadd.f32 %v7307_v49, %v6790_v39 }
 0x3d9   : > { %v6794_v33 = vpop.f32.mrb[124].mxu0 }
 0x3da   : > { %v6672_v9 = vpop.f32.mrb[156].mxu1  ;;  %v9674_v28 = vadd.f32 %v7327_v16, %v6793_v58  ;;  %v6795_v21 = vpop.f32.mrb[125].mxu0 }
 0x3db   : > { %v6673_v36 = vpop.f32.mrb[157].mxu1  ;;  %v6796_v25 = vadd.f32 %v6795_v21, %v6794_v33  ;;  %v6797_v51 = vpop.f32.mrb[126].mxu0 }
 0x3dc   : > { %v6674_v20 = vadd.f32 %v6673_v36, %v6672_v9  ;;  %v6675_v3 = vpop.f32.mrb[158].mxu1  ;;  %v6798_v26 = vpop.f32.mrb[127].mxu0  ;;  %v7334_v36 = vadd.f32 %v9614_v24, %v9666_v54 }
 0x3dd   : > { %v6676_v22 = vpop.f32.mrb[159].mxu1  ;;  %v6799_v52 = vadd.f32 %v6798_v26, %v6797_v51  ;;  %v7354_v51 = vadd.f32 %v9616_v48, %v9666_v54 }
 0x3de   : > { %v7297_v15 = vadd.f32 %v7294_v29, %v6674_v20  ;;  %v6677_v13 = vadd.f32 %v6676_v22, %v6675_v3 }
 0x3e0   : > { %v7317_v23 = vadd.f32 %v7314_v14, %v6677_v13  ;;  %v7300_v32 = vadd.f32 %v7297_v15, %v6796_v25 }
 0x3e1   : > { %v6800_v34 = vpop.f32.mrb[128].mxu0 }
 0x3e2   : > { %v6678_v55 = vpop.f32.mrb[160].mxu1  ;;  %v9680_v41 = vadd.f32 %v7317_v23, %v6799_v52  ;;  %v6801_v47 = vpop.f32.mrb[129].mxu0 }
 0x3e3   : > { %v6679_v18 = vpop.f32.mrb[161].mxu1  ;;  %v6802_v8 = vadd.f32 %v6801_v47, %v6800_v34  ;;  %v6803_v62 = vpop.f32.mrb[130].mxu0 }
 0x3e4   : > { %v6680_v1 = vadd.f32 %v6679_v18, %v6678_v55  ;;  %v6681_v11 = vpop.f32.mrb[162].mxu1  ;;  %v6804_v57 = vpop.f32.mrb[131].mxu0  ;;  %v7384_v18 = vadd.f32 %v9618_v10, %v9666_v54 }
 0x3e5   : > { %v6682_v39 = vpop.f32.mrb[163].mxu1  ;;  %v6805_v30 = vadd.f32 %v6804_v57, %v6803_v62  ;;  %v7404_v62 = vadd.f32 %v9620_v6, %v9666_v54  ;;  %v7374_v6 = vadd.f32 %v9622_v2, %v9666_v54 }
 0x3e6   : > { %v7347_v0 = vadd.f32 %v7344_v61, %v6680_v1  ;;  %v6683_v53 = vadd.f32 %v6682_v39, %v6681_v11 }
 0x3e8   : > { %v7367_v49 = vadd.f32 %v7364_v59, %v6683_v53  ;;  %v9686_v56 = vadd.f32 %v7347_v0, %v6802_v8 }
 0x3e9   : > { %v6806_v9 = vpop.f32.mrb[132].mxu0 }
 0x3ea   : > { %v6684_v58 = vpop.f32.mrb[164].mxu1  ;;  %v9688_v16 = vadd.f32 %v7367_v49, %v6805_v30  ;;  %v6807_v33 = vpop.f32.mrb[133].mxu0 }
 0x3eb   : > { %v6685_v42 = vpop.f32.mrb[165].mxu1  ;;  %v6808_v20 = vadd.f32 %v6807_v33, %v6806_v9  ;;  %v6809_v3 = vpop.f32.mrb[134].mxu0 }
 0x3ec   : > { %v6686_v21 = vadd.f32 %v6685_v42, %v6684_v58  ;;  %v6687_v29 = vpop.f32.mrb[166].mxu1  ;;  %v6810_v25 = vpop.f32.mrb[135].mxu0 }
 0x3ed   : > { %v6688_v38 = vpop.f32.mrb[167].mxu1  ;;  %v6811_v14 = vadd.f32 %v6810_v25, %v6809_v3  ;;  %v7394_v25 = vadd.f32 %v9624_v12, %v9666_v54  ;;  %v7424_v12 = vadd.f32 %v9626_v31, %v9666_v54 }
 0x3ee   : > { %v7337_v22 = vadd.f32 %v7334_v36, %v6686_v21  ;;  %v6689_v26 = vadd.f32 %v6688_v38, %v6687_v29 }
 0x3f0   : > { %v7357_v15 = vadd.f32 %v7354_v51, %v6689_v26  ;;  %v7340_v13 = vadd.f32 %v7337_v22, %v6808_v20 }
 0x3f1   : > { %v6812_v55 = vpop.f32.mrb[136].mxu0 }
 0x3f2   : > { %v6690_v52 = vpop.f32.mrb[168].mxu1  ;;  %v7360_v23 = vadd.f32 %v7357_v15, %v6811_v14  ;;  %v6813_v24 = vpop.f32.mrb[137].mxu0 }
 0x3f3   : > { %v6691_v34 = vpop.f32.mrb[169].mxu1  ;;  %v6814_v1 = vadd.f32 %v6813_v24, %v6812_v55  ;;  %v6815_v11 = vpop.f32.mrb[138].mxu0 }
 0x3f4   : > { %v6692_v47 = vadd.f32 %v6691_v34, %v6690_v52  ;;  %v6693_v61 = vpop.f32.mrb[170].mxu1  ;;  %v6816_v48 = vpop.f32.mrb[139].mxu0 }
 0x3f5   : > { %v6694_v8 = vpop.f32.mrb[171].mxu1  ;;  %v6817_v59 = vadd.f32 %v6816_v48, %v6815_v11 }
 0x3f6   : > { %v7387_v39 = vadd.f32 %v7384_v18, %v6692_v47  ;;  %v6695_v57 = vadd.f32 %v6694_v8, %v6693_v61  ;;  %v7444_v61 = vadd.f32 %v9628_v27, %v9666_v54  ;;  %v7414_v27 = vadd.f32 %v9632_v7, %v9666_v54 }
 0x3f8   : > { %v7407_v0 = vadd.f32 %v7404_v62, %v6695_v57  ;;  %v7390_v53 = vadd.f32 %v7387_v39, %v6814_v1 }
 0x3f9   : > { %v7156_v49 = vpop.f32.mrb[92].mxu0 }
 0x3fa   : > { %v6696_v10 = vpop.f32.mrb[172].mxu1  ;;  %v7410_v30 = vadd.f32 %v7407_v0, %v6817_v59  ;;  %v7303_v9 = vadd.f32 %v7300_v32, %v7156_v49  ;;  %v5572_v42 = vpop.f32.mrb[93].mxu0 }
 0x3fb   : > { %v6697_v58 = vpop.f32.mrb[173].mxu1  ;;  %v7313_v21 = vadd.f32 %v9672_v5, %v5572_v42  ;;  %v7157_v29 = vpop.f32.mrb[94].mxu0 }
 0x3fc   : > { %v6698_v33 = vadd.f32 %v6697_v58, %v6696_v10  ;;  %v6699_v36 = vpop.f32.mrb[174].mxu1  ;;  %5713 = vst [vmem:[%s9702_s18 + $0x10] sm:$0xff] %v7303_v9  ;;  %v7323_v3 = vadd.f32 %v9680_v41, %v7157_v29  ;;  %v5575_v38 = vpop.f32.mrb[95].mxu0  ;;  %v7434_v10 = vadd.f32 %v9634_v44, %v9666_v54 }
 0x3fd   : > { %v6700_v20 = vpop.f32.mrb[175].mxu1  ;;  %5711 = vst [vmem:[%s9702_s18] sm:$0xff] %v7313_v21  ;;  %v7333_v2 = vadd.f32 %v9674_v28, %v5575_v38 }
 0x3fe   : > { %v9711_v32 = vadd.f32 %v7374_v6, %v6698_v33  ;;  %v6701_v51 = vadd.f32 %v6700_v20, %v6699_v36  ;;  %5714 = vst [vmem:[%s9702_s18 + $0x18] sm:$0xff] %v7323_v3  ;;  %v7464_v36 = vadd.f32 %v9638_v63, %v9666_v54 }
 0x3ff   : > { %5712 = vst [vmem:[%s9702_s18 + $0x8] sm:$0xff] %v7333_v2 }
 0x400   : > { %v9716_v22 = vadd.f32 %v7394_v25, %v6701_v51 }
 0x401   : > { %v7160_v26 = vpop.f32.mrb[96].mxu0 }
 0x402   : > { %v6702_v5 = vpop.f32.mrb[176].mxu1  ;;  %v7343_v41 = vadd.f32 %v7340_v13, %v7160_v26  ;;  %v5588_v15 = vpop.f32.mrb[97].mxu0 }
 0x403   : > { %v6703_v14 = vpop.f32.mrb[177].mxu1  ;;  %v7353_v34 = vadd.f32 %v9686_v56, %v5588_v15  ;;  %v7161_v28 = vpop.f32.mrb[98].mxu0 }
 0x404   : > { %v6704_v52 = vadd.f32 %v6703_v14, %v6702_v5  ;;  %v6705_v55 = vpop.f32.mrb[178].mxu1  ;;  %5717 = vst [vmem:[%s9702_s18 + $0x30] sm:$0xff] %v7343_v41  ;;  %v7363_v18 = vadd.f32 %v7360_v23, %v7161_v28  ;;  %v5591_v47 = vpop.f32.mrb[99].mxu0  ;;  %v7454_v14 = vadd.f32 %v9643_v37, %v9666_v54 }
 0x405   : > { %v6706_v24 = vpop.f32.mrb[179].mxu1  ;;  %5715 = vst [vmem:[%s9702_s18 + $0x20] sm:$0xff] %v7353_v34  ;;  %v7373_v11 = vadd.f32 %v9688_v16, %v5591_v47 }
 0x406   : > { %v9725_v1 = vadd.f32 %v7424_v12, %v6704_v52  ;;  %v6707_v13 = vadd.f32 %v6706_v24, %v6705_v55  ;;  %5718 = vst [vmem:[%s9702_s18 + $0x38] sm:$0xff] %v7363_v18  ;;  %v7474_v55 = vadd.f32 %v9645_v50, %v9666_v54 }
 0x407   : > { %5716 = vst [vmem:[%s9702_s18 + $0x28] sm:$0xff] %v7373_v11 }
 0x408   : > { %v9730_v31 = vadd.f32 %v7444_v61, %v6707_v13  ;;  %v7504_v13 = vadd.f32 %v9647_v43, %v9666_v54 }
 0x409   : > { %v9733_v8 = vpop.f32.mrb[100].mxu0 }
 0x40a   : > { %v6708_v56 = vpop.f32.mrb[180].mxu1  ;;  %v5604_v48 = vpop.f32.mrb[101].mxu0 }
 0x40b   : > { %v6709_v23 = vpop.f32.mrb[181].mxu1  ;;  %v7393_v57 = vadd.f32 %v7390_v53, %v5604_v48  ;;  %v9737_v59 = vpop.f32.mrb[102].mxu0 }
 0x40c   : > { %v6710_v62 = vadd.f32 %v6709_v23, %v6708_v56  ;;  %v6711_v39 = vpop.f32.mrb[182].mxu1  ;;  %v5607_v0 = vpop.f32.mrb[103].mxu0 }
 0x40d   : > { %v6712_v16 = vpop.f32.mrb[183].mxu1  ;;  %5719 = vst [vmem:[%s9702_s18 + $0x40] sm:$0xff] %v7393_v57  ;;  %v7413_v9 = vadd.f32 %v7410_v30, %v5607_v0  ;;  %v7484_v30 = vadd.f32 %v9640_v45, %v9666_v54 }
 0x40e   : > { %v9741_v49 = vadd.f32 %v7414_v27, %v6710_v62  ;;  %v6713_v58 = vadd.f32 %v6712_v16, %v6711_v39  ;;  %v7524_v27 = vadd.f32 %v9649_v19, %v9666_v54 }
 0x40f   : > { %5720 = vst [vmem:[%s9702_s18 + $0x48] sm:$0xff] %v7413_v9 }
 0x410   : > { %v9744_v42 = vadd.f32 %v7434_v10, %v6713_v58  ;;  %v7494_v58 = vadd.f32 %v9651_v46, %v9666_v54  ;;  %v7544_v46 = vadd.f32 %v9655_v60, %v9666_v54 }
 0x411   : > { %v9747_v7 = vpop.f32.mrb[104].mxu0 }
 0x412   : > { %v6714_v6 = vpop.f32.mrb[184].mxu1  ;;  %v9749_v53 = vpop.f32.mrb[105].mxu0 }
 0x413   : > { %v6715_v33 = vpop.f32.mrb[185].mxu1  ;;  %v9753_v44 = vpop.f32.mrb[106].mxu0 }
 0x414   : > { %v6716_v21 = vadd.f32 %v6715_v33, %v6714_v6  ;;  %v6717_v29 = vpop.f32.mrb[186].mxu1  ;;  %v9755_v3 = vpop.f32.mrb[107].mxu0 }
 0x415   : > { %v6718_v20 = vpop.f32.mrb[187].mxu1 }
 0x416   : > { %v9759_v38 = vadd.f32 %v7464_v36, %v6716_v21  ;;  %v6719_v25 = vadd.f32 %v6718_v20, %v6717_v29  ;;  %v7514_v21 = vadd.f32 %v9653_v40, %v9666_v54 }
 0x418   : > { %v9761_v51 = vadd.f32 %v7484_v30, %v6719_v25 }
 0x419   : > { %v9763_v5 = vpop.f32.mrb[108].mxu0 }
 0x41a   : > { %v6720_v2 = vpop.f32.mrb[188].mxu1  ;;  %v9765_v63 = vpop.f32.mrb[109].mxu0 }
 0x41b   : > { %v6721_v26 = vpop.f32.mrb[189].mxu1  ;;  %v9769_v12 = vpop.f32.mrb[110].mxu0 }
 0x41c   : > { %v6722_v41 = vadd.f32 %v6721_v26, %v6720_v2  ;;  %v6723_v15 = vpop.f32.mrb[190].mxu1  ;;  %v9771_v45 = vpop.f32.mrb[111].mxu0 }
 0x41d   : > { %v6724_v52 = vpop.f32.mrb[191].mxu1 }
 0x41e   : > { %v9775_v34 = vadd.f32 %v7454_v14, %v6722_v41  ;;  %v6725_v28 = vadd.f32 %v6724_v52, %v6723_v15  ;;  %v7564_v15 = vadd.f32 %v9657_v17, %v9666_v54 }
 0x420   : > { %v9777_v24 = vadd.f32 %v7474_v55, %v6725_v28 }
 0x421   : > { %v9779_v47 = vpop.f32.mrb[112].mxu0 }
 0x422   : > { %v6726_v18 = vpop.f32.mrb[192].mxu1  ;;  %v9781_v37 = vpop.f32.mrb[113].mxu0 }
 0x423   : > { %v6727_v61 = vpop.f32.mrb[193].mxu1  ;;  %v9785_v23 = vpop.f32.mrb[114].mxu0 }
 0x424   : > { %v6728_v11 = vadd.f32 %v6727_v61, %v6726_v18  ;;  %v6729_v56 = vpop.f32.mrb[194].mxu1  ;;  %v9787_v50 = vpop.f32.mrb[115].mxu0  ;;  %v7534_v61 = vadd.f32 %v9659_v35, %v9666_v54 }
 0x425   : > { %v6730_v48 = vpop.f32.mrb[195].mxu1 }
 0x426   : > { %v9791_v62 = vadd.f32 %v7504_v13, %v6728_v11  ;;  %v6731_v39 = vadd.f32 %v6730_v48, %v6729_v56  ;;  %v7554_v56 = vadd.f32 %v9661_v4, %v9666_v54 }
 0x428   : > { %v9793_v57 = vadd.f32 %v7524_v27, %v6731_v39 }
 0x429   : > { %v9795_v0 = vpop.f32.mrb[116].mxu0 }
 0x42a   : > { %v6732_v16 = vpop.f32.mrb[196].mxu1  ;;  %v9797_v43 = vpop.f32.mrb[117].mxu0 }
 0x42b   : > { %v6733_v10 = vpop.f32.mrb[197].mxu1  ;;  %v9801_v33 = vpop.f32.mrb[118].mxu0 }
 0x42c   : > { %v6734_v9 = vadd.f32 %v6733_v10, %v6732_v16  ;;  %v6735_v6 = vpop.f32.mrb[198].mxu1  ;;  %v9803_v19 = vpop.f32.mrb[119].mxu0 }
 0x42d   : > { %v6736_v36 = vpop.f32.mrb[199].mxu1 }
 0x42e   : > { %v9807_v29 = vadd.f32 %v7494_v58, %v6734_v9  ;;  %v6737_v20 = vadd.f32 %v6736_v36, %v6735_v6 }
 0x430   : > { %v9809_v30 = vadd.f32 %v7514_v21, %v6737_v20 }
 0x432   : > { %v6738_v25 = vpop.f32.mrb[200].mxu1 }
 0x433   : > { %v6739_v2 = vpop.f32.mrb[201].mxu1 }
 0x434   : > { %v6740_v26 = vadd.f32 %v6739_v2, %v6738_v25  ;;  %v6741_v14 = vpop.f32.mrb[202].mxu1 }
 0x435   : > { %v6742_v41 = vpop.f32.mrb[203].mxu1 }
 0x436   : > { %v9815_v52 = vadd.f32 %v7544_v46, %v6740_v26  ;;  %v6743_v55 = vadd.f32 %v6742_v41, %v6741_v14 }
 0x438   : > { %v9817_v40 = vadd.f32 %v7564_v15, %v6743_v55 }
 0x43a   : > { %v6744_v28 = vpop.f32.mrb[204].mxu1 }
 0x43b   : > { %v6745_v18 = vpop.f32.mrb[205].mxu1 }
 0x43c   : > { %v6746_v13 = vadd.f32 %v6745_v18, %v6744_v28  ;;  %v6747_v11 = vpop.f32.mrb[206].mxu1 }
 0x43d   : > { %v6748_v60 = vpop.f32.mrb[207].mxu1 }
 0x43e   : > { %v9823_v48 = vadd.f32 %v7534_v61, %v6746_v13  ;;  %v6749_v17 = vadd.f32 %v6748_v60, %v6747_v11 }
 0x440   : > { %v9825_v27 = vadd.f32 %v7554_v56, %v6749_v17 }
 0x442   : > { %v6818_v39 = vpop.f32.mrb[208].mxu1 }
 0x443   : > { %v6819_v16 = vpop.f32.mrb[209].mxu1 }
 0x444   : > { %v6820_v10 = vadd.f32 %v6819_v16, %v6818_v39  ;;  %v6821_v58 = vpop.f32.mrb[210].mxu1 }
 0x445   : > { %v6822_v9 = vpop.f32.mrb[211].mxu1 }
 0x446   : > { %v7380_v35 = vadd.f32 %v9711_v32, %v6820_v10  ;;  %v6823_v6 = vadd.f32 %v6822_v9, %v6821_v58 }
 0x448   : > { %v7383_v36 = vadd.f32 %v7380_v35, %v9733_v8  ;;  %v7400_v21 = vadd.f32 %v9716_v22, %v6823_v6 }
 0x44a   : > { %5721 = vst [vmem:[%s9702_s18 + $0x50] sm:$0xff] %v7383_v36  ;;  %v7403_v4 = vadd.f32 %v7400_v21, %v9737_v59  ;;  %v6824_v54 = vpop.f32.mrb[212].mxu1 }
 0x44b   : > { %v6825_v20 = vpop.f32.mrb[213].mxu1 }
 0x44c   : > { %5722 = vst [vmem:[%s9702_s18 + $0x58] sm:$0xff] %v7403_v4  ;;  %v6826_v25 = vadd.f32 %v6825_v20, %v6824_v54  ;;  %v6827_v2 = vpop.f32.mrb[214].mxu1 }
 0x44d   : > { %v6828_v46 = vpop.f32.mrb[215].mxu1 }
 0x44e   : > { %v7430_v26 = vadd.f32 %v9725_v1, %v6826_v25  ;;  %v6829_v32 = vadd.f32 %v6828_v46, %v6827_v2 }
 0x450   : > { %v7433_v14 = vadd.f32 %v7430_v26, %v9749_v53  ;;  %v7450_v8 = vadd.f32 %v9730_v31, %v6829_v32 }
 0x452   : > { %5723 = vst [vmem:[%s9702_s18 + $0x60] sm:$0xff] %v7433_v14  ;;  %v7453_v22 = vadd.f32 %v7450_v8, %v9755_v3  ;;  %v6830_v41 = vpop.f32.mrb[216].mxu1 }
 0x453   : > { %v6831_v59 = vpop.f32.mrb[217].mxu1 }
 0x454   : > { %5724 = vst [vmem:[%s9702_s18 + $0x68] sm:$0xff] %v7453_v22  ;;  %v6832_v15 = vadd.f32 %v6831_v59, %v6830_v41  ;;  %v6833_v55 = vpop.f32.mrb[218].mxu1 }
 0x455   : > { %v6834_v28 = vpop.f32.mrb[219].mxu1 }
 0x456   : > { %v7420_v18 = vadd.f32 %v9741_v49, %v6832_v15  ;;  %v6835_v1 = vadd.f32 %v6834_v28, %v6833_v55 }
 0x458   : > { %v7423_v61 = vadd.f32 %v7420_v18, %v9747_v7  ;;  %v7440_v53 = vadd.f32 %v9744_v42, %v6835_v1 }
 0x45a   : > { %5725 = vst [vmem:[%s9702_s18 + $0x70] sm:$0xff] %v7423_v61  ;;  %v7443_v31 = vadd.f32 %v7440_v53, %v9753_v44  ;;  %v6836_v13 = vpop.f32.mrb[220].mxu1 }
 0x45b   : > { %v6837_v3 = vpop.f32.mrb[221].mxu1 }
 0x45c   : > { %5726 = vst [vmem:[%s9702_s18 + $0x78] sm:$0xff] %v7443_v31  ;;  %v6838_v11 = vadd.f32 %v6837_v3, %v6836_v13  ;;  %v6839_v60 = vpop.f32.mrb[222].mxu1 }
 0x45d   : > { %v6840_v56 = vpop.f32.mrb[223].mxu1 }
 0x45e   : > { %v7470_v17 = vadd.f32 %v9759_v38, %v6838_v11  ;;  %v6841_v49 = vadd.f32 %v6840_v56, %v6839_v60 }
 0x460   : > { %v7473_v39 = vadd.f32 %v7470_v17, %v9765_v63  ;;  %v7490_v7 = vadd.f32 %v9761_v51, %v6841_v49 }
 0x462   : > { %5727 = vst [vmem:[%s9702_s18 + $0x80] sm:$0xff] %v7473_v39  ;;  %v7493_v42 = vadd.f32 %v7490_v7, %v9771_v45  ;;  %v6842_v16 = vpop.f32.mrb[224].mxu1 }
 0x463   : > { %v6843_v44 = vpop.f32.mrb[225].mxu1 }
 0x464   : > { %5728 = vst [vmem:[%s9702_s18 + $0x88] sm:$0xff] %v7493_v42  ;;  %v6844_v10 = vadd.f32 %v6843_v44, %v6842_v16  ;;  %v6845_v58 = vpop.f32.mrb[226].mxu1 }
 0x465   : > { %v6846_v9 = vpop.f32.mrb[227].mxu1 }
 0x466   : > { %v7460_v35 = vadd.f32 %v9775_v34, %v6844_v10  ;;  %v6847_v38 = vadd.f32 %v6846_v9, %v6845_v58 }
 0x468   : > { %v7463_v6 = vadd.f32 %v7460_v35, %v9763_v5  ;;  %v7480_v63 = vadd.f32 %v9777_v24, %v6847_v38 }
 0x46a   : > { %5729 = vst [vmem:[%s9702_s18 + $0x90] sm:$0xff] %v7463_v6  ;;  %v7483_v51 = vadd.f32 %v7480_v63, %v9769_v12  ;;  %v6848_v36 = vpop.f32.mrb[228].mxu1 }
 0x46b   : > { %v6849_v45 = vpop.f32.mrb[229].mxu1 }
 0x46c   : > { %5730 = vst [vmem:[%s9702_s18 + $0x98] sm:$0xff] %v7483_v51  ;;  %v6850_v21 = vadd.f32 %v6849_v45, %v6848_v36  ;;  %v6851_v4 = vpop.f32.mrb[230].mxu1 }
 0x46d   : > { %v6852_v54 = vpop.f32.mrb[231].mxu1 }
 0x46e   : > { %v7510_v20 = vadd.f32 %v9791_v62, %v6850_v21  ;;  %v6853_v34 = vadd.f32 %v6852_v54, %v6851_v4 }
 0x470   : > { %v7513_v25 = vadd.f32 %v7510_v20, %v9781_v37  ;;  %v7530_v5 = vadd.f32 %v9793_v57, %v6853_v34 }
 0x472   : > { %5731 = vst [vmem:[%s9702_s18 + $0xa0] sm:$0xff] %v7513_v25  ;;  %v7533_v24 = vadd.f32 %v7530_v5, %v9787_v50  ;;  %v6854_v2 = vpop.f32.mrb[232].mxu1 }
 0x473   : > { %v6855_v12 = vpop.f32.mrb[233].mxu1 }
 0x474   : > { %5732 = vst [vmem:[%s9702_s18 + $0xa8] sm:$0xff] %v7533_v24  ;;  %v6856_v46 = vadd.f32 %v6855_v12, %v6854_v2  ;;  %v6857_v26 = vpop.f32.mrb[234].mxu1 }
 0x475   : > { %v6858_v32 = vpop.f32.mrb[235].mxu1 }
 0x476   : > { %v7500_v14 = vadd.f32 %v9807_v29, %v6856_v46  ;;  %v6859_v62 = vadd.f32 %v6858_v32, %v6857_v26 }
 0x478   : > { %v7503_v8 = vadd.f32 %v7500_v14, %v9779_v47  ;;  %v7520_v37 = vadd.f32 %v9809_v30, %v6859_v62 }
 0x47a   : > { %5733 = vst [vmem:[%s9702_s18 + $0xb0] sm:$0xff] %v7503_v8  ;;  %v7523_v57 = vadd.f32 %v7520_v37, %v9785_v23  ;;  %v6860_v22 = vpop.f32.mrb[236].mxu1 }
 0x47b   : > { %v6861_v50 = vpop.f32.mrb[237].mxu1 }
 0x47c   : > { %5734 = vst [vmem:[%s9702_s18 + $0xb8] sm:$0xff] %v7523_v57  ;;  %v6862_v41 = vadd.f32 %v6861_v50, %v6860_v22  ;;  %v6863_v59 = vpop.f32.mrb[238].mxu1 }
 0x47d   : > { %v6864_v15 = vpop.f32.mrb[239].mxu1 }
 0x47e   : > { %v7550_v55 = vadd.f32 %v9815_v52, %v6862_v41  ;;  %v6865_v29 = vadd.f32 %v6864_v15, %v6863_v59 }
 0x480   : > { %v7553_v28 = vadd.f32 %v7550_v55, %v9797_v43  ;;  %v7570_v47 = vadd.f32 %v9817_v40, %v6865_v29 }
 0x482   : > { %5735 = vst [vmem:[%s9702_s18 + $0xc0] sm:$0xff] %v7553_v28  ;;  %v7573_v30 = vadd.f32 %v7570_v47, %v9803_v19  ;;  %v6866_v18 = vpop.f32.mrb[240].mxu1 }
 0x483   : > { %v6867_v23 = vpop.f32.mrb[241].mxu1 }
 0x484   : > { %5736 = vst [vmem:[%s9702_s18 + $0xc8] sm:$0xff] %v7573_v30  ;;  %v6868_v1 = vadd.f32 %v6867_v23, %v6866_v18  ;;  %v6869_v61 = vpop.f32.mrb[242].mxu1 }
 0x485   : > { %v6870_v53 = vpop.f32.mrb[243].mxu1 }
 0x486   : > { %v7540_v31 = vadd.f32 %v9823_v48, %v6868_v1  ;;  %v6871_v13 = vadd.f32 %v6870_v53, %v6869_v61 }
 0x488   : > { %v7543_v52 = vadd.f32 %v7540_v31, %v9795_v0  ;;  %v7560_v3 = vadd.f32 %v9825_v27, %v6871_v13 }
 0x48a   : > { %5737 = vst [vmem:[%s9702_s18 + $0xd0] sm:$0xff] %v7543_v52  ;;  %v7563_v43 = vadd.f32 %v7560_v3, %v9801_v33 }
 0x48c   : > { %5738 = vst [vmem:[%s9702_s18 + $0xd8] sm:$0xff] %v7563_v43 }
 0x48d PF: > { %s19_s30 = sadd.s32 1, %s7975_s30  }
 0x48e   : > { %p16_p4 = scmp.ge.s32.totalorder %s19_s30, 4  }
 0x490   :  { %18 = sbr.rel (!%p16_p4) target bundleno = 1 (0x1), region = 96 }

</bundles_post_ra>
